<compile_context>
chip_gen: v7x
topology: tpu7x:2x2x1
jax: 0.10.0
libtpu: 0.0.40
codegen_flags: <defaults>
</compile_context>

<pallas_src>
import functools

import jax
import jax.numpy as jnp
from jax.experimental import pallas as pl
from jax.experimental.pallas import tpu as pltpu

_SUBLANE = 8  # f32 sublane tile; all channel counts are padded to this.


def _ceil_to(x, m):
    return (x + m - 1) // m * m


def _pick_nb(n, max_nb=8):
    """Largest batch-fold factor NB that divides n, is <= max_nb, and keeps at
    least 2 grid steps (so the "parallel" batch axis can still be sharded
    across both TensorCores on v7x)."""
    best = 1
    for nb in range(1, min(n, max_nb) + 1):
        if n % nb == 0 and n // nb >= 2:
            best = nb
    return best


def _border_masks(H, W, NB):
    """(16, NB*H*W) f32 tap-validity masks (rows 0..8 used, padded to 16 rows).

    Built host-side once and DMA'd into VMEM a single time (constant
    index_map).  Masks are keyed to the pixel index *within* each folded
    image, so the roll-based im2col stays correct when NB images share the
    lane axis: every lane where a roll would leak across an image boundary is
    a border pixel and therefore masked to zero.
    """
    HW = H * W
    L = NB * HW
    p = jnp.arange(L, dtype=jnp.int32)
    row = (p // W) % H
    col = p % W
    rows = []
    for dy in range(3):
        for dx in range(3):
            r = row + (dy - 1)
            c = col + (dx - 1)
            ok = (r >= 0) & (r < H) & (c >= 0) & (c < W)
            rows.append(ok.astype(jnp.float32))
    m = jnp.stack(rows, axis=0)                              # (9, L)
    return jnp.pad(m, ((0, 2 * _SUBLANE - 9), (0, 0)))       # (16, L)


# ----------------------------------------------------------------------------
# Fused Pallas kernel: the entire poseseg forward for NB batch elements.
# ----------------------------------------------------------------------------
def _poseseg_fused_kernel(
    x_ref, masks_ref,
    pw1a, pw1b, pb1,
    pw2, pb2,
    pw3a, pw3b, pb3,
    pw4, pb4,
    sw1a, sw1b, sb1,
    sw2, sb2,
    sw3a, sw3b, sb3,
    sw4, sb4,
    out_ref,
    *, H, W, NB, ci_p,
):
    L = NB * H * W
    f32 = jnp.float32
    masks = masks_ref[...]                       # (16, L) f32, rows 0..8 valid
    taps = [(dy, dx) for dy in range(3) for dx in range(3)]

    def im2col(x):
        # x: (Cp, L) f32 -> (9*Cp, L) bf16 patch, tap-major row order.
        # Spatial shifts are XLU lane rolls; out-of-image taps (including any
        # roll that would leak into a neighbouring folded image) are masked.
        parts = []
        for t, (dy, dx) in enumerate(taps):
            off = (dy - 1) * W + (dx - 1)
            if off == 0:
                parts.append(x)                  # center tap: no shift / mask
            else:
                shifted = pltpu.roll(x, shift=(-off) % L, axis=1)
                parts.append(shifted * masks[t:t + 1])
        return jnp.concatenate(parts, axis=0).astype(jnp.bfloat16)

    def conv(wps, b_ref, act):
        # Conv over a (possibly concatenated) input = sum of per-segment
        # (Cout_p, 9*Cseg_p) @ (9*Cseg_p, L) bf16 MXU matmuls, f32 accumulate.
        # Splitting by segment lets the im2col patches be cached and reused
        # across layers without any misaligned bf16 sublane concats.
        y = None
        for w_ref, patch in wps:
            d = jnp.dot(w_ref[...], patch, preferred_element_type=f32)
            y = d if y is None else y + d
        y = y + b_ref[...]
        if act == "relu":
            y = jnp.maximum(y, 0.0)
        elif act == "sigmoid":
            y = jax.nn.sigmoid(y)
        return y                                 # (Cout_p, L) f32

    x = x_ref[0]                                 # (ci_p + ck_p, L) f32
    img = x[:ci_p]
    heat = x[ci_p:]

    # Patches reused across layers: img (pose c1 + seg c1), f1 (pose c2 + c3),
    # g1 (seg c2 + c3).
    P_img = im2col(img)
    P_heat = im2col(heat)

    # posenet: two heatmap stages (all intermediates stay on-chip).
    f1 = conv([(pw1a, P_img), (pw1b, P_heat)], pb1, "relu")
    P_f1 = im2col(f1)
    h1 = conv([(pw2, P_f1)], pb2, "none")
    P_h1 = im2col(h1)
    f2 = conv([(pw3a, P_f1), (pw3b, P_h1)], pb3, "relu")
    P_f2 = im2col(f2)
    h2 = conv([(pw4, P_f2)], pb4, "none")
    P_h2 = im2col(h2)

    # segnet: conditioned on the last partial heatmap, two mask stages.
    g1 = conv([(sw1a, P_img), (sw1b, P_h2)], sb1, "relu")
    P_g1 = im2col(g1)
    m1 = conv([(sw2, P_g1)], sb2, "sigmoid")
    P_m1 = im2col(m1)
    g2 = conv([(sw3a, P_g1), (sw3b, P_m1)], sb3, "relu")
    P_g2 = im2col(g2)
    m2 = conv([(sw4, P_g2)], sb4, "sigmoid")

    # Single sublane-aligned output slab -> one unmasked store / one DMA.
    out_ref[0] = jnp.concatenate([h1, h2, m1, m2], axis=0)


def _poseseg_fused(flat_params, x_in, masks, out_rows, *, H, W, NB, ci_p):
    G, cin_rows, L = x_in.shape

    in_specs = [
        pl.BlockSpec((1, cin_rows, L), lambda g: (g, 0, 0)),
        pl.BlockSpec(masks.shape, lambda g: (0, 0)),
    ]
    for p in flat_params:
        # Constant index_map -> each weight/bias is DMA'd into VMEM exactly
        # once and stays resident across the whole grid.
        in_specs.append(pl.BlockSpec(p.shape, lambda g: (0, 0)))

    out_shape = jax.ShapeDtypeStruct((G, out_rows, L), jnp.float32)
    out_specs = pl.BlockSpec((1, out_rows, L), lambda g: (g, 0, 0))

    kernel = functools.partial(_poseseg_fused_kernel, H=H, W=W, NB=NB, ci_p=ci_p)
    return pl.pallas_call(
        kernel,
        out_shape=out_shape,
        grid_spec=pltpu.PrefetchScalarGridSpec(
            num_scalar_prefetch=0,
            grid=(G,),
            in_specs=in_specs,
            out_specs=out_specs,
        ),
        compiler_params=pltpu.CompilerParams(
            dimension_semantics=("parallel",),   # batch -> both TCs on v7x
            vmem_limit_bytes=32 * 1024 * 1024,   # explicit, safe on v5e/v6e/v7x
        ),
    )(x_in, masks, *flat_params)


# ----------------------------------------------------------------------------
# Parameter construction (deterministic, synthetic) + kernel-layout packing
# ----------------------------------------------------------------------------
def _conv_params(key, cin, cout, scale=0.1):
    kw, kb = jax.random.split(key)
    w = scale * jax.random.normal(kw, (3, 3, cin, cout), jnp.float32)  # HWIO
    b = scale * jax.random.normal(kb, (cout,), jnp.float32)
    return {"w": w, "b": b}


def init_poseseg_params(key, img_ch=3, heat_ch=4, hidden=8):
    ks = jax.random.split(key, 8)
    pose = {
        "c1": _conv_params(ks[0], img_ch + heat_ch, hidden),  # img + full_heat
        "c2": _conv_params(ks[1], hidden, heat_ch),           # -> heat stage 1
        "c3": _conv_params(ks[2], hidden + heat_ch, hidden),  # refine
        "c4": _conv_params(ks[3], hidden, heat_ch),           # -> heat stage 2
    }
    seg = {
        "c1": _conv_params(ks[4], img_ch + heat_ch, hidden),  # img + preheat[-1]
        "c2": _conv_params(ks[5], hidden, 1),                 # -> mask stage 1
        "c3": _conv_params(ks[6], hidden + 1, hidden),        # refine
        "c4": _conv_params(ks[7], hidden, 1),                 # -> mask stage 2
    }
    return {"pose": pose, "seg": seg}


def _pack_weight_segment(w, cin_start, cin_real):
    """(3,3,Cin,Cout) HWIO -> per-segment (Cout_p, 9*Cseg_p) bf16, tap-major
    column order matching im2col(segment)."""
    cout = w.shape[3]
    cin_p = _ceil_to(cin_real, _SUBLANE)
    cout_p = _ceil_to(cout, _SUBLANE)
    rows = []
    for dy in range(3):
        for dx in range(3):
            blk = w[dy, dx, cin_start:cin_start + cin_real, :]   # (Cseg, Cout)
            rows.append(jnp.pad(blk, ((0, cin_p - cin_real), (0, 0))))
    wp = jnp.concatenate(rows, axis=0)                           # (9*Cseg_p, Cout)
    wp = jnp.pad(wp, ((0, 0), (0, cout_p - cout)))
    return jnp.transpose(wp, (1, 0)).astype(jnp.bfloat16)        # (Cout_p, 9*Cseg_p)


def _pack_bias(b):
    cout = b.shape[0]
    cout_p = _ceil_to(cout, _SUBLANE)
    return jnp.pad(b, (0, cout_p - cout)).reshape(cout_p, 1).astype(jnp.float32)


def pack_poseseg_params(params, img_ch, heat_ch, hidden):
    p, s = params["pose"], params["seg"]
    out = []
    # pose c1: conv(concat(img, full_heat)) -> split segments img / heat
    out += [_pack_weight_segment(p["c1"]["w"], 0, img_ch),
            _pack_weight_segment(p["c1"]["w"], img_ch, heat_ch),
            _pack_bias(p["c1"]["b"])]
    # pose c2: conv(f1) -> heat stage 1
    out += [_pack_weight_segment(p["c2"]["w"], 0, hidden), _pack_bias(p["c2"]["b"])]
    # pose c3: conv(concat(f1, h1))
    out += [_pack_weight_segment(p["c3"]["w"], 0, hidden),
            _pack_weight_segment(p["c3"]["w"], hidden, heat_ch),
            _pack_bias(p["c3"]["b"])]
    # pose c4: conv(f2) -> heat stage 2
    out += [_pack_weight_segment(p["c4"]["w"], 0, hidden), _pack_bias(p["c4"]["b"])]
    # seg c1: conv(concat(img, preheat[-1]))
    out += [_pack_weight_segment(s["c1"]["w"], 0, img_ch),
            _pack_weight_segment(s["c1"]["w"], img_ch, heat_ch),
            _pack_bias(s["c1"]["b"])]
    # seg c2: conv(g1) -> mask stage 1
    out += [_pack_weight_segment(s["c2"]["w"], 0, hidden), _pack_bias(s["c2"]["b"])]
    # seg c3: conv(concat(g1, m1))
    out += [_pack_weight_segment(s["c3"]["w"], 0, hidden),
            _pack_weight_segment(s["c3"]["w"], hidden, 1),
            _pack_bias(s["c3"]["b"])]
    # seg c4: conv(g2) -> mask stage 2
    out += [_pack_weight_segment(s["c4"]["w"], 0, hidden), _pack_bias(s["c4"]["b"])]
    return out


# ----------------------------------------------------------------------------
# poseseg forward (single fused Pallas kernel under the hood)
# ----------------------------------------------------------------------------
def poseseg_forward(params, data, use_full_heat=True, packed=None, nb=None):
    img = data["img"]                       # (N, C, H, W), PyTorch-style NCHW
    N, C, H, W = img.shape
    heat0 = data["input_heat"][0]
    K = heat0.shape[1]
    HW = H * W

    if use_full_heat:
        full_heat = heat0
    else:
        # TODO(synk): branch where posenet runs without full_heat conditioning;
        # the synthetic posenet here always consumes a (zeroed) heat tensor.
        full_heat = jnp.zeros_like(heat0)

    if packed is None:
        hidden = params["pose"]["c2"]["w"].shape[2]
        packed = pack_poseseg_params(params, img_ch=C, heat_ch=K, hidden=hidden)

    NB = nb if nb is not None else _pick_nb(N)
    G = N // NB
    L = NB * HW

    ci_p = _ceil_to(C, _SUBLANE)
    ck_p = _ceil_to(K, _SUBLANE)
    hp = _ceil_to(K, _SUBLANE)
    mp = _SUBLANE
    out_rows = 2 * hp + 2 * mp

    # Single input slab (N, ci_p+ck_p, HW): img rows [0:C], heat rows [ci_p:ci_p+K].
    # NCHW flattened is already channels-major (C, H*W): no transposes needed.
    x = jnp.zeros((N, ci_p + ck_p, HW), jnp.float32)
    x = x.at[:, :C].set(img.astype(jnp.float32).reshape(N, C, HW))
    x = x.at[:, ci_p:ci_p + K].set(full_heat.astype(jnp.float32).reshape(N, K, HW))
    # Fold NB batch elements into the lane axis: (G, ci_p+ck_p, NB*HW).
    x_in = (x.reshape(G, NB, ci_p + ck_p, HW)
             .transpose(0, 2, 1, 3)
             .reshape(G, ci_p + ck_p, L))

    masks = _border_masks(H, W, NB)

    slab = _poseseg_fused(packed, x_in, masks, out_rows, H=H, W=W, NB=NB, ci_p=ci_p)

    # Unfold batch from the lane axis and slice out the real channels.
    slab = (slab.reshape(G, out_rows, NB, HW)
                .transpose(0, 2, 1, 3)
                .reshape(N, out_rows, H, W))
    h1 = slab[:, 0:K]
    h2 = slab[:, hp:hp + K]
    m1 = slab[:, 2 * hp:2 * hp + 1]
    m2 = slab[:, 2 * hp + mp:2 * hp + mp + 1]

    partialheat = [h1, h2]
    pre_mask = [m1, m2]
    return dict(
        mask=pre_mask[-1],
        heatmap=data["input_heat"][-1],
        premask=pre_mask,
        preheat=partialheat,
    )


# ----------------------------------------------------------------------------
# Pure-JAX reference (XLA conv) for correctness checking
# ----------------------------------------------------------------------------
def _conv3x3_ref(x, w, b, act):
    y = jax.lax.conv_general_dilated(
        x, w, window_strides=(1, 1), padding=((1, 1), (1, 1)),
        dimension_numbers=("NCHW", "HWIO", "NCHW"),
        precision=jax.lax.Precision.HIGHEST)
    y = y + b.reshape(1, -1, 1, 1)
    if act == "relu":
        y = jnp.maximum(y, 0.0)
    elif act == "sigmoid":
        y = jax.nn.sigmoid(y)
    return y


def poseseg_forward_ref(params, data, use_full_heat=True):
    img = data["img"]
    heat0 = data["input_heat"][0]
    full_heat = heat0 if use_full_heat else jnp.zeros_like(heat0)
    p, s = params["pose"], params["seg"]
    f1 = _conv3x3_ref(jnp.concatenate([img, full_heat], axis=1),
                      p["c1"]["w"], p["c1"]["b"], "relu")
    h1 = _conv3x3_ref(f1, p["c2"]["w"], p["c2"]["b"], "none")
    f2 = _conv3x3_ref(jnp.concatenate([f1, h1], axis=1),
                      p["c3"]["w"], p["c3"]["b"], "relu")
    h2 = _conv3x3_ref(f2, p["c4"]["w"], p["c4"]["b"], "none")
    g1 = _conv3x3_ref(jnp.concatenate([img, h2], axis=1),
                      s["c1"]["w"], s["c1"]["b"], "relu")
    m1 = _conv3x3_ref(g1, s["c2"]["w"], s["c2"]["b"], "sigmoid")
    g2 = _conv3x3_ref(jnp.concatenate([g1, m1], axis=1),
                      s["c3"]["w"], s["c3"]["b"], "relu")
    m2 = _conv3x3_ref(g2, s["c4"]["w"], s["c4"]["b"], "sigmoid")
    return dict(mask=m2, heatmap=data["input_heat"][-1],
                premask=[m1, m2], preheat=[h1, h2])


# ----------------------------------------------------------------------------
# Demo
# ----------------------------------------------------------------------------
if __name__ == "__main__":
    key = jax.random.PRNGKey(0)
    k_img, k_h0, k_h1, k_par = jax.random.split(key, 4)

    N, C, H, W = 4, 3, 16, 16     # img: NCHW, like the PyTorch module
    K = 4                          # number of heatmap channels
    HID = 8                        # hidden channels of synthetic sub-nets

    img = jax.random.normal(k_img, (N, C, H, W), jnp.float32)
    heat0 = jax.random.normal(k_h0, (N, K, H, W), jnp.float32)
    heat1 = jax.random.normal(k_h1, (N, K, H, W), jnp.float32)
    data = {"img": img, "input_heat": [heat0, heat1]}

    params = init_poseseg_params(k_par, img_ch=C, heat_ch=K, hidden=HID)
    packed = pack_poseseg_params(params, img_ch=C, heat_ch=K, hidden=HID)

    out = poseseg_forward(params, data, use_full_heat=True, packed=packed)
    jax.block_until_ready(out["mask"])
    jax.block_until_ready(out["premask"][0])
    jax.block_until_ready(out["preheat"][-1])

    assert out["mask"].shape == (N, 1, H, W)
    assert out["heatmap"].shape == (N, K, H, W)
    assert len(out["premask"]) == 2 and len(out["preheat"]) == 2

    # Correctness vs. a pure-JAX reference of the same network (tolerance
    # reflects bf16 MXU matmuls with f32 accumulation; tightened from 1e-1 to
    # catch weight-packing regressions).
    ref = poseseg_forward_ref(params, data, use_full_heat=True)
    for got, want in [
        (out["preheat"][0], ref["preheat"][0]),
        (out["preheat"][1], ref["preheat"][1]),
        (out["premask"][0], ref["premask"][0]),
        (out["premask"][1], ref["premask"][1]),
    ]:
        err = float(jnp.max(jnp.abs(got - want)))
        assert err < 3e-2, f"mismatch vs reference: max abs err {err}"

    print("KERNEL_OK")
</pallas_src>

<mosaic_0001>
module attributes {stable_mosaic.version = 11 : i64} {
  func.func @_poseseg_fused_kernel(%arg0: i32, %arg1: memref<1x16x512xf32, #tpu.memory_space<vmem>>, %arg2: memref<16x512xf32, #tpu.memory_space<vmem>>, %arg3: memref<8x72xbf16, #tpu.memory_space<vmem>>, %arg4: memref<8x72xbf16, #tpu.memory_space<vmem>>, %arg5: memref<8x1xf32, #tpu.memory_space<vmem>>, %arg6: memref<8x72xbf16, #tpu.memory_space<vmem>>, %arg7: memref<8x1xf32, #tpu.memory_space<vmem>>, %arg8: memref<8x72xbf16, #tpu.memory_space<vmem>>, %arg9: memref<8x72xbf16, #tpu.memory_space<vmem>>, %arg10: memref<8x1xf32, #tpu.memory_space<vmem>>, %arg11: memref<8x72xbf16, #tpu.memory_space<vmem>>, %arg12: memref<8x1xf32, #tpu.memory_space<vmem>>, %arg13: memref<8x72xbf16, #tpu.memory_space<vmem>>, %arg14: memref<8x72xbf16, #tpu.memory_space<vmem>>, %arg15: memref<8x1xf32, #tpu.memory_space<vmem>>, %arg16: memref<8x72xbf16, #tpu.memory_space<vmem>>, %arg17: memref<8x1xf32, #tpu.memory_space<vmem>>, %arg18: memref<8x72xbf16, #tpu.memory_space<vmem>>, %arg19: memref<8x72xbf16, #tpu.memory_space<vmem>>, %arg20: memref<8x1xf32, #tpu.memory_space<vmem>>, %arg21: memref<8x72xbf16, #tpu.memory_space<vmem>>, %arg22: memref<8x1xf32, #tpu.memory_space<vmem>>, %arg23: memref<1x32x512xf32, #tpu.memory_space<vmem>>) attributes {dimension_semantics = [#tpu.dimension_semantics<parallel>], iteration_bounds = array<i64: 2>, scalar_prefetch = 0 : i64, scratch_operands = 0 : i64, tpu.core_type = #tpu.core_type<tc>, window_params = [{transform_indices = @transform_0, window_bounds = array<i64: 1, 16, 512>}, {pipeline_mode = #tpu.pipeline_mode<synchronous>, transform_indices = @transform_1, window_bounds = array<i64: 16, 512>}, {pipeline_mode = #tpu.pipeline_mode<synchronous>, transform_indices = @transform_2, window_bounds = array<i64: 8, 72>}, {pipeline_mode = #tpu.pipeline_mode<synchronous>, transform_indices = @transform_3, window_bounds = array<i64: 8, 72>}, {pipeline_mode = #tpu.pipeline_mode<synchronous>, transform_indices = @transform_4, window_bounds = array<i64: 8, 1>}, {pipeline_mode = #tpu.pipeline_mode<synchronous>, transform_indices = @transform_5, window_bounds = array<i64: 8, 72>}, {pipeline_mode = #tpu.pipeline_mode<synchronous>, transform_indices = @transform_6, window_bounds = array<i64: 8, 1>}, {pipeline_mode = #tpu.pipeline_mode<synchronous>, transform_indices = @transform_7, window_bounds = array<i64: 8, 72>}, {pipeline_mode = #tpu.pipeline_mode<synchronous>, transform_indices = @transform_8, window_bounds = array<i64: 8, 72>}, {pipeline_mode = #tpu.pipeline_mode<synchronous>, transform_indices = @transform_9, window_bounds = array<i64: 8, 1>}, {pipeline_mode = #tpu.pipeline_mode<synchronous>, transform_indices = @transform_10, window_bounds = array<i64: 8, 72>}, {pipeline_mode = #tpu.pipeline_mode<synchronous>, transform_indices = @transform_11, window_bounds = array<i64: 8, 1>}, {pipeline_mode = #tpu.pipeline_mode<synchronous>, transform_indices = @transform_12, window_bounds = array<i64: 8, 72>}, {pipeline_mode = #tpu.pipeline_mode<synchronous>, transform_indices = @transform_13, window_bounds = array<i64: 8, 72>}, {pipeline_mode = #tpu.pipeline_mode<synchronous>, transform_indices = @transform_14, window_bounds = array<i64: 8, 1>}, {pipeline_mode = #tpu.pipeline_mode<synchronous>, transform_indices = @transform_15, window_bounds = array<i64: 8, 72>}, {pipeline_mode = #tpu.pipeline_mode<synchronous>, transform_indices = @transform_16, window_bounds = array<i64: 8, 1>}, {pipeline_mode = #tpu.pipeline_mode<synchronous>, transform_indices = @transform_17, window_bounds = array<i64: 8, 72>}, {pipeline_mode = #tpu.pipeline_mode<synchronous>, transform_indices = @transform_18, window_bounds = array<i64: 8, 72>}, {pipeline_mode = #tpu.pipeline_mode<synchronous>, transform_indices = @transform_19, window_bounds = array<i64: 8, 1>}, {pipeline_mode = #tpu.pipeline_mode<synchronous>, transform_indices = @transform_20, window_bounds = array<i64: 8, 72>}, {pipeline_mode = #tpu.pipeline_mode<synchronous>, transform_indices = @transform_21, window_bounds = array<i64: 8, 1>}, {transform_indices = @transform_22, window_bounds = array<i64: 1, 32, 512>}]} {
    %c0 = arith.constant 0 : index
    %c0_0 = arith.constant 0 : index
    %0 = vector.load %arg2[%c0, %c0_0] : memref<16x512xf32, #tpu.memory_space<vmem>>, vector<16x512xf32>
    %c0_1 = arith.constant 0 : index
    %c0_2 = arith.constant 0 : index
    %c0_3 = arith.constant 0 : index
    %1 = vector.load %arg1[%c0_1, %c0_2, %c0_3] : memref<1x16x512xf32, #tpu.memory_space<vmem>>, vector<1x16x512xf32>
    %2 = vector.shape_cast %1 : vector<1x16x512xf32> to vector<16x512xf32>
    %3 = vector.extract_strided_slice %2 {offsets = [0, 0], sizes = [8, 512], strides = [1, 1]} : vector<16x512xf32> to vector<8x512xf32>
    %4 = vector.extract_strided_slice %2 {offsets = [8, 0], sizes = [8, 512], strides = [1, 1]} : vector<16x512xf32> to vector<8x512xf32>
    %c17_i32 = arith.constant 17 : i32
    %5 = tpu.dynamic_rotate %3 by %c17_i32 dim 1 : vector<8x512xf32>, i32 -> vector<8x512xf32>
    %6 = vector.extract_strided_slice %0 {offsets = [0, 0], sizes = [1, 512], strides = [1, 1]} : vector<16x512xf32> to vector<1x512xf32>
    %7 = vector.broadcast %6 : vector<1x512xf32> to vector<8x512xf32>
    %8 = arith.mulf %5, %7 : vector<8x512xf32>
    %c16_i32 = arith.constant 16 : i32
    %9 = tpu.dynamic_rotate %3 by %c16_i32 dim 1 : vector<8x512xf32>, i32 -> vector<8x512xf32>
    %10 = vector.extract_strided_slice %0 {offsets = [1, 0], sizes = [1, 512], strides = [1, 1]} : vector<16x512xf32> to vector<1x512xf32>
    %11 = vector.broadcast %10 : vector<1x512xf32> to vector<8x512xf32>
    %12 = arith.mulf %9, %11 : vector<8x512xf32>
    %c15_i32 = arith.constant 15 : i32
    %13 = tpu.dynamic_rotate %3 by %c15_i32 dim 1 : vector<8x512xf32>, i32 -> vector<8x512xf32>
    %14 = vector.extract_strided_slice %0 {offsets = [2, 0], sizes = [1, 512], strides = [1, 1]} : vector<16x512xf32> to vector<1x512xf32>
    %15 = vector.broadcast %14 : vector<1x512xf32> to vector<8x512xf32>
    %16 = arith.mulf %13, %15 : vector<8x512xf32>
    %c1_i32 = arith.constant 1 : i32
    %17 = tpu.dynamic_rotate %3 by %c1_i32 dim 1 : vector<8x512xf32>, i32 -> vector<8x512xf32>
    %18 = vector.extract_strided_slice %0 {offsets = [3, 0], sizes = [1, 512], strides = [1, 1]} : vector<16x512xf32> to vector<1x512xf32>
    %19 = vector.broadcast %18 : vector<1x512xf32> to vector<8x512xf32>
    %20 = arith.mulf %17, %19 : vector<8x512xf32>
    %c511_i32 = arith.constant 511 : i32
    %21 = tpu.dynamic_rotate %3 by %c511_i32 dim 1 : vector<8x512xf32>, i32 -> vector<8x512xf32>
    %22 = vector.extract_strided_slice %0 {offsets = [5, 0], sizes = [1, 512], strides = [1, 1]} : vector<16x512xf32> to vector<1x512xf32>
    %23 = vector.broadcast %22 : vector<1x512xf32> to vector<8x512xf32>
    %24 = arith.mulf %21, %23 : vector<8x512xf32>
    %c497_i32 = arith.constant 497 : i32
    %25 = tpu.dynamic_rotate %3 by %c497_i32 dim 1 : vector<8x512xf32>, i32 -> vector<8x512xf32>
    %26 = vector.extract_strided_slice %0 {offsets = [6, 0], sizes = [1, 512], strides = [1, 1]} : vector<16x512xf32> to vector<1x512xf32>
    %27 = vector.broadcast %26 : vector<1x512xf32> to vector<8x512xf32>
    %28 = arith.mulf %25, %27 : vector<8x512xf32>
    %c496_i32 = arith.constant 496 : i32
    %29 = tpu.dynamic_rotate %3 by %c496_i32 dim 1 : vector<8x512xf32>, i32 -> vector<8x512xf32>
    %30 = vector.extract_strided_slice %0 {offsets = [7, 0], sizes = [1, 512], strides = [1, 1]} : vector<16x512xf32> to vector<1x512xf32>
    %31 = vector.broadcast %30 : vector<1x512xf32> to vector<8x512xf32>
    %32 = arith.mulf %29, %31 : vector<8x512xf32>
    %c495_i32 = arith.constant 495 : i32
    %33 = tpu.dynamic_rotate %3 by %c495_i32 dim 1 : vector<8x512xf32>, i32 -> vector<8x512xf32>
    %34 = vector.extract_strided_slice %0 {offsets = [8, 0], sizes = [1, 512], strides = [1, 1]} : vector<16x512xf32> to vector<1x512xf32>
    %35 = vector.broadcast %34 : vector<1x512xf32> to vector<8x512xf32>
    %36 = arith.mulf %33, %35 : vector<8x512xf32>
    %37 = tpu.concatenate %8, %12, %16, %20, %3, %24, %28, %32, %36 in 0 : vector<8x512xf32>, vector<8x512xf32>, vector<8x512xf32>, vector<8x512xf32>, vector<8x512xf32>, vector<8x512xf32>, vector<8x512xf32>, vector<8x512xf32>, vector<8x512xf32> -> vector<72x512xf32>
    %38 = arith.truncf %37 : vector<72x512xf32> to vector<72x512xbf16>
    %c17_i32_4 = arith.constant 17 : i32
    %39 = tpu.dynamic_rotate %4 by %c17_i32_4 dim 1 : vector<8x512xf32>, i32 -> vector<8x512xf32>
    %40 = vector.extract_strided_slice %0 {offsets = [0, 0], sizes = [1, 512], strides = [1, 1]} : vector<16x512xf32> to vector<1x512xf32>
    %41 = vector.broadcast %40 : vector<1x512xf32> to vector<8x512xf32>
    %42 = arith.mulf %39, %41 : vector<8x512xf32>
    %c16_i32_5 = arith.constant 16 : i32
    %43 = tpu.dynamic_rotate %4 by %c16_i32_5 dim 1 : vector<8x512xf32>, i32 -> vector<8x512xf32>
    %44 = vector.extract_strided_slice %0 {offsets = [1, 0], sizes = [1, 512], strides = [1, 1]} : vector<16x512xf32> to vector<1x512xf32>
    %45 = vector.broadcast %44 : vector<1x512xf32> to vector<8x512xf32>
    %46 = arith.mulf %43, %45 : vector<8x512xf32>
    %c15_i32_6 = arith.constant 15 : i32
    %47 = tpu.dynamic_rotate %4 by %c15_i32_6 dim 1 : vector<8x512xf32>, i32 -> vector<8x512xf32>
    %48 = vector.extract_strided_slice %0 {offsets = [2, 0], sizes = [1, 512], strides = [1, 1]} : vector<16x512xf32> to vector<1x512xf32>
    %49 = vector.broadcast %48 : vector<1x512xf32> to vector<8x512xf32>
    %50 = arith.mulf %47, %49 : vector<8x512xf32>
    %c1_i32_7 = arith.constant 1 : i32
    %51 = tpu.dynamic_rotate %4 by %c1_i32_7 dim 1 : vector<8x512xf32>, i32 -> vector<8x512xf32>
    %52 = vector.extract_strided_slice %0 {offsets = [3, 0], sizes = [1, 512], strides = [1, 1]} : vector<16x512xf32> to vector<1x512xf32>
    %53 = vector.broadcast %52 : vector<1x512xf32> to vector<8x512xf32>
    %54 = arith.mulf %51, %53 : vector<8x512xf32>
    %c511_i32_8 = arith.constant 511 : i32
    %55 = tpu.dynamic_rotate %4 by %c511_i32_8 dim 1 : vector<8x512xf32>, i32 -> vector<8x512xf32>
    %56 = vector.extract_strided_slice %0 {offsets = [5, 0], sizes = [1, 512], strides = [1, 1]} : vector<16x512xf32> to vector<1x512xf32>
    %57 = vector.broadcast %56 : vector<1x512xf32> to vector<8x512xf32>
    %58 = arith.mulf %55, %57 : vector<8x512xf32>
    %c497_i32_9 = arith.constant 497 : i32
    %59 = tpu.dynamic_rotate %4 by %c497_i32_9 dim 1 : vector<8x512xf32>, i32 -> vector<8x512xf32>
    %60 = vector.extract_strided_slice %0 {offsets = [6, 0], sizes = [1, 512], strides = [1, 1]} : vector<16x512xf32> to vector<1x512xf32>
    %61 = vector.broadcast %60 : vector<1x512xf32> to vector<8x512xf32>
    %62 = arith.mulf %59, %61 : vector<8x512xf32>
    %c496_i32_10 = arith.constant 496 : i32
    %63 = tpu.dynamic_rotate %4 by %c496_i32_10 dim 1 : vector<8x512xf32>, i32 -> vector<8x512xf32>
    %64 = vector.extract_strided_slice %0 {offsets = [7, 0], sizes = [1, 512], strides = [1, 1]} : vector<16x512xf32> to vector<1x512xf32>
    %65 = vector.broadcast %64 : vector<1x512xf32> to vector<8x512xf32>
    %66 = arith.mulf %63, %65 : vector<8x512xf32>
    %c495_i32_11 = arith.constant 495 : i32
    %67 = tpu.dynamic_rotate %4 by %c495_i32_11 dim 1 : vector<8x512xf32>, i32 -> vector<8x512xf32>
    %68 = vector.extract_strided_slice %0 {offsets = [8, 0], sizes = [1, 512], strides = [1, 1]} : vector<16x512xf32> to vector<1x512xf32>
    %69 = vector.broadcast %68 : vector<1x512xf32> to vector<8x512xf32>
    %70 = arith.mulf %67, %69 : vector<8x512xf32>
    %71 = tpu.concatenate %42, %46, %50, %54, %4, %58, %62, %66, %70 in 0 : vector<8x512xf32>, vector<8x512xf32>, vector<8x512xf32>, vector<8x512xf32>, vector<8x512xf32>, vector<8x512xf32>, vector<8x512xf32>, vector<8x512xf32>, vector<8x512xf32> -> vector<72x512xf32>
    %72 = arith.truncf %71 : vector<72x512xf32> to vector<72x512xbf16>
    %c0_12 = arith.constant 0 : index
    %c0_13 = arith.constant 0 : index
    %73 = vector.load %arg3[%c0_12, %c0_13] : memref<8x72xbf16, #tpu.memory_space<vmem>>, vector<8x72xbf16>
    %cst = arith.constant dense<0.000000e+00> : vector<8x512xf32>
    %74 = tpu.matmul %73, %38, %cst {dimension_numbers = #tpu.dot_dimension_numbers<[1], [0], [0], [1], [0, 0, 1, 1], [], []>} : vector<8x72xbf16>, vector<72x512xbf16>, vector<8x512xf32> -> vector<8x512xf32>
    %c0_14 = arith.constant 0 : index
    %c0_15 = arith.constant 0 : index
    %75 = vector.load %arg4[%c0_14, %c0_15] : memref<8x72xbf16, #tpu.memory_space<vmem>>, vector<8x72xbf16>
    %cst_16 = arith.constant dense<0.000000e+00> : vector<8x512xf32>
    %76 = tpu.matmul %75, %72, %cst_16 {dimension_numbers = #tpu.dot_dimension_numbers<[1], [0], [0], [1], [0, 0, 1, 1], [], []>} : vector<8x72xbf16>, vector<72x512xbf16>, vector<8x512xf32> -> vector<8x512xf32>
    %77 = arith.addf %74, %76 : vector<8x512xf32>
    %c0_17 = arith.constant 0 : index
    %c0_18 = arith.constant 0 : index
    %78 = vector.load %arg5[%c0_17, %c0_18] : memref<8x1xf32, #tpu.memory_space<vmem>>, vector<8x1xf32>
    %79 = vector.broadcast %78 : vector<8x1xf32> to vector<8x512xf32>
    %80 = arith.addf %77, %79 : vector<8x512xf32>
    %cst_19 = arith.constant 0.000000e+00 : f32
    %81 = vector.broadcast %cst_19 : f32 to vector<8x512xf32>
    %82 = arith.maximumf %80, %81 : vector<8x512xf32>
    %c17_i32_20 = arith.constant 17 : i32
    %83 = tpu.dynamic_rotate %82 by %c17_i32_20 dim 1 : vector<8x512xf32>, i32 -> vector<8x512xf32>
    %84 = vector.extract_strided_slice %0 {offsets = [0, 0], sizes = [1, 512], strides = [1, 1]} : vector<16x512xf32> to vector<1x512xf32>
    %85 = vector.broadcast %84 : vector<1x512xf32> to vector<8x512xf32>
    %86 = arith.mulf %83, %85 : vector<8x512xf32>
    %c16_i32_21 = arith.constant 16 : i32
    %87 = tpu.dynamic_rotate %82 by %c16_i32_21 dim 1 : vector<8x512xf32>, i32 -> vector<8x512xf32>
    %88 = vector.extract_strided_slice %0 {offsets = [1, 0], sizes = [1, 512], strides = [1, 1]} : vector<16x512xf32> to vector<1x512xf32>
    %89 = vector.broadcast %88 : vector<1x512xf32> to vector<8x512xf32>
    %90 = arith.mulf %87, %89 : vector<8x512xf32>
    %c15_i32_22 = arith.constant 15 : i32
    %91 = tpu.dynamic_rotate %82 by %c15_i32_22 dim 1 : vector<8x512xf32>, i32 -> vector<8x512xf32>
    %92 = vector.extract_strided_slice %0 {offsets = [2, 0], sizes = [1, 512], strides = [1, 1]} : vector<16x512xf32> to vector<1x512xf32>
    %93 = vector.broadcast %92 : vector<1x512xf32> to vector<8x512xf32>
    %94 = arith.mulf %91, %93 : vector<8x512xf32>
    %c1_i32_23 = arith.constant 1 : i32
    %95 = tpu.dynamic_rotate %82 by %c1_i32_23 dim 1 : vector<8x512xf32>, i32 -> vector<8x512xf32>
    %96 = vector.extract_strided_slice %0 {offsets = [3, 0], sizes = [1, 512], strides = [1, 1]} : vector<16x512xf32> to vector<1x512xf32>
    %97 = vector.broadcast %96 : vector<1x512xf32> to vector<8x512xf32>
    %98 = arith.mulf %95, %97 : vector<8x512xf32>
    %c511_i32_24 = arith.constant 511 : i32
    %99 = tpu.dynamic_rotate %82 by %c511_i32_24 dim 1 : vector<8x512xf32>, i32 -> vector<8x512xf32>
    %100 = vector.extract_strided_slice %0 {offsets = [5, 0], sizes = [1, 512], strides = [1, 1]} : vector<16x512xf32> to vector<1x512xf32>
    %101 = vector.broadcast %100 : vector<1x512xf32> to vector<8x512xf32>
    %102 = arith.mulf %99, %101 : vector<8x512xf32>
    %c497_i32_25 = arith.constant 497 : i32
    %103 = tpu.dynamic_rotate %82 by %c497_i32_25 dim 1 : vector<8x512xf32>, i32 -> vector<8x512xf32>
    %104 = vector.extract_strided_slice %0 {offsets = [6, 0], sizes = [1, 512], strides = [1, 1]} : vector<16x512xf32> to vector<1x512xf32>
    %105 = vector.broadcast %104 : vector<1x512xf32> to vector<8x512xf32>
    %106 = arith.mulf %103, %105 : vector<8x512xf32>
    %c496_i32_26 = arith.constant 496 : i32
    %107 = tpu.dynamic_rotate %82 by %c496_i32_26 dim 1 : vector<8x512xf32>, i32 -> vector<8x512xf32>
    %108 = vector.extract_strided_slice %0 {offsets = [7, 0], sizes = [1, 512], strides = [1, 1]} : vector<16x512xf32> to vector<1x512xf32>
    %109 = vector.broadcast %108 : vector<1x512xf32> to vector<8x512xf32>
    %110 = arith.mulf %107, %109 : vector<8x512xf32>
    %c495_i32_27 = arith.constant 495 : i32
    %111 = tpu.dynamic_rotate %82 by %c495_i32_27 dim 1 : vector<8x512xf32>, i32 -> vector<8x512xf32>
    %112 = vector.extract_strided_slice %0 {offsets = [8, 0], sizes = [1, 512], strides = [1, 1]} : vector<16x512xf32> to vector<1x512xf32>
    %113 = vector.broadcast %112 : vector<1x512xf32> to vector<8x512xf32>
    %114 = arith.mulf %111, %113 : vector<8x512xf32>
    %115 = tpu.concatenate %86, %90, %94, %98, %82, %102, %106, %110, %114 in 0 : vector<8x512xf32>, vector<8x512xf32>, vector<8x512xf32>, vector<8x512xf32>, vector<8x512xf32>, vector<8x512xf32>, vector<8x512xf32>, vector<8x512xf32>, vector<8x512xf32> -> vector<72x512xf32>
    %116 = arith.truncf %115 : vector<72x512xf32> to vector<72x512xbf16>
    %c0_28 = arith.constant 0 : index
    %c0_29 = arith.constant 0 : index
    %117 = vector.load %arg6[%c0_28, %c0_29] : memref<8x72xbf16, #tpu.memory_space<vmem>>, vector<8x72xbf16>
    %cst_30 = arith.constant dense<0.000000e+00> : vector<8x512xf32>
    %118 = tpu.matmul %117, %116, %cst_30 {dimension_numbers = #tpu.dot_dimension_numbers<[1], [0], [0], [1], [0, 0, 1, 1], [], []>} : vector<8x72xbf16>, vector<72x512xbf16>, vector<8x512xf32> -> vector<8x512xf32>
    %c0_31 = arith.constant 0 : index
    %c0_32 = arith.constant 0 : index
    %119 = vector.load %arg7[%c0_31, %c0_32] : memref<8x1xf32, #tpu.memory_space<vmem>>, vector<8x1xf32>
    %120 = vector.broadcast %119 : vector<8x1xf32> to vector<8x512xf32>
    %121 = arith.addf %118, %120 : vector<8x512xf32>
    %c17_i32_33 = arith.constant 17 : i32
    %122 = tpu.dynamic_rotate %121 by %c17_i32_33 dim 1 : vector<8x512xf32>, i32 -> vector<8x512xf32>
    %123 = vector.extract_strided_slice %0 {offsets = [0, 0], sizes = [1, 512], strides = [1, 1]} : vector<16x512xf32> to vector<1x512xf32>
    %124 = vector.broadcast %123 : vector<1x512xf32> to vector<8x512xf32>
    %125 = arith.mulf %122, %124 : vector<8x512xf32>
    %c16_i32_34 = arith.constant 16 : i32
    %126 = tpu.dynamic_rotate %121 by %c16_i32_34 dim 1 : vector<8x512xf32>, i32 -> vector<8x512xf32>
    %127 = vector.extract_strided_slice %0 {offsets = [1, 0], sizes = [1, 512], strides = [1, 1]} : vector<16x512xf32> to vector<1x512xf32>
    %128 = vector.broadcast %127 : vector<1x512xf32> to vector<8x512xf32>
    %129 = arith.mulf %126, %128 : vector<8x512xf32>
    %c15_i32_35 = arith.constant 15 : i32
    %130 = tpu.dynamic_rotate %121 by %c15_i32_35 dim 1 : vector<8x512xf32>, i32 -> vector<8x512xf32>
    %131 = vector.extract_strided_slice %0 {offsets = [2, 0], sizes = [1, 512], strides = [1, 1]} : vector<16x512xf32> to vector<1x512xf32>
    %132 = vector.broadcast %131 : vector<1x512xf32> to vector<8x512xf32>
    %133 = arith.mulf %130, %132 : vector<8x512xf32>
    %c1_i32_36 = arith.constant 1 : i32
    %134 = tpu.dynamic_rotate %121 by %c1_i32_36 dim 1 : vector<8x512xf32>, i32 -> vector<8x512xf32>
    %135 = vector.extract_strided_slice %0 {offsets = [3, 0], sizes = [1, 512], strides = [1, 1]} : vector<16x512xf32> to vector<1x512xf32>
    %136 = vector.broadcast %135 : vector<1x512xf32> to vector<8x512xf32>
    %137 = arith.mulf %134, %136 : vector<8x512xf32>
    %c511_i32_37 = arith.constant 511 : i32
    %138 = tpu.dynamic_rotate %121 by %c511_i32_37 dim 1 : vector<8x512xf32>, i32 -> vector<8x512xf32>
    %139 = vector.extract_strided_slice %0 {offsets = [5, 0], sizes = [1, 512], strides = [1, 1]} : vector<16x512xf32> to vector<1x512xf32>
    %140 = vector.broadcast %139 : vector<1x512xf32> to vector<8x512xf32>
    %141 = arith.mulf %138, %140 : vector<8x512xf32>
    %c497_i32_38 = arith.constant 497 : i32
    %142 = tpu.dynamic_rotate %121 by %c497_i32_38 dim 1 : vector<8x512xf32>, i32 -> vector<8x512xf32>
    %143 = vector.extract_strided_slice %0 {offsets = [6, 0], sizes = [1, 512], strides = [1, 1]} : vector<16x512xf32> to vector<1x512xf32>
    %144 = vector.broadcast %143 : vector<1x512xf32> to vector<8x512xf32>
    %145 = arith.mulf %142, %144 : vector<8x512xf32>
    %c496_i32_39 = arith.constant 496 : i32
    %146 = tpu.dynamic_rotate %121 by %c496_i32_39 dim 1 : vector<8x512xf32>, i32 -> vector<8x512xf32>
    %147 = vector.extract_strided_slice %0 {offsets = [7, 0], sizes = [1, 512], strides = [1, 1]} : vector<16x512xf32> to vector<1x512xf32>
    %148 = vector.broadcast %147 : vector<1x512xf32> to vector<8x512xf32>
    %149 = arith.mulf %146, %148 : vector<8x512xf32>
    %c495_i32_40 = arith.constant 495 : i32
    %150 = tpu.dynamic_rotate %121 by %c495_i32_40 dim 1 : vector<8x512xf32>, i32 -> vector<8x512xf32>
    %151 = vector.extract_strided_slice %0 {offsets = [8, 0], sizes = [1, 512], strides = [1, 1]} : vector<16x512xf32> to vector<1x512xf32>
    %152 = vector.broadcast %151 : vector<1x512xf32> to vector<8x512xf32>
    %153 = arith.mulf %150, %152 : vector<8x512xf32>
    %154 = tpu.concatenate %125, %129, %133, %137, %121, %141, %145, %149, %153 in 0 : vector<8x512xf32>, vector<8x512xf32>, vector<8x512xf32>, vector<8x512xf32>, vector<8x512xf32>, vector<8x512xf32>, vector<8x512xf32>, vector<8x512xf32>, vector<8x512xf32> -> vector<72x512xf32>
    %155 = arith.truncf %154 : vector<72x512xf32> to vector<72x512xbf16>
    %c0_41 = arith.constant 0 : index
    %c0_42 = arith.constant 0 : index
    %156 = vector.load %arg8[%c0_41, %c0_42] : memref<8x72xbf16, #tpu.memory_space<vmem>>, vector<8x72xbf16>
    %cst_43 = arith.constant dense<0.000000e+00> : vector<8x512xf32>
    %157 = tpu.matmul %156, %116, %cst_43 {dimension_numbers = #tpu.dot_dimension_numbers<[1], [0], [0], [1], [0, 0, 1, 1], [], []>} : vector<8x72xbf16>, vector<72x512xbf16>, vector<8x512xf32> -> vector<8x512xf32>
    %c0_44 = arith.constant 0 : index
    %c0_45 = arith.constant 0 : index
    %158 = vector.load %arg9[%c0_44, %c0_45] : memref<8x72xbf16, #tpu.memory_space<vmem>>, vector<8x72xbf16>
    %cst_46 = arith.constant dense<0.000000e+00> : vector<8x512xf32>
    %159 = tpu.matmul %158, %155, %cst_46 {dimension_numbers = #tpu.dot_dimension_numbers<[1], [0], [0], [1], [0, 0, 1, 1], [], []>} : vector<8x72xbf16>, vector<72x512xbf16>, vector<8x512xf32> -> vector<8x512xf32>
    %160 = arith.addf %157, %159 : vector<8x512xf32>
    %c0_47 = arith.constant 0 : index
    %c0_48 = arith.constant 0 : index
    %161 = vector.load %arg10[%c0_47, %c0_48] : memref<8x1xf32, #tpu.memory_space<vmem>>, vector<8x1xf32>
    %162 = vector.broadcast %161 : vector<8x1xf32> to vector<8x512xf32>
    %163 = arith.addf %160, %162 : vector<8x512xf32>
    %cst_49 = arith.constant 0.000000e+00 : f32
    %164 = vector.broadcast %cst_49 : f32 to vector<8x512xf32>
    %165 = arith.maximumf %163, %164 : vector<8x512xf32>
    %c17_i32_50 = arith.constant 17 : i32
    %166 = tpu.dynamic_rotate %165 by %c17_i32_50 dim 1 : vector<8x512xf32>, i32 -> vector<8x512xf32>
    %167 = vector.extract_strided_slice %0 {offsets = [0, 0], sizes = [1, 512], strides = [1, 1]} : vector<16x512xf32> to vector<1x512xf32>
    %168 = vector.broadcast %167 : vector<1x512xf32> to vector<8x512xf32>
    %169 = arith.mulf %166, %168 : vector<8x512xf32>
    %c16_i32_51 = arith.constant 16 : i32
    %170 = tpu.dynamic_rotate %165 by %c16_i32_51 dim 1 : vector<8x512xf32>, i32 -> vector<8x512xf32>
    %171 = vector.extract_strided_slice %0 {offsets = [1, 0], sizes = [1, 512], strides = [1, 1]} : vector<16x512xf32> to vector<1x512xf32>
    %172 = vector.broadcast %171 : vector<1x512xf32> to vector<8x512xf32>
    %173 = arith.mulf %170, %172 : vector<8x512xf32>
    %c15_i32_52 = arith.constant 15 : i32
    %174 = tpu.dynamic_rotate %165 by %c15_i32_52 dim 1 : vector<8x512xf32>, i32 -> vector<8x512xf32>
    %175 = vector.extract_strided_slice %0 {offsets = [2, 0], sizes = [1, 512], strides = [1, 1]} : vector<16x512xf32> to vector<1x512xf32>
    %176 = vector.broadcast %175 : vector<1x512xf32> to vector<8x512xf32>
    %177 = arith.mulf %174, %176 : vector<8x512xf32>
    %c1_i32_53 = arith.constant 1 : i32
    %178 = tpu.dynamic_rotate %165 by %c1_i32_53 dim 1 : vector<8x512xf32>, i32 -> vector<8x512xf32>
    %179 = vector.extract_strided_slice %0 {offsets = [3, 0], sizes = [1, 512], strides = [1, 1]} : vector<16x512xf32> to vector<1x512xf32>
    %180 = vector.broadcast %179 : vector<1x512xf32> to vector<8x512xf32>
    %181 = arith.mulf %178, %180 : vector<8x512xf32>
    %c511_i32_54 = arith.constant 511 : i32
    %182 = tpu.dynamic_rotate %165 by %c511_i32_54 dim 1 : vector<8x512xf32>, i32 -> vector<8x512xf32>
    %183 = vector.extract_strided_slice %0 {offsets = [5, 0], sizes = [1, 512], strides = [1, 1]} : vector<16x512xf32> to vector<1x512xf32>
    %184 = vector.broadcast %183 : vector<1x512xf32> to vector<8x512xf32>
    %185 = arith.mulf %182, %184 : vector<8x512xf32>
    %c497_i32_55 = arith.constant 497 : i32
    %186 = tpu.dynamic_rotate %165 by %c497_i32_55 dim 1 : vector<8x512xf32>, i32 -> vector<8x512xf32>
    %187 = vector.extract_strided_slice %0 {offsets = [6, 0], sizes = [1, 512], strides = [1, 1]} : vector<16x512xf32> to vector<1x512xf32>
    %188 = vector.broadcast %187 : vector<1x512xf32> to vector<8x512xf32>
    %189 = arith.mulf %186, %188 : vector<8x512xf32>
    %c496_i32_56 = arith.constant 496 : i32
    %190 = tpu.dynamic_rotate %165 by %c496_i32_56 dim 1 : vector<8x512xf32>, i32 -> vector<8x512xf32>
    %191 = vector.extract_strided_slice %0 {offsets = [7, 0], sizes = [1, 512], strides = [1, 1]} : vector<16x512xf32> to vector<1x512xf32>
    %192 = vector.broadcast %191 : vector<1x512xf32> to vector<8x512xf32>
    %193 = arith.mulf %190, %192 : vector<8x512xf32>
    %c495_i32_57 = arith.constant 495 : i32
    %194 = tpu.dynamic_rotate %165 by %c495_i32_57 dim 1 : vector<8x512xf32>, i32 -> vector<8x512xf32>
    %195 = vector.extract_strided_slice %0 {offsets = [8, 0], sizes = [1, 512], strides = [1, 1]} : vector<16x512xf32> to vector<1x512xf32>
    %196 = vector.broadcast %195 : vector<1x512xf32> to vector<8x512xf32>
    %197 = arith.mulf %194, %196 : vector<8x512xf32>
    %198 = tpu.concatenate %169, %173, %177, %181, %165, %185, %189, %193, %197 in 0 : vector<8x512xf32>, vector<8x512xf32>, vector<8x512xf32>, vector<8x512xf32>, vector<8x512xf32>, vector<8x512xf32>, vector<8x512xf32>, vector<8x512xf32>, vector<8x512xf32> -> vector<72x512xf32>
    %199 = arith.truncf %198 : vector<72x512xf32> to vector<72x512xbf16>
    %c0_58 = arith.constant 0 : index
    %c0_59 = arith.constant 0 : index
    %200 = vector.load %arg11[%c0_58, %c0_59] : memref<8x72xbf16, #tpu.memory_space<vmem>>, vector<8x72xbf16>
    %cst_60 = arith.constant dense<0.000000e+00> : vector<8x512xf32>
    %201 = tpu.matmul %200, %199, %cst_60 {dimension_numbers = #tpu.dot_dimension_numbers<[1], [0], [0], [1], [0, 0, 1, 1], [], []>} : vector<8x72xbf16>, vector<72x512xbf16>, vector<8x512xf32> -> vector<8x512xf32>
    %c0_61 = arith.constant 0 : index
    %c0_62 = arith.constant 0 : index
    %202 = vector.load %arg12[%c0_61, %c0_62] : memref<8x1xf32, #tpu.memory_space<vmem>>, vector<8x1xf32>
    %203 = vector.broadcast %202 : vector<8x1xf32> to vector<8x512xf32>
    %204 = arith.addf %201, %203 : vector<8x512xf32>
    %c17_i32_63 = arith.constant 17 : i32
    %205 = tpu.dynamic_rotate %204 by %c17_i32_63 dim 1 : vector<8x512xf32>, i32 -> vector<8x512xf32>
    %206 = vector.extract_strided_slice %0 {offsets = [0, 0], sizes = [1, 512], strides = [1, 1]} : vector<16x512xf32> to vector<1x512xf32>
    %207 = vector.broadcast %206 : vector<1x512xf32> to vector<8x512xf32>
    %208 = arith.mulf %205, %207 : vector<8x512xf32>
    %c16_i32_64 = arith.constant 16 : i32
    %209 = tpu.dynamic_rotate %204 by %c16_i32_64 dim 1 : vector<8x512xf32>, i32 -> vector<8x512xf32>
    %210 = vector.extract_strided_slice %0 {offsets = [1, 0], sizes = [1, 512], strides = [1, 1]} : vector<16x512xf32> to vector<1x512xf32>
    %211 = vector.broadcast %210 : vector<1x512xf32> to vector<8x512xf32>
    %212 = arith.mulf %209, %211 : vector<8x512xf32>
    %c15_i32_65 = arith.constant 15 : i32
    %213 = tpu.dynamic_rotate %204 by %c15_i32_65 dim 1 : vector<8x512xf32>, i32 -> vector<8x512xf32>
    %214 = vector.extract_strided_slice %0 {offsets = [2, 0], sizes = [1, 512], strides = [1, 1]} : vector<16x512xf32> to vector<1x512xf32>
    %215 = vector.broadcast %214 : vector<1x512xf32> to vector<8x512xf32>
    %216 = arith.mulf %213, %215 : vector<8x512xf32>
    %c1_i32_66 = arith.constant 1 : i32
    %217 = tpu.dynamic_rotate %204 by %c1_i32_66 dim 1 : vector<8x512xf32>, i32 -> vector<8x512xf32>
    %218 = vector.extract_strided_slice %0 {offsets = [3, 0], sizes = [1, 512], strides = [1, 1]} : vector<16x512xf32> to vector<1x512xf32>
    %219 = vector.broadcast %218 : vector<1x512xf32> to vector<8x512xf32>
    %220 = arith.mulf %217, %219 : vector<8x512xf32>
    %c511_i32_67 = arith.constant 511 : i32
    %221 = tpu.dynamic_rotate %204 by %c511_i32_67 dim 1 : vector<8x512xf32>, i32 -> vector<8x512xf32>
    %222 = vector.extract_strided_slice %0 {offsets = [5, 0], sizes = [1, 512], strides = [1, 1]} : vector<16x512xf32> to vector<1x512xf32>
    %223 = vector.broadcast %222 : vector<1x512xf32> to vector<8x512xf32>
    %224 = arith.mulf %221, %223 : vector<8x512xf32>
    %c497_i32_68 = arith.constant 497 : i32
    %225 = tpu.dynamic_rotate %204 by %c497_i32_68 dim 1 : vector<8x512xf32>, i32 -> vector<8x512xf32>
    %226 = vector.extract_strided_slice %0 {offsets = [6, 0], sizes = [1, 512], strides = [1, 1]} : vector<16x512xf32> to vector<1x512xf32>
    %227 = vector.broadcast %226 : vector<1x512xf32> to vector<8x512xf32>
    %228 = arith.mulf %225, %227 : vector<8x512xf32>
    %c496_i32_69 = arith.constant 496 : i32
    %229 = tpu.dynamic_rotate %204 by %c496_i32_69 dim 1 : vector<8x512xf32>, i32 -> vector<8x512xf32>
    %230 = vector.extract_strided_slice %0 {offsets = [7, 0], sizes = [1, 512], strides = [1, 1]} : vector<16x512xf32> to vector<1x512xf32>
    %231 = vector.broadcast %230 : vector<1x512xf32> to vector<8x512xf32>
    %232 = arith.mulf %229, %231 : vector<8x512xf32>
    %c495_i32_70 = arith.constant 495 : i32
    %233 = tpu.dynamic_rotate %204 by %c495_i32_70 dim 1 : vector<8x512xf32>, i32 -> vector<8x512xf32>
    %234 = vector.extract_strided_slice %0 {offsets = [8, 0], sizes = [1, 512], strides = [1, 1]} : vector<16x512xf32> to vector<1x512xf32>
    %235 = vector.broadcast %234 : vector<1x512xf32> to vector<8x512xf32>
    %236 = arith.mulf %233, %235 : vector<8x512xf32>
    %237 = tpu.concatenate %208, %212, %216, %220, %204, %224, %228, %232, %236 in 0 : vector<8x512xf32>, vector<8x512xf32>, vector<8x512xf32>, vector<8x512xf32>, vector<8x512xf32>, vector<8x512xf32>, vector<8x512xf32>, vector<8x512xf32>, vector<8x512xf32> -> vector<72x512xf32>
    %238 = arith.truncf %237 : vector<72x512xf32> to vector<72x512xbf16>
    %c0_71 = arith.constant 0 : index
    %c0_72 = arith.constant 0 : index
    %239 = vector.load %arg13[%c0_71, %c0_72] : memref<8x72xbf16, #tpu.memory_space<vmem>>, vector<8x72xbf16>
    %cst_73 = arith.constant dense<0.000000e+00> : vector<8x512xf32>
    %240 = tpu.matmul %239, %38, %cst_73 {dimension_numbers = #tpu.dot_dimension_numbers<[1], [0], [0], [1], [0, 0, 1, 1], [], []>} : vector<8x72xbf16>, vector<72x512xbf16>, vector<8x512xf32> -> vector<8x512xf32>
    %c0_74 = arith.constant 0 : index
    %c0_75 = arith.constant 0 : index
    %241 = vector.load %arg14[%c0_74, %c0_75] : memref<8x72xbf16, #tpu.memory_space<vmem>>, vector<8x72xbf16>
    %cst_76 = arith.constant dense<0.000000e+00> : vector<8x512xf32>
    %242 = tpu.matmul %241, %238, %cst_76 {dimension_numbers = #tpu.dot_dimension_numbers<[1], [0], [0], [1], [0, 0, 1, 1], [], []>} : vector<8x72xbf16>, vector<72x512xbf16>, vector<8x512xf32> -> vector<8x512xf32>
    %243 = arith.addf %240, %242 : vector<8x512xf32>
    %c0_77 = arith.constant 0 : index
    %c0_78 = arith.constant 0 : index
    %244 = vector.load %arg15[%c0_77, %c0_78] : memref<8x1xf32, #tpu.memory_space<vmem>>, vector<8x1xf32>
    %245 = vector.broadcast %244 : vector<8x1xf32> to vector<8x512xf32>
    %246 = arith.addf %243, %245 : vector<8x512xf32>
    %cst_79 = arith.constant 0.000000e+00 : f32
    %247 = vector.broadcast %cst_79 : f32 to vector<8x512xf32>
    %248 = arith.maximumf %246, %247 : vector<8x512xf32>
    %c17_i32_80 = arith.constant 17 : i32
    %249 = tpu.dynamic_rotate %248 by %c17_i32_80 dim 1 : vector<8x512xf32>, i32 -> vector<8x512xf32>
    %250 = vector.extract_strided_slice %0 {offsets = [0, 0], sizes = [1, 512], strides = [1, 1]} : vector<16x512xf32> to vector<1x512xf32>
    %251 = vector.broadcast %250 : vector<1x512xf32> to vector<8x512xf32>
    %252 = arith.mulf %249, %251 : vector<8x512xf32>
    %c16_i32_81 = arith.constant 16 : i32
    %253 = tpu.dynamic_rotate %248 by %c16_i32_81 dim 1 : vector<8x512xf32>, i32 -> vector<8x512xf32>
    %254 = vector.extract_strided_slice %0 {offsets = [1, 0], sizes = [1, 512], strides = [1, 1]} : vector<16x512xf32> to vector<1x512xf32>
    %255 = vector.broadcast %254 : vector<1x512xf32> to vector<8x512xf32>
    %256 = arith.mulf %253, %255 : vector<8x512xf32>
    %c15_i32_82 = arith.constant 15 : i32
    %257 = tpu.dynamic_rotate %248 by %c15_i32_82 dim 1 : vector<8x512xf32>, i32 -> vector<8x512xf32>
    %258 = vector.extract_strided_slice %0 {offsets = [2, 0], sizes = [1, 512], strides = [1, 1]} : vector<16x512xf32> to vector<1x512xf32>
    %259 = vector.broadcast %258 : vector<1x512xf32> to vector<8x512xf32>
    %260 = arith.mulf %257, %259 : vector<8x512xf32>
    %c1_i32_83 = arith.constant 1 : i32
    %261 = tpu.dynamic_rotate %248 by %c1_i32_83 dim 1 : vector<8x512xf32>, i32 -> vector<8x512xf32>
    %262 = vector.extract_strided_slice %0 {offsets = [3, 0], sizes = [1, 512], strides = [1, 1]} : vector<16x512xf32> to vector<1x512xf32>
    %263 = vector.broadcast %262 : vector<1x512xf32> to vector<8x512xf32>
    %264 = arith.mulf %261, %263 : vector<8x512xf32>
    %c511_i32_84 = arith.constant 511 : i32
    %265 = tpu.dynamic_rotate %248 by %c511_i32_84 dim 1 : vector<8x512xf32>, i32 -> vector<8x512xf32>
    %266 = vector.extract_strided_slice %0 {offsets = [5, 0], sizes = [1, 512], strides = [1, 1]} : vector<16x512xf32> to vector<1x512xf32>
    %267 = vector.broadcast %266 : vector<1x512xf32> to vector<8x512xf32>
    %268 = arith.mulf %265, %267 : vector<8x512xf32>
    %c497_i32_85 = arith.constant 497 : i32
    %269 = tpu.dynamic_rotate %248 by %c497_i32_85 dim 1 : vector<8x512xf32>, i32 -> vector<8x512xf32>
    %270 = vector.extract_strided_slice %0 {offsets = [6, 0], sizes = [1, 512], strides = [1, 1]} : vector<16x512xf32> to vector<1x512xf32>
    %271 = vector.broadcast %270 : vector<1x512xf32> to vector<8x512xf32>
    %272 = arith.mulf %269, %271 : vector<8x512xf32>
    %c496_i32_86 = arith.constant 496 : i32
    %273 = tpu.dynamic_rotate %248 by %c496_i32_86 dim 1 : vector<8x512xf32>, i32 -> vector<8x512xf32>
    %274 = vector.extract_strided_slice %0 {offsets = [7, 0], sizes = [1, 512], strides = [1, 1]} : vector<16x512xf32> to vector<1x512xf32>
    %275 = vector.broadcast %274 : vector<1x512xf32> to vector<8x512xf32>
    %276 = arith.mulf %273, %275 : vector<8x512xf32>
    %c495_i32_87 = arith.constant 495 : i32
    %277 = tpu.dynamic_rotate %248 by %c495_i32_87 dim 1 : vector<8x512xf32>, i32 -> vector<8x512xf32>
    %278 = vector.extract_strided_slice %0 {offsets = [8, 0], sizes = [1, 512], strides = [1, 1]} : vector<16x512xf32> to vector<1x512xf32>
    %279 = vector.broadcast %278 : vector<1x512xf32> to vector<8x512xf32>
    %280 = arith.mulf %277, %279 : vector<8x512xf32>
    %281 = tpu.concatenate %252, %256, %260, %264, %248, %268, %272, %276, %280 in 0 : vector<8x512xf32>, vector<8x512xf32>, vector<8x512xf32>, vector<8x512xf32>, vector<8x512xf32>, vector<8x512xf32>, vector<8x512xf32>, vector<8x512xf32>, vector<8x512xf32> -> vector<72x512xf32>
    %282 = arith.truncf %281 : vector<72x512xf32> to vector<72x512xbf16>
    %c0_88 = arith.constant 0 : index
    %c0_89 = arith.constant 0 : index
    %283 = vector.load %arg16[%c0_88, %c0_89] : memref<8x72xbf16, #tpu.memory_space<vmem>>, vector<8x72xbf16>
    %cst_90 = arith.constant dense<0.000000e+00> : vector<8x512xf32>
    %284 = tpu.matmul %283, %282, %cst_90 {dimension_numbers = #tpu.dot_dimension_numbers<[1], [0], [0], [1], [0, 0, 1, 1], [], []>} : vector<8x72xbf16>, vector<72x512xbf16>, vector<8x512xf32> -> vector<8x512xf32>
    %c0_91 = arith.constant 0 : index
    %c0_92 = arith.constant 0 : index
    %285 = vector.load %arg17[%c0_91, %c0_92] : memref<8x1xf32, #tpu.memory_space<vmem>>, vector<8x1xf32>
    %286 = vector.broadcast %285 : vector<8x1xf32> to vector<8x512xf32>
    %287 = arith.addf %284, %286 : vector<8x512xf32>
    %288 = arith.negf %287 : vector<8x512xf32>
    %289 = math.exp %288 : vector<8x512xf32>
    %cst_93 = arith.constant 1.000000e+00 : f32
    %290 = vector.broadcast %cst_93 : f32 to vector<8x512xf32>
    %291 = arith.addf %290, %289 : vector<8x512xf32>
    %292 = arith.divf %290, %291 : vector<8x512xf32>
    %c17_i32_94 = arith.constant 17 : i32
    %293 = tpu.dynamic_rotate %292 by %c17_i32_94 dim 1 : vector<8x512xf32>, i32 -> vector<8x512xf32>
    %294 = vector.extract_strided_slice %0 {offsets = [0, 0], sizes = [1, 512], strides = [1, 1]} : vector<16x512xf32> to vector<1x512xf32>
    %295 = vector.broadcast %294 : vector<1x512xf32> to vector<8x512xf32>
    %296 = arith.mulf %293, %295 : vector<8x512xf32>
    %c16_i32_95 = arith.constant 16 : i32
    %297 = tpu.dynamic_rotate %292 by %c16_i32_95 dim 1 : vector<8x512xf32>, i32 -> vector<8x512xf32>
    %298 = vector.extract_strided_slice %0 {offsets = [1, 0], sizes = [1, 512], strides = [1, 1]} : vector<16x512xf32> to vector<1x512xf32>
    %299 = vector.broadcast %298 : vector<1x512xf32> to vector<8x512xf32>
    %300 = arith.mulf %297, %299 : vector<8x512xf32>
    %c15_i32_96 = arith.constant 15 : i32
    %301 = tpu.dynamic_rotate %292 by %c15_i32_96 dim 1 : vector<8x512xf32>, i32 -> vector<8x512xf32>
    %302 = vector.extract_strided_slice %0 {offsets = [2, 0], sizes = [1, 512], strides = [1, 1]} : vector<16x512xf32> to vector<1x512xf32>
    %303 = vector.broadcast %302 : vector<1x512xf32> to vector<8x512xf32>
    %304 = arith.mulf %301, %303 : vector<8x512xf32>
    %c1_i32_97 = arith.constant 1 : i32
    %305 = tpu.dynamic_rotate %292 by %c1_i32_97 dim 1 : vector<8x512xf32>, i32 -> vector<8x512xf32>
    %306 = vector.extract_strided_slice %0 {offsets = [3, 0], sizes = [1, 512], strides = [1, 1]} : vector<16x512xf32> to vector<1x512xf32>
    %307 = vector.broadcast %306 : vector<1x512xf32> to vector<8x512xf32>
    %308 = arith.mulf %305, %307 : vector<8x512xf32>
    %c511_i32_98 = arith.constant 511 : i32
    %309 = tpu.dynamic_rotate %292 by %c511_i32_98 dim 1 : vector<8x512xf32>, i32 -> vector<8x512xf32>
    %310 = vector.extract_strided_slice %0 {offsets = [5, 0], sizes = [1, 512], strides = [1, 1]} : vector<16x512xf32> to vector<1x512xf32>
    %311 = vector.broadcast %310 : vector<1x512xf32> to vector<8x512xf32>
    %312 = arith.mulf %309, %311 : vector<8x512xf32>
    %c497_i32_99 = arith.constant 497 : i32
    %313 = tpu.dynamic_rotate %292 by %c497_i32_99 dim 1 : vector<8x512xf32>, i32 -> vector<8x512xf32>
    %314 = vector.extract_strided_slice %0 {offsets = [6, 0], sizes = [1, 512], strides = [1, 1]} : vector<16x512xf32> to vector<1x512xf32>
    %315 = vector.broadcast %314 : vector<1x512xf32> to vector<8x512xf32>
    %316 = arith.mulf %313, %315 : vector<8x512xf32>
    %c496_i32_100 = arith.constant 496 : i32
    %317 = tpu.dynamic_rotate %292 by %c496_i32_100 dim 1 : vector<8x512xf32>, i32 -> vector<8x512xf32>
    %318 = vector.extract_strided_slice %0 {offsets = [7, 0], sizes = [1, 512], strides = [1, 1]} : vector<16x512xf32> to vector<1x512xf32>
    %319 = vector.broadcast %318 : vector<1x512xf32> to vector<8x512xf32>
    %320 = arith.mulf %317, %319 : vector<8x512xf32>
    %c495_i32_101 = arith.constant 495 : i32
    %321 = tpu.dynamic_rotate %292 by %c495_i32_101 dim 1 : vector<8x512xf32>, i32 -> vector<8x512xf32>
    %322 = vector.extract_strided_slice %0 {offsets = [8, 0], sizes = [1, 512], strides = [1, 1]} : vector<16x512xf32> to vector<1x512xf32>
    %323 = vector.broadcast %322 : vector<1x512xf32> to vector<8x512xf32>
    %324 = arith.mulf %321, %323 : vector<8x512xf32>
    %325 = tpu.concatenate %296, %300, %304, %308, %292, %312, %316, %320, %324 in 0 : vector<8x512xf32>, vector<8x512xf32>, vector<8x512xf32>, vector<8x512xf32>, vector<8x512xf32>, vector<8x512xf32>, vector<8x512xf32>, vector<8x512xf32>, vector<8x512xf32> -> vector<72x512xf32>
    %326 = arith.truncf %325 : vector<72x512xf32> to vector<72x512xbf16>
    %c0_102 = arith.constant 0 : index
    %c0_103 = arith.constant 0 : index
    %327 = vector.load %arg18[%c0_102, %c0_103] : memref<8x72xbf16, #tpu.memory_space<vmem>>, vector<8x72xbf16>
    %cst_104 = arith.constant dense<0.000000e+00> : vector<8x512xf32>
    %328 = tpu.matmul %327, %282, %cst_104 {dimension_numbers = #tpu.dot_dimension_numbers<[1], [0], [0], [1], [0, 0, 1, 1], [], []>} : vector<8x72xbf16>, vector<72x512xbf16>, vector<8x512xf32> -> vector<8x512xf32>
    %c0_105 = arith.constant 0 : index
    %c0_106 = arith.constant 0 : index
    %329 = vector.load %arg19[%c0_105, %c0_106] : memref<8x72xbf16, #tpu.memory_space<vmem>>, vector<8x72xbf16>
    %cst_107 = arith.constant dense<0.000000e+00> : vector<8x512xf32>
    %330 = tpu.matmul %329, %326, %cst_107 {dimension_numbers = #tpu.dot_dimension_numbers<[1], [0], [0], [1], [0, 0, 1, 1], [], []>} : vector<8x72xbf16>, vector<72x512xbf16>, vector<8x512xf32> -> vector<8x512xf32>
    %331 = arith.addf %328, %330 : vector<8x512xf32>
    %c0_108 = arith.constant 0 : index
    %c0_109 = arith.constant 0 : index
    %332 = vector.load %arg20[%c0_108, %c0_109] : memref<8x1xf32, #tpu.memory_space<vmem>>, vector<8x1xf32>
    %333 = vector.broadcast %332 : vector<8x1xf32> to vector<8x512xf32>
    %334 = arith.addf %331, %333 : vector<8x512xf32>
    %cst_110 = arith.constant 0.000000e+00 : f32
    %335 = vector.broadcast %cst_110 : f32 to vector<8x512xf32>
    %336 = arith.maximumf %334, %335 : vector<8x512xf32>
    %c17_i32_111 = arith.constant 17 : i32
    %337 = tpu.dynamic_rotate %336 by %c17_i32_111 dim 1 : vector<8x512xf32>, i32 -> vector<8x512xf32>
    %338 = vector.extract_strided_slice %0 {offsets = [0, 0], sizes = [1, 512], strides = [1, 1]} : vector<16x512xf32> to vector<1x512xf32>
    %339 = vector.broadcast %338 : vector<1x512xf32> to vector<8x512xf32>
    %340 = arith.mulf %337, %339 : vector<8x512xf32>
    %c16_i32_112 = arith.constant 16 : i32
    %341 = tpu.dynamic_rotate %336 by %c16_i32_112 dim 1 : vector<8x512xf32>, i32 -> vector<8x512xf32>
    %342 = vector.extract_strided_slice %0 {offsets = [1, 0], sizes = [1, 512], strides = [1, 1]} : vector<16x512xf32> to vector<1x512xf32>
    %343 = vector.broadcast %342 : vector<1x512xf32> to vector<8x512xf32>
    %344 = arith.mulf %341, %343 : vector<8x512xf32>
    %c15_i32_113 = arith.constant 15 : i32
    %345 = tpu.dynamic_rotate %336 by %c15_i32_113 dim 1 : vector<8x512xf32>, i32 -> vector<8x512xf32>
    %346 = vector.extract_strided_slice %0 {offsets = [2, 0], sizes = [1, 512], strides = [1, 1]} : vector<16x512xf32> to vector<1x512xf32>
    %347 = vector.broadcast %346 : vector<1x512xf32> to vector<8x512xf32>
    %348 = arith.mulf %345, %347 : vector<8x512xf32>
    %c1_i32_114 = arith.constant 1 : i32
    %349 = tpu.dynamic_rotate %336 by %c1_i32_114 dim 1 : vector<8x512xf32>, i32 -> vector<8x512xf32>
    %350 = vector.extract_strided_slice %0 {offsets = [3, 0], sizes = [1, 512], strides = [1, 1]} : vector<16x512xf32> to vector<1x512xf32>
    %351 = vector.broadcast %350 : vector<1x512xf32> to vector<8x512xf32>
    %352 = arith.mulf %349, %351 : vector<8x512xf32>
    %c511_i32_115 = arith.constant 511 : i32
    %353 = tpu.dynamic_rotate %336 by %c511_i32_115 dim 1 : vector<8x512xf32>, i32 -> vector<8x512xf32>
    %354 = vector.extract_strided_slice %0 {offsets = [5, 0], sizes = [1, 512], strides = [1, 1]} : vector<16x512xf32> to vector<1x512xf32>
    %355 = vector.broadcast %354 : vector<1x512xf32> to vector<8x512xf32>
    %356 = arith.mulf %353, %355 : vector<8x512xf32>
    %c497_i32_116 = arith.constant 497 : i32
    %357 = tpu.dynamic_rotate %336 by %c497_i32_116 dim 1 : vector<8x512xf32>, i32 -> vector<8x512xf32>
    %358 = vector.extract_strided_slice %0 {offsets = [6, 0], sizes = [1, 512], strides = [1, 1]} : vector<16x512xf32> to vector<1x512xf32>
    %359 = vector.broadcast %358 : vector<1x512xf32> to vector<8x512xf32>
    %360 = arith.mulf %357, %359 : vector<8x512xf32>
    %c496_i32_117 = arith.constant 496 : i32
    %361 = tpu.dynamic_rotate %336 by %c496_i32_117 dim 1 : vector<8x512xf32>, i32 -> vector<8x512xf32>
    %362 = vector.extract_strided_slice %0 {offsets = [7, 0], sizes = [1, 512], strides = [1, 1]} : vector<16x512xf32> to vector<1x512xf32>
    %363 = vector.broadcast %362 : vector<1x512xf32> to vector<8x512xf32>
    %364 = arith.mulf %361, %363 : vector<8x512xf32>
    %c495_i32_118 = arith.constant 495 : i32
    %365 = tpu.dynamic_rotate %336 by %c495_i32_118 dim 1 : vector<8x512xf32>, i32 -> vector<8x512xf32>
    %366 = vector.extract_strided_slice %0 {offsets = [8, 0], sizes = [1, 512], strides = [1, 1]} : vector<16x512xf32> to vector<1x512xf32>
    %367 = vector.broadcast %366 : vector<1x512xf32> to vector<8x512xf32>
    %368 = arith.mulf %365, %367 : vector<8x512xf32>
    %369 = tpu.concatenate %340, %344, %348, %352, %336, %356, %360, %364, %368 in 0 : vector<8x512xf32>, vector<8x512xf32>, vector<8x512xf32>, vector<8x512xf32>, vector<8x512xf32>, vector<8x512xf32>, vector<8x512xf32>, vector<8x512xf32>, vector<8x512xf32> -> vector<72x512xf32>
    %370 = arith.truncf %369 : vector<72x512xf32> to vector<72x512xbf16>
    %c0_119 = arith.constant 0 : index
    %c0_120 = arith.constant 0 : index
    %371 = vector.load %arg21[%c0_119, %c0_120] : memref<8x72xbf16, #tpu.memory_space<vmem>>, vector<8x72xbf16>
    %cst_121 = arith.constant dense<0.000000e+00> : vector<8x512xf32>
    %372 = tpu.matmul %371, %370, %cst_121 {dimension_numbers = #tpu.dot_dimension_numbers<[1], [0], [0], [1], [0, 0, 1, 1], [], []>} : vector<8x72xbf16>, vector<72x512xbf16>, vector<8x512xf32> -> vector<8x512xf32>
    %c0_122 = arith.constant 0 : index
    %c0_123 = arith.constant 0 : index
    %373 = vector.load %arg22[%c0_122, %c0_123] : memref<8x1xf32, #tpu.memory_space<vmem>>, vector<8x1xf32>
    %374 = vector.broadcast %373 : vector<8x1xf32> to vector<8x512xf32>
    %375 = arith.addf %372, %374 : vector<8x512xf32>
    %376 = arith.negf %375 : vector<8x512xf32>
    %377 = math.exp %376 : vector<8x512xf32>
    %cst_124 = arith.constant 1.000000e+00 : f32
    %378 = vector.broadcast %cst_124 : f32 to vector<8x512xf32>
    %379 = arith.addf %378, %377 : vector<8x512xf32>
    %380 = arith.divf %378, %379 : vector<8x512xf32>
    %381 = tpu.concatenate %121, %204, %292, %380 in 0 : vector<8x512xf32>, vector<8x512xf32>, vector<8x512xf32>, vector<8x512xf32> -> vector<32x512xf32>
    %c0_125 = arith.constant 0 : index
    %c0_126 = arith.constant 0 : index
    %c0_127 = arith.constant 0 : index
    %382 = vector.load %arg23[%c0_125, %c0_126, %c0_127] : memref<1x32x512xf32, #tpu.memory_space<vmem>>, vector<1x32x512xf32>
    %383 = vector.shape_cast %382 : vector<1x32x512xf32> to vector<32x512xf32>
    %384 = vector.shape_cast %381 : vector<32x512xf32> to vector<1x32x512xf32>
    tpu.vector_store %arg23[%c0_125, %c0_126, %c0_127], %384 {strides = array<i32>} : memref<1x32x512xf32, #tpu.memory_space<vmem>>, vector<1x32x512xf32>,
    return
  }
  func.func @transform_0(%arg0: i32) -> (i32, i32, i32) {
    %c0_i32 = arith.constant 0 : i32
    %c0_i32_0 = arith.constant 0 : i32
    %c0_i32_1 = arith.constant 0 : i32
    return %arg0, %c0_i32, %c0_i32_0 : i32, i32, i32
  }
  func.func @transform_1(%arg0: i32) -> (i32, i32) {
    %c0_i32 = arith.constant 0 : i32
    %c0_i32_0 = arith.constant 0 : i32
    %c0_i32_1 = arith.constant 0 : i32
    return %c0_i32, %c0_i32_0 : i32, i32
  }
  func.func @transform_2(%arg0: i32) -> (i32, i32) {
    %c0_i32 = arith.constant 0 : i32
    %c0_i32_0 = arith.constant 0 : i32
    %c0_i32_1 = arith.constant 0 : i32
    return %c0_i32, %c0_i32_0 : i32, i32
  }
  func.func @transform_3(%arg0: i32) -> (i32, i32) {
    %c0_i32 = arith.constant 0 : i32
    %c0_i32_0 = arith.constant 0 : i32
    %c0_i32_1 = arith.constant 0 : i32
    return %c0_i32, %c0_i32_0 : i32, i32
  }
  func.func @transform_4(%arg0: i32) -> (i32, i32) {
    %c0_i32 = arith.constant 0 : i32
    %c0_i32_0 = arith.constant 0 : i32
    %c0_i32_1 = arith.constant 0 : i32
    return %c0_i32, %c0_i32_0 : i32, i32
  }
  func.func @transform_5(%arg0: i32) -> (i32, i32) {
    %c0_i32 = arith.constant 0 : i32
    %c0_i32_0 = arith.constant 0 : i32
    %c0_i32_1 = arith.constant 0 : i32
    return %c0_i32, %c0_i32_0 : i32, i32
  }
  func.func @transform_6(%arg0: i32) -> (i32, i32) {
    %c0_i32 = arith.constant 0 : i32
    %c0_i32_0 = arith.constant 0 : i32
    %c0_i32_1 = arith.constant 0 : i32
    return %c0_i32, %c0_i32_0 : i32, i32
  }
  func.func @transform_7(%arg0: i32) -> (i32, i32) {
    %c0_i32 = arith.constant 0 : i32
    %c0_i32_0 = arith.constant 0 : i32
    %c0_i32_1 = arith.constant 0 : i32
    return %c0_i32, %c0_i32_0 : i32, i32
  }
  func.func @transform_8(%arg0: i32) -> (i32, i32) {
    %c0_i32 = arith.constant 0 : i32
    %c0_i32_0 = arith.constant 0 : i32
    %c0_i32_1 = arith.constant 0 : i32
    return %c0_i32, %c0_i32_0 : i32, i32
  }
  func.func @transform_9(%arg0: i32) -> (i32, i32) {
    %c0_i32 = arith.constant 0 : i32
    %c0_i32_0 = arith.constant 0 : i32
    %c0_i32_1 = arith.constant 0 : i32
    return %c0_i32, %c0_i32_0 : i32, i32
  }
  func.func @transform_10(%arg0: i32) -> (i32, i32) {
    %c0_i32 = arith.constant 0 : i32
    %c0_i32_0 = arith.constant 0 : i32
    %c0_i32_1 = arith.constant 0 : i32
    return %c0_i32, %c0_i32_0 : i32, i32
  }
  func.func @transform_11(%arg0: i32) -> (i32, i32) {
    %c0_i32 = arith.constant 0 : i32
    %c0_i32_0 = arith.constant 0 : i32
    %c0_i32_1 = arith.constant 0 : i32
    return %c0_i32, %c0_i32_0 : i32, i32
  }
  func.func @transform_12(%arg0: i32) -> (i32, i32) {
    %c0_i32 = arith.constant 0 : i32
    %c0_i32_0 = arith.constant 0 : i32
    %c0_i32_1 = arith.constant 0 : i32
    return %c0_i32, %c0_i32_0 : i32, i32
  }
  func.func @transform_13(%arg0: i32) -> (i32, i32) {
    %c0_i32 = arith.constant 0 : i32
    %c0_i32_0 = arith.constant 0 : i32
    %c0_i32_1 = arith.constant 0 : i32
    return %c0_i32, %c0_i32_0 : i32, i32
  }
  func.func @transform_14(%arg0: i32) -> (i32, i32) {
    %c0_i32 = arith.constant 0 : i32
    %c0_i32_0 = arith.constant 0 : i32
    %c0_i32_1 = arith.constant 0 : i32
    return %c0_i32, %c0_i32_0 : i32, i32
  }
  func.func @transform_15(%arg0: i32) -> (i32, i32) {
    %c0_i32 = arith.constant 0 : i32
    %c0_i32_0 = arith.constant 0 : i32
    %c0_i32_1 = arith.constant 0 : i32
    return %c0_i32, %c0_i32_0 : i32, i32
  }
  func.func @transform_16(%arg0: i32) -> (i32, i32) {
    %c0_i32 = arith.constant 0 : i32
    %c0_i32_0 = arith.constant 0 : i32
    %c0_i32_1 = arith.constant 0 : i32
    return %c0_i32, %c0_i32_0 : i32, i32
  }
  func.func @transform_17(%arg0: i32) -> (i32, i32) {
    %c0_i32 = arith.constant 0 : i32
    %c0_i32_0 = arith.constant 0 : i32
    %c0_i32_1 = arith.constant 0 : i32
    return %c0_i32, %c0_i32_0 : i32, i32
  }
  func.func @transform_18(%arg0: i32) -> (i32, i32) {
    %c0_i32 = arith.constant 0 : i32
    %c0_i32_0 = arith.constant 0 : i32
    %c0_i32_1 = arith.constant 0 : i32
    return %c0_i32, %c0_i32_0 : i32, i32
  }
  func.func @transform_19(%arg0: i32) -> (i32, i32) {
    %c0_i32 = arith.constant 0 : i32
    %c0_i32_0 = arith.constant 0 : i32
    %c0_i32_1 = arith.constant 0 : i32
    return %c0_i32, %c0_i32_0 : i32, i32
  }
  func.func @transform_20(%arg0: i32) -> (i32, i32) {
    %c0_i32 = arith.constant 0 : i32
    %c0_i32_0 = arith.constant 0 : i32
    %c0_i32_1 = arith.constant 0 : i32
    return %c0_i32, %c0_i32_0 : i32, i32
  }
  func.func @transform_21(%arg0: i32) -> (i32, i32) {
    %c0_i32 = arith.constant 0 : i32
    %c0_i32_0 = arith.constant 0 : i32
    %c0_i32_1 = arith.constant 0 : i32
    return %c0_i32, %c0_i32_0 : i32, i32
  }
  func.func @transform_22(%arg0: i32) -> (i32, i32, i32) {
    %c0_i32 = arith.constant 0 : i32
    %c0_i32_0 = arith.constant 0 : i32
    %c0_i32_1 = arith.constant 0 : i32
    return %arg0, %c0_i32, %c0_i32_0 : i32, i32, i32
  }
}

</mosaic_0001>

<bundles_post_ra>
// kernel: tpu_custom_call.1
= control target key start
LH: loop header
LB: loop body
LE: loop exit
PB: predicated region body
PF: predicated region fallthrough
CT: control target
= control target key end

     0   :  { %s6252_s0 = inlined_call_operand.hbm [shape: f32[2,16,512], index: 0, kind: input, shape index: {}]   ;;  %s6253_s1 = inlined_call_operand.vmem [shape: f32[16,512], index: 1, kind: input, shape index: {}]   ;;  %s6254_s2 = inlined_call_operand.vmem [shape: bf16[8,72], index: 2, kind: input, shape index: {}]   ;;  %s6255_s3 = inlined_call_operand.vmem [shape: bf16[8,72], index: 3, kind: input, shape index: {}]   ;;  %s6256_s4 = inlined_call_operand.vmem [shape: f32[8,1], index: 4, kind: input, shape index: {}]   ;;  %s6257_s5 = inlined_call_operand.vmem [shape: bf16[8,72], index: 5, kind: input, shape index: {}]   ;;  %s6258_s6 = inlined_call_operand.vmem [shape: f32[8,1], index: 6, kind: input, shape index: {}]   ;;  %s6259_s7 = inlined_call_operand.vmem [shape: bf16[8,72], index: 7, kind: input, shape index: {}]   ;;  %s6260_s8 = inlined_call_operand.vmem [shape: bf16[8,72], index: 8, kind: input, shape index: {}]   ;;  %s6261_s9 = inlined_call_operand.vmem [shape: f32[8,1], index: 9, kind: input, shape index: {}]   ;;  %s6262_s10 = inlined_call_operand.vmem [shape: bf16[8,72], index: 10, kind: input, shape index: {}]   ;;  %s6263_s11 = inlined_call_operand.vmem [shape: f32[8,1], index: 11, kind: input, shape index: {}]   ;;  %s6264_s12 = inlined_call_operand.vmem [shape: bf16[8,72], index: 12, kind: input, shape index: {}]   ;;  %s6265_s13 = inlined_call_operand.vmem [shape: bf16[8,72], index: 13, kind: input, shape index: {}]   ;;  %s6266_s14 = inlined_call_operand.vmem [shape: f32[8,1], index: 14, kind: input, shape index: {}]   ;;  %s6267_s15 = inlined_call_operand.vmem [shape: bf16[8,72], index: 15, kind: input, shape index: {}]   ;;  %s6268_s16 = inlined_call_operand.vmem [shape: f32[8,1], index: 16, kind: input, shape index: {}]   ;;  %s6269_s17 = inlined_call_operand.vmem [shape: bf16[8,72], index: 17, kind: input, shape index: {}]   ;;  %s6270_s18 = inlined_call_operand.vmem [shape: bf16[8,72], index: 18, kind: input, shape index: {}]   ;;  %s6271_s19 = inlined_call_operand.vmem [shape: f32[8,1], index: 19, kind: input, shape index: {}]   ;;  %s6272_s20 = inlined_call_operand.vmem [shape: bf16[8,72], index: 20, kind: input, shape index: {}]   ;;  %s6273_s21 = inlined_call_operand.vmem [shape: f32[8,1], index: 21, kind: input, shape index: {}]   ;;  %s6274_s22 = inlined_call_operand.hbm [shape: f32[2,32,512], index: 22, kind: output, shape index: {}]  }
   0x1   :  { %6348 = sst [smem:[#allocation48_spill]] %s6252_s0 }
   0x2   :  { %6349 = sst [smem:[#allocation49_spill]] %s6253_s1 }
   0x3   :  { %6350 = sst [smem:[#allocation50_spill]] %s6254_s2 }
   0x4   :  { %6351 = sst [smem:[#allocation51_spill]] %s6255_s3 }
   0x5   :  { %6352 = sst [smem:[#allocation52_spill]] %s6256_s4 }
   0x6   :  { %6353 = sst [smem:[#allocation53_spill]] %s6257_s5 }
   0x7   :  { %6354 = sst [smem:[#allocation54_spill]] %s6258_s6 }
   0x8   :  { %6355 = sst [smem:[#allocation55_spill]] %s6259_s7 }
   0x9   :  { %6356 = sst [smem:[#allocation56_spill]] %s6260_s8 }
   0xa   :  { %6357 = sst [smem:[#allocation57_spill]] %s6272_s20 }
   0xb   :  { %6358 = sst [smem:[#allocation58_spill]] %s6274_s22 }
   0xc   :  { %27 = vsyncpa [#allocation3], 0 }
   0xd   :  { %29 = vsyncpa [#allocation3 + $0x1], 0 }
   0xe   :  { %30 = vsyncpa [#allocation4], 0 }
   0xf   :  { %32 = vsyncpa [#allocation4 + $0x1], 0  ;;  %s3955_s3 = smov 0   ;;  %s3957_s28 = smov 0  }
  0x10   :  { %s3959_s29 = smov 0   ;;  %s3961_s30 = smov 0  }
  0x11 LB: > { %6359 = sst [smem:[#allocation8_spill]] %s3811_s3  ;;  %s3976_s4 = sadd.s32 4294967295, %s3823_s30   ;;  %s3823_s30 = sphi %s3961_s30, %s6490_s30   ;;  %s3819_s29 = sphi %s3959_s29, %s6495_s29   ;;  %s3815_s28 = sphi %s3957_s28, %s6494_s28   ;;  %s3811_s3 = sphi %s3955_s3, %s6493_s3  }
  0x12   : > { %6360 = sst [smem:[#allocation9_spill]] %s3819_s29  ;;  %s3562_s0 = sadd.s32 4294967294, %s3823_s30  }
  0x13   : > { %6361 = sst [smem:[#allocation10_spill]] %s3976_s4  ;;  %s3980_s23 = sadd.s32 1, %s3823_s30  }
  0x14   : > { %6362 = sst [smem:[#allocation11_spill]] %s3980_s23  ;;  %s45_s1 = sadd.s32 1, %s3819_s29 }
  0x15   : > { %s42_s5 = ssub.s32 %s3823_s30, %s3980_s23  ;;  %p52_p0 = scmp.ne.s32.totalorder %s3819_s29, %s3815_s28 }
  0x16   : > { %p43_p1 = scmp.eq.s32.totalorder %s42_s5, 0  ;;  %p53_p2 = scmp.eq.s32.totalorder %s3823_s30, 0 }
  0x17   : > { %p58_p3 = scmp.ne.s32.totalorder %s3815_s28, %s3811_s3  ;;  %p59_p4 = scmp.eq.s32.totalorder %s3976_s4, 0 }
  0x18   : > { %s3992_s24 = scalar_select %p43_p1, %s3819_s29, %s45_s1  }
  0x19   : > { %p3994_p5 = por %p53_p2, %p52_p0  ;;  %p3998_p6 = por %p59_p4, %p58_p3 }
  0x1a   : > { %6363 = sst [smem:[#allocation12_spill]] %s3992_s24  ;;  %p523_p7 = scmp.eq.s32.totalorder %s3976_s4, 1 }
  0x1b   : > { %p529_p8 = scmp.eq.s32.totalorder %s3562_s0, 1  ;;  %p3646_p10 = scmp.lt.s32.totalorder %s3823_s30, 2 }
  0x1c   : > { %p4005_p11 = por %p523_p7, %p52_p0  ;;  %s612_s27 = sand.u32 1, %s3819_s29  }
  0x1d   : > { %p4009_p12 = por %p529_p8, %p58_p3  ;;  %s3632_s1 = sshll.u32 %s3823_s30, 10 }
  0x1e   : > { %s6366_s26 = scalar_select %p4005_p11, 1, 0 }
  0x1f   : > { %s6368_s2 = scalar_select %p4009_p12, 1, 0 }
  0x20   : > { %6367 = sst [smem:[#allocation13_spill]] %s6366_s26  ;;  %s3565_s5 = sshll.u32 %s612_s27, 6 }
  0x21   : > { %s6369_s3 = sld [smem:[#allocation48_spill]]  ;;  %s616_s0 = scalar_lea.vmem [#allocation2], %s3565_s5 }
  0x22   : > { %s623_s4 = sshll.u32 %s616_s0, 4  ;;  %p4022_p13 = pnand %p3646_p10, %p3994_p5  ;;  %s4026_s4 = int_to_ptr.vmem [resolvable:$true] %s623_s4 }
  0x23   : > { %s4028_s29 = scalar_lea.sflag [#allocation3], %s612_s27 }
  0x24   : > { %p3729_p1 = pneg %p4022_p13 }
  0x27   : > { %s6370_s22 = smov %s6369_s3  ;;  %s4018_s20 = scalar_lea.hbm %s6369_s3, %s3632_s1 }
  0x28   : > { %s3727_s23 = scalar_lea.hbm %s4018_s20, 1024  ;;  %s3732_s6 = scalar_lea.hbm %s6370_s22, 2048 }
  0x29   : > { %p3728_p0 = scmp.ne.s32.totalorder %s4018_s20, %s3727_s23  ;;  %p3733_p4 = scmp.lt.u32.totalorder %s4018_s20, %s6370_s22 }
  0x2a   : > { %p3734_p5 = scmp.lt.u32.totalorder %s3732_s6, %s3727_s23  ;;  %p3736_p8 = scmp.lt.u32.totalorder %s3727_s23, %s4018_s20 }
  0x2b   : > { %p3730_p2 = pnand %p3729_p1, %p3728_p0 }
  0x2c   : > { %p3735_p7 = por %p3734_p5, %p3733_p4 }
  0x2d   : > { %p3731_p3 = pneg %p3730_p2 }
  0x2e   : > { %p3737_p10 = por %p3736_p8, %p3735_p7 }
  0x30   : > { %p3738_p9 = pnand %p3737_p10, %p3731_p3 }
  0x32   : > { %3741 = shalt.err (!%p3738_p9)
}
  0x33   : > { %s3742_s27 = scalar_lea.vmem %s4026_s4, 1024  ;;  %s3825_s0 = smov [#allocation2]  }
  0x34   : > { %p3743_p0 = scmp.ne.s32.totalorder %s4026_s4, %s3742_s27  ;;  %s3747_s3 = sshll.u32 %s3825_s0, 4  ;;  %s3748_s3 = int_to_ptr.vmem [resolvable:$false] %s3747_s3 }
  0x35   : > { %s3749_s24 = scalar_lea.vmem %s3748_s3, 2048  ;;  %p3750_p11 = scmp.lt.s32.totalorder %s4026_s4, %s3748_s3 }
  0x36   : > { %p3745_p2 = pnand %p3743_p0, %p3729_p1  ;;  %p3751_p4 = scmp.lt.s32.totalorder %s3749_s24, %s3742_s27 }
  0x38   : > { %p3746_p12 = pneg %p3745_p2  ;;  %p3752_p5 = por %p3751_p4, %p3750_p11 }
  0x3a   : > { %p3753_p7 = pnand %p3752_p5, %p3746_p12 }
  0x3c   : > { %3756 = shalt.err (!%p3753_p7)
}
  0x3d   : > { %s3826_s23 = smov 512   ;;  %s3827_s6 = smov 32  }
  0x3e   : > { %3641 = dma.hbm_to_vmem [thread:$0]  (!%p4022_p13), %s4018_s20, 1024, %s4026_s4, %s4028_s29, %s3826_s23, %s3826_s23, %s3827_s6  }
  0x3f   : > { %p3568_p9 = scmp.ge.s32.totalorder %s3823_s30, 1  ;;  %p631_p1 = scmp.lt.s32.totalorder %s3823_s30, 3 }
  0x41   : > { %p632_p3 = pnand %p3568_p9, %p631_p1 }
  0x43   : > { %635 = sbr.rel (%p632_p3) target bundleno = 3474 (0xd92), region = 108 }
  0x4a   : > { %s4059_s1 = sand.u32 1, %s3815_s28  }
  0x4b   : > { %s3569_s5 = sshll.u32 %s4059_s1, 6  ;;  %s638_s27 = scalar_lea.sflag [#allocation3], %s4059_s1 }
  0x4c   : > { %s4063_s0 = scalar_lea.vmem [#allocation2], %s3569_s5 }
  0x4d   : > { %3802 = dma.done.wait (%p3998_p6), %s638_s27, 1024  }
  0x4e   : > { %3804 = vsyncadd (%p3998_p6), %s638_s27, 4294966272  ;;  %v4070_v0 = vld [vmem:[%s4063_s0 + $0x30] sm:$0xff]  ;;  %v4073_v1 = vld [vmem:[%s4063_s0 + $0x20] sm:$0xff]  ;;  %s3828_s20 = smov 17   ;;  %s3829_s29 = smov 16   ;;  %v6296_v8 = vmov 0   ;;  %v727_v9 = vlaneseq }
  0x4f   : > { %1009 = vrot.lane.b32.xlu1 %v4070_v0, %s3828_s20  ;;  %1005 = vrot.lane.b32.xlu0 %v4073_v1, %s3828_s20  ;;  %v4080_v2 = vld [vmem:[%s4063_s0 + $0x38] sm:$0xff]  ;;  %v4083_v3 = vld [vmem:[%s4063_s0 + $0x28] sm:$0xff]  ;;  %s6294_s4 = smov 15   ;;  %s6292_s25 = smov 1   ;;  %vm1159_vm8 = vcmask 1043456   ;;  %vm1155_vm9 = vcmask 588800  }
  0x50   : > { %s6290_s26 = smov 127   ;;  %s6286_s3 = smov 113   ;;  %v4146_v4 = vld [vmem:[%s4063_s0 + $0x8] sm:$0xff]  ;;  %v4149_v5 = vld [vmem:[%s4063_s0] sm:$0xff]  ;;  %v4156_v6 = vld [vmem:[%s4063_s0 + $0x18] sm:$0xff]  ;;  %1204 = vmatprep.mubr.bf16.mxu0 %v6296_v8  ;;  %1245 = vmatprep.mubr.bf16.mxu1 %v6296_v8  ;;  %v4213_v10 = vshrl.u32 %v727_v9, 7 }
  0x51   : > { %s6288_s24 = smov 112   ;;  %s3835_s23 = smov 111   ;;  %v4159_v7 = vld [vmem:[%s4063_s0 + $0x10] sm:$0xff]  ;;  %3693 = vset.pattern.permute.xlu0 %v6296_v8  ;;  %3694 = vset.pattern.permute.xlu1 %v6296_v8  ;;  %v4215_v13 = vand.u32 127, %v727_v9 }
  0x52   : > { %v4222_v14 = vsub.s32 0, %v4213_v10  ;;  %v769_v15 = vsub.s32 1, %v4213_v10  ;;  %s6372_s27 = sld [smem:[#allocation49_spill]]  ;;  %v802_v57 = vsub.s32 2, %v4213_v10  ;;  %v835_v58 = vsub.s32 3, %v4213_v10  ;;  %s6376_s6 = sld [smem:[#allocation51_spill]] }
  0x53   : > { %1011 = vrot.lane.b32.xlu1 %v4080_v2, %s3828_s20  ;;  %1007 = vrot.lane.b32.xlu0 %v4083_v3, %s3828_s20  ;;  %vm729_vm0 = vcmp.lt.s32.totalorder %v4215_v13, 17  ;;  %vm762_vm1 = vcmp.lt.s32.totalorder %v4215_v13, 16  ;;  %vm795_vm2 = vcmp.lt.s32.totalorder %v4215_v13, 15  ;;  %vm828_vm3 = vcmp.lt.s32.totalorder %v4215_v13, 1  ;;  %s3570_s5 = sshll.u32 %s4059_s1, 7  ;;  %s6418_s8 = sld [smem:[#allocation56_spill]] }
  0x54   : > { %vm861_vm4 = vcmp.lt.s32.totalorder %v4215_v13, 127  ;;  %vm927_vm5 = vcmp.lt.s32.totalorder %v4215_v13, 112  ;;  %vm894_vm6 = vcmp.lt.s32.totalorder %v4215_v13, 113  ;;  %vm960_vm7 = vcmp.lt.s32.totalorder %v4215_v13, 111  ;;  %s4914_s0 = scalar_lea.vmem [#allocation5], %s3570_s5  ;;  %s6430_s7 = sld [smem:[#allocation55_spill]] }
  0x57   : > { %1023 = vrot.lane.b32.xlu1 %v4083_v3, %s3829_s29  ;;  %1021 = vrot.lane.b32.xlu0 %v4073_v1, %s3829_s29 }
  0x58   : > { %v4228_v16 = vld [vmem:[%s6372_s27 + $0x8] sm:$0xff]  ;;  %v4234_v19 = vld [vmem:[%s6372_s27] sm:$0xff]  ;;  %v4239_v20 = vld [vmem:[%s6372_s27 + $0x18] sm:$0xff] }
  0x59   : > { %v4244_v21 = vld [vmem:[%s6372_s27 + $0x10] sm:$0xff]  ;;  %v4253_v22 = vrot.slane %v4228_v16, %v4222_v14  ;;  %v4256_v23 = vrot.slane %v4228_v16, %v769_v15  ;;  %v4262_v25 = vrot.slane %v4234_v19, %v4222_v14  ;;  %v4265_v28 = vrot.slane %v4234_v19, %v769_v15 }
  0x5a   : > { %v4269_v29 = vrot.slane %v4239_v20, %v4222_v14  ;;  %v4272_v30 = vrot.slane %v4239_v20, %v769_v15  ;;  %v4276_v31 = vrot.slane %v4244_v21, %v4222_v14  ;;  %v4285_v35 = vrot.slane %v4244_v21, %v769_v15 }
  0x5b   : > { %1027 = vrot.lane.b32.xlu1 %v4080_v2, %s3829_s29  ;;  %1025 = vrot.lane.b32.xlu0 %v4070_v0, %s3829_s29  ;;  %6373 = vst [vmem:[#allocation14_spill] sm:$0xff] %v4256_v23  ;;  %v4315_v61 = vrot.slane %v4228_v16, %v802_v57  ;;  %v4318_v62 = vrot.slane %v4228_v16, %v835_v58 }
  0x5c   : > { %6374 = vst [vmem:[#allocation15_spill] sm:$0xff] %v4285_v35  ;;  %v4323_v9 = vrot.slane %v4234_v19, %v802_v57 }
  0x5f   : > { %1039 = vrot.lane.b32.xlu1 %v4083_v3, %s6294_s4  ;;  %1037 = vrot.lane.b32.xlu0 %v4073_v1, %s6294_s4 }
  0x63   : > { %1043 = vrot.lane.b32.xlu1 %v4080_v2, %s6294_s4  ;;  %1041 = vrot.lane.b32.xlu0 %v4070_v0, %s6294_s4 }
  0x67   : > { %1055 = vrot.lane.b32.xlu1 %v4083_v3, %s6292_s25  ;;  %1053 = vrot.lane.b32.xlu0 %v4073_v1, %s6292_s25 }
  0x6b   : > { %1059 = vrot.lane.b32.xlu1 %v4080_v2, %s6292_s25  ;;  %1057 = vrot.lane.b32.xlu0 %v4070_v0, %s6292_s25 }
  0x6f   : > { %1071 = vrot.lane.b32.xlu1 %v4083_v3, %s6290_s26  ;;  %1069 = vrot.lane.b32.xlu0 %v4073_v1, %s6290_s26 }
  0x73   : > { %1075 = vrot.lane.b32.xlu1 %v4080_v2, %s6290_s26  ;;  %1073 = vrot.lane.b32.xlu0 %v4070_v0, %s6290_s26 }
  0x77   : > { %1087 = vrot.lane.b32.xlu1 %v4083_v3, %s6286_s3  ;;  %1085 = vrot.lane.b32.xlu0 %v4073_v1, %s6286_s3 }
  0x7b   : > { %1091 = vrot.lane.b32.xlu1 %v4080_v2, %s6286_s3  ;;  %1089 = vrot.lane.b32.xlu0 %v4070_v0, %s6286_s3 }
  0x7f   : > { %1103 = vrot.lane.b32.xlu1 %v4083_v3, %s6288_s24  ;;  %1101 = vrot.lane.b32.xlu0 %v4073_v1, %s6288_s24 }
  0x83   : > { %1107 = vrot.lane.b32.xlu1 %v4080_v2, %s6288_s24  ;;  %1105 = vrot.lane.b32.xlu0 %v4070_v0, %s6288_s24 }
  0x87   : > { %1119 = vrot.lane.b32.xlu1 %v4083_v3, %s3835_s23  ;;  %1117 = vrot.lane.b32.xlu0 %v4073_v1, %s3835_s23 }
  0x8b   : > { %1123 = vrot.lane.b32.xlu1 %v4080_v2, %s3835_s23  ;;  %1121 = vrot.lane.b32.xlu0 %v4070_v0, %s3835_s23 }
  0x8f   : > { %721 = vrot.lane.b32.xlu1 %v4146_v4, %s3828_s20  ;;  %719 = vrot.lane.b32.xlu0 %v4149_v5, %s3828_s20 }
  0x93   : > { %725 = vrot.lane.b32.xlu1 %v4156_v6, %s3828_s20  ;;  %723 = vrot.lane.b32.xlu0 %v4159_v7, %s3828_s20 }
  0x97   : > { %756 = vrot.lane.b32.xlu1 %v4146_v4, %s3829_s29  ;;  %754 = vrot.lane.b32.xlu0 %v4149_v5, %s3829_s29 }
  0x9b   : > { %760 = vrot.lane.b32.xlu1 %v4156_v6, %s3829_s29  ;;  %758 = vrot.lane.b32.xlu0 %v4159_v7, %s3829_s29 }
  0x9f   : > { %789 = vrot.lane.b32.xlu1 %v4146_v4, %s6294_s4  ;;  %787 = vrot.lane.b32.xlu0 %v4149_v5, %s6294_s4 }
  0xa3   : > { %793 = vrot.lane.b32.xlu1 %v4156_v6, %s6294_s4  ;;  %791 = vrot.lane.b32.xlu0 %v4159_v7, %s6294_s4  ;;  %s6397_s4 = sld [smem:[#allocation50_spill]] }
  0xa7   : > { %822 = vrot.lane.b32.xlu1 %v4146_v4, %s6292_s25  ;;  %820 = vrot.lane.b32.xlu0 %v4149_v5, %s6292_s25 }
  0xab   : > { %826 = vrot.lane.b32.xlu1 %v4156_v6, %s6292_s25  ;;  %824 = vrot.lane.b32.xlu0 %v4159_v7, %s6292_s25  ;;  %s6399_s25 = smov 15  }
  0xaf   : > { %855 = vrot.lane.b32.xlu1 %v4146_v4, %s6290_s26  ;;  %853 = vrot.lane.b32.xlu0 %v4149_v5, %s6290_s26 }
  0xb3   : > { %859 = vrot.lane.b32.xlu1 %v4156_v6, %s6290_s26  ;;  %857 = vrot.lane.b32.xlu0 %v4159_v7, %s6290_s26  ;;  %s6375_s26 = sld [smem:[#allocation52_spill]] }
  0xb7   : > { %888 = vrot.lane.b32.xlu1 %v4146_v4, %s6286_s3  ;;  %886 = vrot.lane.b32.xlu0 %v4149_v5, %s6286_s3 }
  0xb9   : > { %v1351_v39 = vld [vmem:[%s6375_s26] sm:$0xff]  ;;  %s6400_s26 = smov 1  }
  0xbb   : > { %892 = vrot.lane.b32.xlu1 %v4156_v6, %s6286_s3  ;;  %890 = vrot.lane.b32.xlu0 %v4159_v7, %s6286_s3  ;;  %s6401_s3 = smov 127  }
  0xbf   : > { %921 = vrot.lane.b32.xlu1 %v4146_v4, %s6288_s24  ;;  %919 = vrot.lane.b32.xlu0 %v4149_v5, %s6288_s24 }
  0xc1   : > { %v1010_v11 = vpop.permute.xlu1 %1009  ;;  %v1006_v12 = vpop.permute.xlu0 %1005 }
  0xc3   : > { %925 = vrot.lane.b32.xlu1 %v4156_v6, %s6288_s24  ;;  %923 = vrot.lane.b32.xlu0 %v4159_v7, %s6288_s24  ;;  %s6402_s24 = smov 113  }
  0xc5   : > { %v1012_v17 = vpop.permute.xlu1 %1011  ;;  %v1008_v18 = vpop.permute.xlu0 %1007 }
  0xc6   : > { %v1015_v24 = vsel %vm729_vm0, %v1006_v12, %v1008_v18  ;;  %v1016_v32 = vsel %vm729_vm0, %v1012_v17, %v1006_v12  ;;  %v1013_v34 = vsel %vm729_vm0, %v1010_v11, %v1012_v17  ;;  %v1014_v36 = vsel %vm729_vm0, %v1008_v18, %v1010_v11 }
  0xc7   : > { %954 = vrot.lane.b32.xlu1 %v4146_v4, %s3835_s23  ;;  %952 = vrot.lane.b32.xlu0 %v4149_v5, %s3835_s23  ;;  %v1018_v37 = vmul.f32 %v1015_v24, %v4253_v22  ;;  %v1017_v43 = vmul.f32 %v1016_v32, %v4262_v25  ;;  %v1020_v44 = vmul.f32 %v1013_v34, %v4269_v29 }
  0xc8   : > { %v1019_v48 = vmul.f32 %v1014_v36, %v4276_v31  ;;  %v4326_v11 = vrot.slane %v4244_v21, %v802_v57  ;;  %v4329_v12 = vrot.slane %v4239_v20, %v802_v57  ;;  %v4346_v36 = vrot.slane %v4239_v20, %v835_v58 }
  0xc9   : > { %v1024_v26 = vpop.permute.xlu1 %1023  ;;  %v1022_v27 = vpop.permute.xlu0 %1021 }
  0xca   : > { %v1031_v33 = vsel %vm762_vm1, %v1022_v27, %v1024_v26 }
  0xcb   : > { %958 = vrot.lane.b32.xlu1 %v4156_v6, %s3835_s23  ;;  %956 = vrot.lane.b32.xlu0 %v4159_v7, %s3835_s23  ;;  %v1034_v38 = vmul.f32 %v1031_v33, %v4256_v23 }
  0xcd   : > { %v1028_v40 = vpop.permute.xlu1 %1027  ;;  %v1026_v41 = vpop.permute.xlu0 %1025  ;;  %v1134_v42 = vpack.c.bf16 %v1034_v38, %v1018_v37 }
  0xce   : > { %v1032_v45 = vsel %vm762_vm1, %v1028_v40, %v1022_v27  ;;  %v1030_v46 = vsel %vm762_vm1, %v1024_v26, %v1026_v41  ;;  %v1029_v47 = vsel %vm762_vm1, %v1026_v41, %v1028_v40  ;;  %v4336_v26 = vrot.slane %v4234_v19, %v835_v58 }
  0xcf   : > { %1172 = vmatprep.subr.bf16.mxu0 %v1134_v42  ;;  %v1033_v49 = vmul.f32 %v1032_v45, %v4265_v28  ;;  %v1036_v50 = vmul.f32 %v1029_v47, %v4272_v30  ;;  %v1035_v51 = vmul.f32 %v1030_v46, %v4285_v35  ;;  %1354 = vperm.xlu0 %3693, %v1351_v39   ;;  %v868_v42 = vsub.s32 5, %v4213_v10 }
  0xd0   : > { %v4339_v27 = vrot.slane %v4244_v21, %v835_v58 }
  0xd1   : > { %v1040_v52 = vpop.permute.xlu1 %1039  ;;  %v1038_v53 = vpop.permute.xlu0 %1037  ;;  %v1133_v54 = vpack.c.bf16 %v1033_v49, %v1017_v43  ;;  %v1136_v55 = vpack.c.bf16 %v1036_v50, %v1020_v44  ;;  %v1135_v56 = vpack.c.bf16 %v1035_v51, %v1019_v48  ;;  %v4368_v57 = vrot.slane %v4239_v20, %v868_v42 }
  0xd2   : > { %v1047_v63 = vsel %vm795_vm2, %v1038_v53, %v1040_v52 }
  0xd3   : > { %1173 = vmatpush1.bf16.msra.mxu0 %v1133_v54  ;;  %1213 = vmatprep.subr.bf16.mxu1 %v1136_v55  ;;  %v1050_v32 = vmul.f32 %v1047_v63, %v4315_v61 }
  0xd4   : > { %1214 = vmatpush1.bf16.msra.mxu1 %v1135_v56  ;;  %v4365_v56 = vrot.slane %v4234_v19, %v868_v42 }
  0xd5   : > { %v1044_v59 = vpop.permute.xlu1 %1043  ;;  %v1042_v60 = vpop.permute.xlu0 %1041 }
  0xd6   : > { %v1048_v18 = vsel %vm795_vm2, %v1044_v59, %v1038_v53  ;;  %v1046_v33 = vsel %vm795_vm2, %v1040_v52, %v1042_v60  ;;  %v1045_v37 = vsel %vm795_vm2, %v1042_v60, %v1044_v59  ;;  %v4373_v59 = vrot.slane %v4228_v16, %v868_v42 }
  0xd7   : > { %v1049_v38 = vmul.f32 %v1048_v18, %v4323_v9  ;;  %v1051_v43 = vmul.f32 %v1046_v33, %v4326_v11  ;;  %v1052_v47 = vmul.f32 %v1045_v37, %v4329_v12  ;;  %v4376_v60 = vrot.slane %v4244_v21, %v868_v42 }
  0xd9   : > { %v1056_v15 = vpop.permute.xlu1 %1055  ;;  %v1054_v17 = vpop.permute.xlu0 %1053 }
  0xda   : > { %v1063_v24 = vsel %vm828_vm3, %v1054_v17, %v1056_v15 }
  0xdb   : > { %v1066_v34 = vmul.f32 %v1063_v24, %v4318_v62 }
  0xdd   : > { %v1060_v39 = vpop.permute.xlu1 %1059  ;;  %v1058_v40 = vpop.permute.xlu0 %1057  ;;  %v1138_v41 = vpack.c.bf16 %v1066_v34, %v1050_v32 }
  0xde   : > { %v1064_v44 = vsel %vm828_vm3, %v1060_v39, %v1054_v17  ;;  %v1061_v45 = vsel %vm828_vm3, %v1058_v40, %v1060_v39  ;;  %v1062_v46 = vsel %vm828_vm3, %v1056_v15, %v1058_v40 }
  0xdf   : > { %v1065_v48 = vmul.f32 %v1064_v44, %v4336_v26  ;;  %v1067_v49 = vmul.f32 %v1062_v46, %v4339_v27  ;;  %v1068_v50 = vmul.f32 %v1061_v45, %v4346_v36  ;;  %1174 = vmatprep.subr.bf16.mxu0 %v1138_v41  ;;  %v934_v46 = vsub.s32 7, %v4213_v10 }
  0xe1   : > { %v1072_v51 = vpop.permute.xlu1 %1071  ;;  %v1070_v52 = vpop.permute.xlu0 %1069  ;;  %v1137_v53 = vpack.c.bf16 %v1065_v48, %v1049_v38  ;;  %v1140_v54 = vpack.c.bf16 %v1068_v50, %v1052_v47  ;;  %v1139_v55 = vpack.c.bf16 %v1067_v49, %v1051_v43  ;;  %v901_v47 = vsub.s32 6, %v4213_v10 }
  0xe2   : > { %v1079_v58 = vsel %vm861_vm4, %v1070_v52, %v1072_v51  ;;  %v4410_v50 = vrot.slane %v4234_v19, %v934_v46 }
  0xe3   : > { %1175 = vmatpush1.bf16.msra.mxu0 %v1137_v53  ;;  %1215 = vmatprep.subr.bf16.mxu1 %v1140_v54  ;;  %v1081_v17 = vmul.f32 %v1079_v58, %v4365_v56  ;;  %v4405_v49 = vrot.slane %v4244_v21, %v901_v47  ;;  %v4418_v53 = vrot.slane %v4239_v20, %v934_v46 }
  0xe4   : > { %1216 = vmatpush1.bf16.msra.mxu1 %v1139_v55  ;;  %v4421_v54 = vrot.slane %v4228_v16, %v934_v46  ;;  %v4424_v55 = vrot.slane %v4244_v21, %v934_v46  ;;  %v4428_v58 = vrot.slane %v4234_v19, %v901_v47 }
  0xe5   : > { %v1076_v63 = vpop.permute.xlu1 %1075  ;;  %v1074_v15 = vpop.permute.xlu0 %1073  ;;  %v1141_v43 = vpack.c.bf16 %v1081_v17, %v4073_v1 }
  0xe6   : > { %v1080_v18 = vsel %vm861_vm4, %v1076_v63, %v1070_v52  ;;  %v1077_v24 = vsel %vm861_vm4, %v1074_v15, %v1076_v63  ;;  %v1078_v32 = vsel %vm861_vm4, %v1072_v51, %v1074_v15  ;;  %v707_v51 = vld [vmem:[%s6372_s27 + $0x20] sm:$0xff] }
  0xe7   : > { %v1084_v33 = vmul.f32 %v1080_v18, %v4368_v57  ;;  %v1082_v34 = vmul.f32 %v1078_v32, %v4373_v59  ;;  %v1083_v37 = vmul.f32 %v1077_v24, %v4376_v60  ;;  %v4437_v21 = vrot.slane %v707_v51, %v4222_v14 }
  0xe9   : > { %v1088_v38 = vpop.permute.xlu1 %1087  ;;  %v1086_v39 = vpop.permute.xlu0 %1085  ;;  %v1142_v40 = vpack.c.bf16 %v1082_v34, %v4083_v3  ;;  %v1144_v41 = vpack.c.bf16 %v1084_v33, %v4080_v2  ;;  %v1143_v42 = vpack.c.bf16 %v1083_v37, %v4070_v0  ;;  %v4397_v2 = vrot.slane %v4239_v20, %v901_v47 }
  0xea   : > { %v4400_v0 = vrot.slane %v4228_v16, %v901_v47  ;;  %v1095_v15 = vsel %vm894_vm6, %v1086_v39, %v1088_v38 }
  0xeb   : > { %1176 = vmatprep.subr.bf16.mxu0 %v1142_v40  ;;  %1217 = vmatprep.subr.bf16.mxu1 %v1144_v41  ;;  %v710_v40 = vld [vmem:[%s6372_s27 + $0x38] sm:$0xff]  ;;  %v1097_v41 = vmul.f32 %v1095_v15, %v4428_v58 }
  0xec   : > { %1177 = vmatpush1.bf16.msra.mxu0 %v1141_v43  ;;  %1218 = vmatpush1.bf16.msra.mxu1 %v1143_v42  ;;  %v708_v42 = vld [vmem:[%s6372_s27 + $0x28] sm:$0xff]  ;;  %v709_v43 = vld [vmem:[%s6372_s27 + $0x30] sm:$0xff] }
  0xed   : > { %v1092_v44 = vpop.permute.xlu1 %1091  ;;  %v1090_v45 = vpop.permute.xlu0 %1089  ;;  %v4466_v51 = vrot.slane %v708_v42, %v4222_v14  ;;  %v1154_v42 = vld [vmem:[%s6376_s6] sm:$0xf]  ;;  %s6403_s6 = smov 112  }
  0xee   : > { %v1096_v48 = vsel %vm894_vm6, %v1092_v44, %v1086_v39  ;;  %v1094_v10 = vsel %vm894_vm6, %v1088_v38, %v1090_v45  ;;  %v1093_v63 = vsel %vm894_vm6, %v1090_v45, %v1092_v44 }
  0xef   : > { %v1100_v20 = vmul.f32 %v1096_v48, %v4397_v2  ;;  %v1098_v17 = vmul.f32 %v1094_v10, %v4400_v0  ;;  %v1099_v34 = vmul.f32 %v1093_v63, %v4405_v49  ;;  %v4463_v10 = vrot.slane %v710_v40, %v4222_v14 }
  0xf0   : > { %v4470_v63 = vrot.slane %v709_v43, %v4222_v14 }
  0xf1   : > { %v1104_v1 = vpop.permute.xlu1 %1103  ;;  %v1102_v3 = vpop.permute.xlu0 %1101 }
  0xf2   : > { %v1111_v52 = vsel %vm927_vm5, %v1102_v3, %v1104_v1 }
  0xf3   : > { %v1113_v24 = vmul.f32 %v1111_v52, %v4410_v50 }
  0xf5   : > { %v1108_v16 = vpop.permute.xlu1 %1107  ;;  %v1106_v18 = vpop.permute.xlu0 %1105  ;;  %v1145_v48 = vpack.c.bf16 %v1113_v24, %v1097_v41 }
  0xf6   : > { %v1112_v19 = vsel %vm927_vm5, %v1108_v16, %v1102_v3  ;;  %v1109_v32 = vsel %vm927_vm5, %v1106_v18, %v1108_v16  ;;  %v1110_v33 = vsel %vm927_vm5, %v1104_v1, %v1106_v18 }
  0xf7   : > { %v1116_v37 = vmul.f32 %v1112_v19, %v4418_v53  ;;  %v1114_v38 = vmul.f32 %v1110_v33, %v4421_v54  ;;  %v1115_v39 = vmul.f32 %v1109_v32, %v4424_v55 }
  0xf9   : > { %v1120_v44 = vpop.permute.xlu1 %1119  ;;  %v1118_v45 = vpop.permute.xlu0 %1117  ;;  %v1146_v46 = vpack.c.bf16 %v1114_v38, %v1098_v17  ;;  %v1148_v47 = vpack.c.bf16 %v1116_v37, %v1100_v20  ;;  %v1147_v1 = vpack.c.bf16 %v1115_v39, %v1099_v34 }
  0xfa   : > { %v1127_v3 = vsel %vm960_vm7, %v1118_v45, %v1120_v44 }
  0xfb   : > { %1178 = vmatprep.subr.bf16.mxu0 %v1146_v46  ;;  %1219 = vmatprep.subr.bf16.mxu1 %v1148_v47  ;;  %v1129_v52 = vmul.f32 %v1127_v3, %v4437_v21 }
  0xfc   : > { %1179 = vmatpush1.bf16.msra.mxu0 %v1145_v48  ;;  %1220 = vmatpush1.bf16.msra.mxu1 %v1147_v1 }
  0xfd   : > { %v1124_v15 = vpop.permute.xlu1 %1123  ;;  %v1122_v20 = vpop.permute.xlu0 %1121  ;;  %v1149_v32 = vpack.c.bf16 %v1129_v52, %v1129_v52 }
  0xfe   : > { %v1128_v17 = vsel %vm960_vm7, %v1124_v15, %v1118_v45  ;;  %v1125_v16 = vsel %vm960_vm7, %v1122_v20, %v1124_v15  ;;  %v1126_v18 = vsel %vm960_vm7, %v1120_v44, %v1122_v20 }
  0xff   : > { %v1132_v24 = vmul.f32 %v1128_v17, %v4463_v10  ;;  %v1130_v19 = vmul.f32 %v1126_v18, %v4466_v51  ;;  %v1131_v14 = vmul.f32 %v1125_v16, %v4470_v63  ;;  %v1161_v40 = vsel %vm1159_vm8, %v1149_v32, 0 }
 0x101   : > { %v1152_v33 = vpack.c.bf16 %v1132_v24, %v1132_v24  ;;  %v1150_v34 = vpack.c.bf16 %v1130_v19, %v1130_v19  ;;  %v722_v37 = vpop.permute.xlu1 %721  ;;  %v720_v38 = vpop.permute.xlu0 %719  ;;  %v1151_v39 = vpack.c.bf16 %v1131_v14, %v1131_v14 }
 0x102   : > { %v732_v45 = vsel %vm729_vm0, %v720_v38, %v722_v37 }
 0x103   : > { %3571 = vmatprep.subr.msk.bf16.mxu0 %vm1159_vm8, %v1150_v34  ;;  %3573 = vmatprep.subr.msk.bf16.mxu1 %vm1159_vm8, %v1152_v33  ;;  %v1167_v41 = vsel %vm1159_vm8, %v1151_v39, 0  ;;  %v751_v48 = vmul.f32 %v4253_v22, %v732_v45 }
 0x104   : > { %1181 = vmatpush1.bf16.msra.mxu0 %v1161_v40  ;;  %1222 = vmatpush1.bf16.msra.mxu1 %v1167_v41 }
 0x105   : > { %v726_v43 = vpop.permute.xlu1 %725  ;;  %v724_v44 = vpop.permute.xlu0 %723 }
 0x106   : > { %v733_v1 = vsel %vm729_vm0, %v726_v43, %v720_v38  ;;  %v731_v52 = vsel %vm729_vm0, %v722_v37, %v724_v44  ;;  %v730_v20 = vsel %vm729_vm0, %v724_v44, %v726_v43 }
 0x107   : > { %3572 = vmatmul.mubr.msk.bf16.vlgmr.msra.gmra.mrb[0].mxu0 %vm1155_vm9, %v1154_v42  ;;  %3574 = vmatmul.mubr.msk.bf16.vlgmr.msra.gmra.mrb[0].mxu1 %vm1155_vm9, %v1154_v42  ;;  %v750_v17 = vmul.f32 %v4262_v25, %v733_v1  ;;  %v752_v19 = vmul.f32 %v4276_v31, %v731_v52  ;;  %v753_v34 = vmul.f32 %v4269_v29, %v730_v20 }
 0x108   : > { %1301 = vmatprep.mubr.bf16.mxu0 %v6296_v8  ;;  %1342 = vmatprep.mubr.bf16.mxu1 %v6296_v8 }
 0x109   : > { %v757_v46 = vpop.permute.xlu1 %756  ;;  %v755_v47 = vpop.permute.xlu0 %754 }
 0x10a   : > { %v765_v3 = vsel %vm762_vm1, %v755_v47, %v757_v46 }
 0x10b   : > { %v784_v15 = vmul.f32 %v4256_v23, %v765_v3 }
 0x10d   : > { %v761_v16 = vpop.permute.xlu1 %760  ;;  %v759_v18 = vpop.permute.xlu0 %758  ;;  %v4505_v24 = vpack.c.bf16 %v784_v15, %v751_v48 }
 0x10e   : > { %v766_v32 = vsel %vm762_vm1, %v761_v16, %v755_v47  ;;  %v763_v14 = vsel %vm762_vm1, %v759_v18, %v761_v16  ;;  %v764_v33 = vsel %vm762_vm1, %v757_v46, %v759_v18 }
 0x10f   : > { %6377 = vst [vmem:[#allocation16_spill] sm:$0xff] %v4505_v24  ;;  %v783_v37 = vmul.f32 %v4265_v28, %v766_v32  ;;  %v785_v38 = vmul.f32 %v4285_v35, %v764_v33  ;;  %v786_v39 = vmul.f32 %v4272_v30, %v763_v14  ;;  %1269 = vmatprep.subr.bf16.mxu0 %v4505_v24 }
 0x111   : > { %v4519_v40 = vpack.c.bf16 %v783_v37, %v750_v17  ;;  %v4521_v41 = vpack.c.bf16 %v785_v38, %v752_v19  ;;  %v790_v42 = vpop.permute.xlu1 %789  ;;  %v788_v43 = vpop.permute.xlu0 %787  ;;  %v4523_v44 = vpack.c.bf16 %v786_v39, %v753_v34 }
 0x112   : > { %v798_v47 = vsel %vm795_vm2, %v788_v43, %v790_v42 }
 0x113   : > { %6378 = vst [vmem:[#allocation17_spill] sm:$0xff] %v4519_v40  ;;  %6379 = vst [vmem:[#allocation18_spill] sm:$0xff] %v4521_v41  ;;  %1270 = vmatpush1.bf16.msra.mxu0 %v4519_v40  ;;  %1310 = vmatprep.subr.bf16.mxu1 %v4523_v44  ;;  %v817_v15 = vmul.f32 %v4315_v61, %v798_v47 }
 0x114   : > { %6380 = vst [vmem:[#allocation19_spill] sm:$0xff] %v4523_v44  ;;  %1311 = vmatpush1.bf16.msra.mxu1 %v4521_v41 }
 0x115   : > { %v794_v45 = vpop.permute.xlu1 %793  ;;  %v792_v46 = vpop.permute.xlu0 %791 }
 0x116   : > { %v799_v48 = vsel %vm795_vm2, %v794_v45, %v788_v43  ;;  %v797_v20 = vsel %vm795_vm2, %v790_v42, %v792_v46  ;;  %v796_v16 = vsel %vm795_vm2, %v792_v46, %v794_v45 }
 0x117   : > { %v816_v18 = vmul.f32 %v4323_v9, %v799_v48  ;;  %v818_v33 = vmul.f32 %v4326_v11, %v797_v20  ;;  %v819_v39 = vmul.f32 %v4329_v12, %v796_v16 }
 0x119   : > { %v823_v1 = vpop.permute.xlu1 %822  ;;  %v821_v3 = vpop.permute.xlu0 %820 }
 0x11a   : > { %v831_v52 = vsel %vm828_vm3, %v821_v3, %v823_v1 }
 0x11b   : > { %v850_v17 = vmul.f32 %v4318_v62, %v831_v52 }
 0x11d   : > { %v827_v19 = vpop.permute.xlu1 %826  ;;  %v825_v32 = vpop.permute.xlu0 %824  ;;  %v4541_v14 = vpack.c.bf16 %v850_v17, %v817_v15 }
 0x11e   : > { %v832_v34 = vsel %vm828_vm3, %v827_v19, %v821_v3  ;;  %v829_v37 = vsel %vm828_vm3, %v825_v32, %v827_v19  ;;  %v830_v38 = vsel %vm828_vm3, %v823_v1, %v825_v32 }
 0x11f   : > { %6381 = vst [vmem:[#allocation20_spill] sm:$0xff] %v4541_v14  ;;  %v849_v42 = vmul.f32 %v4336_v26, %v832_v34  ;;  %v851_v43 = vmul.f32 %v4339_v27, %v830_v38  ;;  %v852_v45 = vmul.f32 %v4346_v36, %v829_v37  ;;  %1271 = vmatprep.subr.bf16.mxu0 %v4541_v14 }
 0x121   : > { %v4555_v46 = vpack.c.bf16 %v849_v42, %v816_v18  ;;  %v4557_v47 = vpack.c.bf16 %v851_v43, %v818_v33  ;;  %v856_v3 = vpop.permute.xlu1 %855  ;;  %v854_v48 = vpop.permute.xlu0 %853  ;;  %v4559_v52 = vpack.c.bf16 %v852_v45, %v819_v39 }
 0x122   : > { %v864_v1 = vsel %vm861_vm4, %v854_v48, %v856_v3 }
 0x123   : > { %6382 = vst [vmem:[#allocation21_spill] sm:$0xff] %v4555_v46  ;;  %6383 = vst [vmem:[#allocation22_spill] sm:$0xff] %v4557_v47  ;;  %1272 = vmatpush1.bf16.msra.mxu0 %v4555_v46  ;;  %1312 = vmatprep.subr.bf16.mxu1 %v4559_v52  ;;  %v882_v17 = vmul.f32 %v4365_v56, %v864_v1 }
 0x124   : > { %6384 = vst [vmem:[#allocation23_spill] sm:$0xff] %v4559_v52  ;;  %1313 = vmatpush1.bf16.msra.mxu1 %v4557_v47 }
 0x125   : > { %v860_v15 = vpop.permute.xlu1 %859  ;;  %v858_v20 = vpop.permute.xlu0 %857  ;;  %v4586_v45 = vpack.c.bf16 %v882_v17, %v4149_v5 }
 0x126   : > { %v865_v16 = vsel %vm861_vm4, %v860_v15, %v854_v48  ;;  %v862_v18 = vsel %vm861_vm4, %v858_v20, %v860_v15  ;;  %v863_v19 = vsel %vm861_vm4, %v856_v3, %v858_v20 }
 0x127   : > { %v885_v32 = vmul.f32 %v4368_v57, %v865_v16  ;;  %v883_v33 = vmul.f32 %v4373_v59, %v863_v19  ;;  %v884_v34 = vmul.f32 %v4376_v60, %v862_v18  ;;  %6388 = vst [vmem:[#allocation27_spill] sm:$0xff] %v4586_v45 }
 0x129   : > { %v4577_v37 = vpack.c.bf16 %v884_v34, %v4159_v7  ;;  %v889_v38 = vpop.permute.xlu1 %888  ;;  %v887_v39 = vpop.permute.xlu0 %886  ;;  %v4580_v42 = vpack.c.bf16 %v883_v33, %v4146_v4  ;;  %v4583_v43 = vpack.c.bf16 %v885_v32, %v4156_v6 }
 0x12a   : > { %v897_v20 = vsel %vm894_vm6, %v887_v39, %v889_v38 }
 0x12b   : > { %6385 = vst [vmem:[#allocation24_spill] sm:$0xff] %v4577_v37  ;;  %6386 = vst [vmem:[#allocation25_spill] sm:$0xff] %v4580_v42  ;;  %1273 = vmatprep.subr.bf16.mxu0 %v4580_v42  ;;  %1314 = vmatprep.subr.bf16.mxu1 %v4583_v43 }
 0x12c   : > { %6387 = vst [vmem:[#allocation26_spill] sm:$0xff] %v4583_v43  ;;  %1274 = vmatpush1.bf16.msra.mxu0 %v4586_v45  ;;  %1315 = vmatpush1.bf16.msra.mxu1 %v4577_v37 }
 0x12d   : > { %v893_v7 = vpop.permute.xlu1 %892  ;;  %v891_v3 = vpop.permute.xlu0 %890 }
 0x12e   : > { %v898_v4 = vsel %vm894_vm6, %v893_v7, %v887_v39  ;;  %v896_v6 = vsel %vm894_vm6, %v889_v38, %v891_v3  ;;  %v895_v15 = vsel %vm894_vm6, %v891_v3, %v893_v7 }
 0x12f   : > { %v918_v17 = vmul.f32 %v4397_v2, %v898_v4  ;;  %v916_v16 = vmul.f32 %v4400_v0, %v896_v6  ;;  %v917_v3 = vmul.f32 %v4405_v49, %v895_v15  ;;  %v915_v6 = vmul.f32 %v4428_v58, %v897_v20 }
 0x131   : > { %v922_v48 = vpop.permute.xlu1 %921  ;;  %v920_v1 = vpop.permute.xlu0 %919 }
 0x132   : > { %v930_v5 = vsel %vm927_vm5, %v920_v1, %v922_v48 }
 0x133   : > { %v948_v32 = vmul.f32 %v4410_v50, %v930_v5 }
 0x135   : > { %v926_v18 = vpop.permute.xlu1 %925  ;;  %v924_v19 = vpop.permute.xlu0 %923  ;;  %v4622_v45 = vpack.c.bf16 %v948_v32, %v915_v6 }
 0x136   : > { %v931_v33 = vsel %vm927_vm5, %v926_v18, %v920_v1  ;;  %v928_v34 = vsel %vm927_vm5, %v924_v19, %v926_v18  ;;  %v929_v7 = vsel %vm927_vm5, %v922_v48, %v924_v19 }
 0x137   : > { %v951_v38 = vmul.f32 %v4418_v53, %v931_v33  ;;  %v949_v39 = vmul.f32 %v4421_v54, %v929_v7  ;;  %v950_v4 = vmul.f32 %v4424_v55, %v928_v34  ;;  %6392 = vst [vmem:[#allocation31_spill] sm:$0xff] %v4622_v45 }
 0x139   : > { %v4616_v5 = vpack.c.bf16 %v950_v4, %v917_v3  ;;  %v955_v8 = vpop.permute.xlu1 %954  ;;  %v953_v1 = vpop.permute.xlu0 %952  ;;  %v4618_v37 = vpack.c.bf16 %v949_v39, %v916_v16  ;;  %v4620_v18 = vpack.c.bf16 %v951_v38, %v918_v17 }
 0x13a   : > { %v963_v48 = vsel %vm960_vm7, %v953_v1, %v955_v8 }
 0x13b   : > { %6389 = vst [vmem:[#allocation28_spill] sm:$0xff] %v4616_v5  ;;  %6390 = vst [vmem:[#allocation29_spill] sm:$0xff] %v4618_v37  ;;  %v981_v15 = vmul.f32 %v4437_v21, %v963_v48  ;;  %1275 = vmatprep.subr.bf16.mxu0 %v4618_v37  ;;  %1316 = vmatprep.subr.bf16.mxu1 %v4620_v18  ;;  %v6398_v48 = vmov 0  }
 0x13c   : > { %6391 = vst [vmem:[#allocation30_spill] sm:$0xff] %v4620_v18  ;;  %1276 = vmatpush1.bf16.msra.mxu0 %v4622_v45  ;;  %1317 = vmatpush1.bf16.msra.mxu1 %v4616_v5 }
 0x13d   : > { %v959_v20 = vpop.permute.xlu1 %958  ;;  %v957_v16 = vpop.permute.xlu0 %956  ;;  %v1001_v33 = vpack.c.bf16 %v981_v15, %v981_v15 }
 0x13e   : > { %v964_v17 = vsel %vm960_vm7, %v959_v20, %v953_v1  ;;  %v961_v19 = vsel %vm960_vm7, %v957_v16, %v959_v20  ;;  %v962_v32 = vsel %vm960_vm7, %v955_v8, %v957_v16  ;;  %v1153_v1 = vld [vmem:[%s6397_s4] sm:$0xf]  ;;  %s6404_s4 = sld [smem:[#allocation54_spill]] }
 0x13f   : > { %v984_v34 = vmul.f32 %v4463_v10, %v964_v17  ;;  %v982_v7 = vmul.f32 %v4466_v51, %v962_v32  ;;  %v983_v3 = vmul.f32 %v4470_v63, %v961_v19  ;;  %v4649_v8 = vsel %vm1159_vm8, %v1001_v33, 0 }
 0x140   : > { %6395 = vst [vmem:[#allocation34_spill] sm:$0xff] %v4649_v8 }
 0x141   : > { %v4640_v38 = vpack.c.bf16 %v984_v34, %v984_v34  ;;  %v4642_v39 = vpack.c.bf16 %v982_v7, %v982_v7  ;;  %v1003_v4 = vpack.c.bf16 %v983_v3, %v983_v3 }
 0x143   : > { %6393 = vst [vmem:[#allocation32_spill] sm:$0xff] %v4640_v38  ;;  %6394 = vst [vmem:[#allocation33_spill] sm:$0xff] %v4642_v39  ;;  %3575 = vmatprep.subr.msk.bf16.mxu0 %vm1159_vm8, %v4642_v39  ;;  %3577 = vmatprep.subr.msk.bf16.mxu1 %vm1159_vm8, %v4640_v38  ;;  %v4652_v6 = vsel %vm1159_vm8, %v1003_v4, 0 }
 0x144   : > { %6396 = vst [vmem:[#allocation35_spill] sm:$0xff] %v4652_v6  ;;  %1278 = vmatpush1.bf16.msra.mxu0 %v4649_v8  ;;  %1319 = vmatpush1.bf16.msra.mxu1 %v4652_v6 }
 0x147   : > { %3576 = vmatmul.mubr.msk.bf16.vlgmr.msra.gmra.mrb[4].mxu0 %vm1155_vm9, %v1153_v1  ;;  %3578 = vmatmul.mubr.msk.bf16.vlgmr.msra.gmra.mrb[4].mxu1 %vm1155_vm9, %v1153_v1 }
 0x148   : > { %1567 = vmatprep.mubr.bf16.mxu0 %v6398_v48  ;;  %1608 = vmatprep.mubr.bf16.mxu1 %v6398_v48 }
 0x14e   : > { %v1355_v7 = vpop.permute.xlu0 %1354 }
 0x1da   : > { %v1206_v15 = vpop.f32.mrb[0].mxu0  ;;  %v1247_v20 = vpop.f32.mrb[0].mxu1 }
 0x1db   : > { %v1208_v16 = vpop.f32.mrb[1].mxu0  ;;  %v1249_v17 = vpop.f32.mrb[1].mxu1 }
 0x1dc   : > { %v1210_v19 = vpop.f32.mrb[2].mxu0  ;;  %v1251_v32 = vpop.f32.mrb[2].mxu1 }
 0x1dd   : > { %v1211_v33 = vpop.f32.mrb[3].mxu0  ;;  %v1252_v34 = vpop.f32.mrb[3].mxu1 }
 0x21a   : > { %v1303_v3 = vpop.f32.mrb[4].mxu0  ;;  %v1344_v4 = vpop.f32.mrb[4].mxu1 }
 0x21b   : > { %v1304_v6 = vadd.f32 %v1303_v3, %v1206_v15  ;;  %v1345_v8 = vadd.f32 %v1344_v4, %v1247_v20  ;;  %v1305_v38 = vpop.f32.mrb[5].mxu0  ;;  %v1346_v5 = vpop.f32.mrb[5].mxu1 }
 0x21c   : > { %v1306_v1 = vadd.f32 %v1305_v38, %v1208_v16  ;;  %v1347_v39 = vadd.f32 %v1346_v5, %v1249_v17  ;;  %v1307_v45 = vpop.f32.mrb[6].mxu0  ;;  %v1348_v18 = vpop.f32.mrb[6].mxu1 }
 0x21d   : > { %v1357_v37 = vadd.f32 %v1355_v7, %v1304_v6  ;;  %v1359_v43 = vadd.f32 %v1355_v7, %v1345_v8  ;;  %v1308_v47 = vpop.f32.mrb[7].mxu0  ;;  %v1349_v42 = vpop.f32.mrb[7].mxu1 }
 0x21e   : > { %v1358_v46 = vadd.f32 %v1355_v7, %v1306_v1  ;;  %v1360_v15 = vadd.f32 %v1355_v7, %v1347_v39 }
 0x21f   : > { %v4663_v19 = vmax.f32 %v1357_v37, 0.0  ;;  %v4665_v32 = vmax.f32 %v1359_v43, 0.0 }
 0x220   : > { %v4671_v38 = vmax.f32 %v1358_v46, 0.0  ;;  %v4677_v47 = vmax.f32 %v1360_v15, 0.0  ;;  %v1514_v46 = vld [vmem:[%s6404_s4] sm:$0xff]  ;;  %s6415_s4 = sld [smem:[#allocation53_spill]] }
 0x221   : > { %1369 = vrot.lane.b32.xlu0 %v4665_v32, %s3828_s20  ;;  %1365 = vrot.lane.b32.xlu1 %v4663_v19, %s3828_s20 }
 0x225   : > { %1381 = vrot.lane.b32.xlu0 %v4663_v19, %s3829_s29  ;;  %1367 = vrot.lane.b32.xlu1 %v4671_v38, %s3828_s20 }
 0x229   : > { %1385 = vrot.lane.b32.xlu0 %v4665_v32, %s3829_s29  ;;  %1371 = vrot.lane.b32.xlu1 %v4677_v47, %s3828_s20 }
 0x22d   : > { %1397 = vrot.lane.b32.xlu0 %v4663_v19, %s6399_s25  ;;  %1383 = vrot.lane.b32.xlu1 %v4671_v38, %s3829_s29 }
 0x231   : > { %1401 = vrot.lane.b32.xlu0 %v4665_v32, %s6399_s25  ;;  %1387 = vrot.lane.b32.xlu1 %v4677_v47, %s3829_s29 }
 0x235   : > { %1413 = vrot.lane.b32.xlu0 %v4663_v19, %s6400_s26  ;;  %1399 = vrot.lane.b32.xlu1 %v4671_v38, %s6399_s25 }
 0x239   : > { %1417 = vrot.lane.b32.xlu0 %v4665_v32, %s6400_s26  ;;  %1403 = vrot.lane.b32.xlu1 %v4677_v47, %s6399_s25 }
 0x23d   : > { %1429 = vrot.lane.b32.xlu0 %v4663_v19, %s6401_s3  ;;  %1415 = vrot.lane.b32.xlu1 %v4671_v38, %s6400_s26 }
 0x241   : > { %1433 = vrot.lane.b32.xlu0 %v4665_v32, %s6401_s3  ;;  %1419 = vrot.lane.b32.xlu1 %v4677_v47, %s6400_s26 }
 0x245   : > { %1445 = vrot.lane.b32.xlu0 %v4663_v19, %s6402_s24  ;;  %1431 = vrot.lane.b32.xlu1 %v4671_v38, %s6401_s3 }
 0x249   : > { %1449 = vrot.lane.b32.xlu0 %v4665_v32, %s6402_s24  ;;  %1435 = vrot.lane.b32.xlu1 %v4677_v47, %s6401_s3 }
 0x24d   : > { %1461 = vrot.lane.b32.xlu0 %v4663_v19, %s6403_s6  ;;  %1447 = vrot.lane.b32.xlu1 %v4671_v38, %s6402_s24 }
 0x251   : > { %1465 = vrot.lane.b32.xlu0 %v4665_v32, %s6403_s6  ;;  %1451 = vrot.lane.b32.xlu1 %v4677_v47, %s6402_s24 }
 0x255   : > { %1477 = vrot.lane.b32.xlu0 %v4663_v19, %s3835_s23  ;;  %1463 = vrot.lane.b32.xlu1 %v4671_v38, %s6403_s6 }
 0x259   : > { %1481 = vrot.lane.b32.xlu0 %v4665_v32, %s3835_s23  ;;  %1467 = vrot.lane.b32.xlu1 %v4677_v47, %s6403_s6 }
 0x25d   : > { %1517 = vperm.xlu0 %3693, %v1514_v46   ;;  %1479 = vrot.lane.b32.xlu1 %v4671_v38, %s3835_s23 }
 0x261   : > { %1483 = vrot.lane.b32.xlu1 %v4677_v47, %s3835_s23 }
 0x293   : > { %v1370_v37 = vpop.permute.xlu0 %1369  ;;  %v1366_v42 = vpop.permute.xlu1 %1365 }
 0x297   : > { %v1382_v43 = vpop.permute.xlu0 %1381  ;;  %v1368_v45 = vpop.permute.xlu1 %1367 }
 0x298   : > { %v1375_v39 = vsel %vm729_vm0, %v1366_v42, %v1368_v45  ;;  %v1374_v3 = vsel %vm729_vm0, %v1368_v45, %v1370_v37 }
 0x299   : > { %v1378_v16 = vmul.f32 %v1375_v39, %v4253_v22  ;;  %v1379_v45 = vmul.f32 %v1374_v3, %v4276_v31 }
 0x29b   : > { %v1386_v5 = vpop.permute.xlu0 %1385  ;;  %v1372_v18 = vpop.permute.xlu1 %1371 }
 0x29c   : > { %v1373_v34 = vsel %vm729_vm0, %v1370_v37, %v1372_v18  ;;  %v1376_v7 = vsel %vm729_vm0, %v1372_v18, %v1366_v42 }
 0x29d   : > { %v1380_v52 = vmul.f32 %v1373_v34, %v4269_v29 }
 0x29f   : > { %v1398_v8 = vpop.permute.xlu0 %1397  ;;  %v1384_v6 = vpop.permute.xlu1 %1383 }
 0x2a0   : > { %v1391_v20 = vsel %vm762_vm1, %v1382_v43, %v1384_v6  ;;  %v1390_v17 = vsel %vm762_vm1, %v1384_v6, %v1386_v5 }
 0x2a1   : > { %v1394_v33 = vmul.f32 %v1391_v20, %v4256_v23  ;;  %v1395_v46 = vmul.f32 %v1390_v17, %v4285_v35  ;;  %v1377_v20 = vmul.f32 %v1376_v7, %v4262_v25 }
 0x2a3   : > { %v1402_v4 = vpop.permute.xlu0 %1401  ;;  %v1388_v1 = vpop.permute.xlu1 %1387  ;;  %v4752_v15 = vpack.c.bf16 %v1394_v33, %v1378_v16  ;;  %v4769_v33 = vpack.c.bf16 %v1395_v46, %v1379_v45 }
 0x2a4   : > { %v1389_v39 = vsel %vm762_vm1, %v1386_v5, %v1388_v1  ;;  %v1392_v6 = vsel %vm762_vm1, %v1388_v1, %v1382_v43 }
 0x2a5   : > { %v1393_v42 = vmul.f32 %v1392_v6, %v4265_v28  ;;  %v1396_v37 = vmul.f32 %v1389_v39, %v4272_v30  ;;  %1535 = vmatprep.subr.bf16.mxu0 %v4752_v15 }
 0x2a7   : > { %v4765_v18 = vpack.c.bf16 %v1393_v42, %v1377_v20  ;;  %v1414_v16 = vpop.permute.xlu0 %1413  ;;  %v1400_v17 = vpop.permute.xlu1 %1399  ;;  %v4767_v5 = vpack.c.bf16 %v1396_v37, %v1380_v52 }
 0x2a8   : > { %v1407_v7 = vsel %vm795_vm2, %v1398_v8, %v1400_v17  ;;  %v1406_v37 = vsel %vm795_vm2, %v1400_v17, %v1402_v4 }
 0x2a9   : > { %1536 = vmatpush1.bf16.msra.mxu0 %v4765_v18  ;;  %1576 = vmatprep.subr.bf16.mxu1 %v4767_v5  ;;  %v1410_v52 = vmul.f32 %v1407_v7, %v4315_v61  ;;  %v1411_v17 = vmul.f32 %v1406_v37, %v4326_v11 }
 0x2aa   : > { %1577 = vmatpush1.bf16.msra.mxu1 %v4769_v33 }
 0x2ab   : > { %v1418_v43 = vpop.permute.xlu0 %1417  ;;  %v1404_v34 = vpop.permute.xlu1 %1403 }
 0x2ac   : > { %v1405_v20 = vsel %vm795_vm2, %v1402_v4, %v1404_v34  ;;  %v1408_v42 = vsel %vm795_vm2, %v1404_v34, %v1398_v8 }
 0x2ad   : > { %v1409_v40 = vmul.f32 %v1408_v42, %v4323_v9  ;;  %v1412_v44 = vmul.f32 %v1405_v20, %v4329_v12 }
 0x2af   : > { %v1430_v3 = vpop.permute.xlu0 %1429  ;;  %v1416_v1 = vpop.permute.xlu1 %1415 }
 0x2b0   : > { %v1423_v39 = vsel %vm828_vm3, %v1414_v16, %v1416_v1  ;;  %v1422_v46 = vsel %vm828_vm3, %v1416_v1, %v1418_v43 }
 0x2b1   : > { %v1426_v6 = vmul.f32 %v1423_v39, %v4318_v62  ;;  %v1427_v7 = vmul.f32 %v1422_v46, %v4339_v27 }
 0x2b3   : > { %v1434_v45 = vpop.permute.xlu0 %1433  ;;  %v1420_v41 = vpop.permute.xlu1 %1419  ;;  %v4788_v14 = vpack.c.bf16 %v1426_v6, %v1410_v52  ;;  %v4805_v6 = vpack.c.bf16 %v1427_v7, %v1411_v17 }
 0x2b4   : > { %v1421_v1 = vsel %vm828_vm3, %v1418_v43, %v1420_v41  ;;  %v1424_v39 = vsel %vm828_vm3, %v1420_v41, %v1414_v16 }
 0x2b5   : > { %v1425_v8 = vmul.f32 %v1424_v39, %v4336_v26  ;;  %v1428_v4 = vmul.f32 %v1421_v1, %v4346_v36  ;;  %1537 = vmatprep.subr.bf16.mxu0 %v4788_v14  ;;  %6405 = vst [vmem:[#allocation36_spill] sm:$0xff] %v4805_v6 }
 0x2b7   : > { %v4801_v34 = vpack.c.bf16 %v1425_v8, %v1409_v40  ;;  %v1446_v52 = vpop.permute.xlu0 %1445  ;;  %v1432_v46 = vpop.permute.xlu1 %1431  ;;  %v4803_v43 = vpack.c.bf16 %v1428_v4, %v1412_v44 }
 0x2b8   : > { %v1438_v41 = vsel %vm861_vm4, %v1432_v46, %v1434_v45  ;;  %v1439_v16 = vsel %vm861_vm4, %v1430_v3, %v1432_v46 }
 0x2b9   : > { %v1441_v20 = vmul.f32 %v1439_v16, %v4365_v56  ;;  %v1442_v42 = vmul.f32 %v1438_v41, %v4373_v59  ;;  %1538 = vmatpush1.bf16.msra.mxu0 %v4801_v34  ;;  %1578 = vmatprep.subr.bf16.mxu1 %v4803_v43 }
 0x2ba   : > { %1579 = vmatpush1.bf16.msra.mxu1 %v4805_v6 }
 0x2bb   : > { %v4817_v40 = vpack.c.bf16 %v1441_v20, %v4663_v19  ;;  %v1450_v44 = vpop.permute.xlu0 %1449  ;;  %v1436_v37 = vpop.permute.xlu1 %1435  ;;  %v4820_v7 = vpack.c.bf16 %v1442_v42, %v4671_v38 }
 0x2bc   : > { %v1437_v1 = vsel %vm861_vm4, %v1434_v45, %v1436_v37  ;;  %v1440_v39 = vsel %vm861_vm4, %v1436_v37, %v1430_v3 }
 0x2bd   : > { %6406 = vst [vmem:[#allocation37_spill] sm:$0xff] %v4817_v40  ;;  %v1443_v8 = vmul.f32 %v1437_v1, %v4376_v60  ;;  %v1444_v4 = vmul.f32 %v1440_v39, %v4368_v57  ;;  %1539 = vmatprep.subr.bf16.mxu0 %v4820_v7 }
 0x2be   : > { %1540 = vmatpush1.bf16.msra.mxu0 %v4817_v40 }
 0x2bf   : > { %v4831_v19 = vpack.c.bf16 %v1443_v8, %v4665_v32  ;;  %v1462_v17 = vpop.permute.xlu0 %1461  ;;  %v1448_v38 = vpop.permute.xlu1 %1447  ;;  %v4834_v46 = vpack.c.bf16 %v1444_v4, %v4677_v47 }
 0x2c0   : > { %v1454_v41 = vsel %vm894_vm6, %v1448_v38, %v1450_v44  ;;  %v1455_v16 = vsel %vm894_vm6, %v1446_v52, %v1448_v38 }
 0x2c1   : > { %6407 = vst [vmem:[#allocation38_spill] sm:$0xff] %v4831_v19  ;;  %6408 = vst [vmem:[#allocation39_spill] sm:$0xff] %v4834_v46  ;;  %1580 = vmatprep.subr.bf16.mxu1 %v4834_v46  ;;  %v1457_v42 = vmul.f32 %v1455_v16, %v4428_v58  ;;  %v1458_v37 = vmul.f32 %v1454_v41, %v4400_v0 }
 0x2c2   : > { %1581 = vmatpush1.bf16.msra.mxu1 %v4831_v19 }
 0x2c3   : > { %v1466_v3 = vpop.permute.xlu0 %1465  ;;  %v1452_v45 = vpop.permute.xlu1 %1451 }
 0x2c4   : > { %v1453_v4 = vsel %vm894_vm6, %v1450_v44, %v1452_v45  ;;  %v1456_v38 = vsel %vm894_vm6, %v1452_v45, %v1446_v52 }
 0x2c7   : > { %v1464_v20 = vpop.permute.xlu1 %1463  ;;  %v1478_v1 = vpop.permute.xlu0 %1477 }
 0x2c8   : > { %v1470_v32 = vsel %vm927_vm5, %v1464_v20, %v1466_v3  ;;  %v1471_v47 = vsel %vm927_vm5, %v1462_v17, %v1464_v20  ;;  %v1459_v20 = vmul.f32 %v1453_v4, %v4405_v49 }
 0x2c9   : > { %v1473_v39 = vmul.f32 %v1471_v47, %v4410_v50  ;;  %v1474_v8 = vmul.f32 %v1470_v32, %v4421_v54  ;;  %v1460_v32 = vmul.f32 %v1456_v38, %v4397_v2 }
 0x2cb   : > { %v4854_v24 = vpack.c.bf16 %v1473_v39, %v1457_v42  ;;  %v1468_v19 = vpop.permute.xlu1 %1467  ;;  %v4856_v40 = vpack.c.bf16 %v1474_v8, %v1458_v37  ;;  %v1482_v52 = vpop.permute.xlu0 %1481 }
 0x2cc   : > { %v1469_v16 = vsel %vm927_vm5, %v1466_v3, %v1468_v19  ;;  %v1472_v41 = vsel %vm927_vm5, %v1468_v19, %v1462_v17 }
 0x2cd   : > { %6409 = vst [vmem:[#allocation40_spill] sm:$0xff] %v4854_v24  ;;  %6410 = vst [vmem:[#allocation41_spill] sm:$0xff] %v4856_v40  ;;  %v1475_v44 = vmul.f32 %v1469_v16, %v4424_v55  ;;  %v1476_v47 = vmul.f32 %v1472_v41, %v4418_v53  ;;  %1541 = vmatprep.subr.bf16.mxu0 %v4856_v40 }
 0x2ce   : > { %1542 = vmatpush1.bf16.msra.mxu0 %v4854_v24 }
 0x2cf   : > { %v4868_v45 = vpack.c.bf16 %v1475_v44, %v1459_v20  ;;  %v1480_v42 = vpop.permute.xlu1 %1479  ;;  %v4870_v3 = vpack.c.bf16 %v1476_v47, %v1460_v32  ;;  %v1513_v47 = vld [vmem:[%s6415_s4] sm:$0xf]  ;;  %s3489_s4 = sshll.u32 %s4914_s0, 4  ;;  %s6205_s4 = int_to_ptr.vmem [resolvable:$true] %s3489_s4 }
 0x2d0   : > { %v1486_v19 = vsel %vm960_vm7, %v1480_v42, %v1482_v52  ;;  %v1487_v17 = vsel %vm960_vm7, %v1478_v1, %v1480_v42 }
 0x2d1   : > { %6411 = vst [vmem:[#allocation42_spill] sm:$0xff] %v4868_v45  ;;  %6412 = vst [vmem:[#allocation43_spill] sm:$0xff] %v4870_v3  ;;  %v1489_v37 = vmul.f32 %v1487_v17, %v4437_v21  ;;  %v1490_v39 = vmul.f32 %v1486_v19, %v4466_v51  ;;  %1582 = vmatprep.subr.bf16.mxu1 %v4870_v3 }
 0x2d2   : > { %1583 = vmatpush1.bf16.msra.mxu1 %v4868_v45 }
 0x2d3   : > { %v1509_v8 = vpack.c.bf16 %v1489_v37, %v1489_v37  ;;  %v4880_v4 = vpack.c.bf16 %v1490_v39, %v1490_v39  ;;  %v1484_v38 = vpop.permute.xlu1 %1483 }
 0x2d4   : > { %v1485_v16 = vsel %vm960_vm7, %v1482_v52, %v1484_v38  ;;  %v1488_v41 = vsel %vm960_vm7, %v1484_v38, %v1478_v1 }
 0x2d5   : > { %6413 = vst [vmem:[#allocation44_spill] sm:$0xff] %v4880_v4  ;;  %v1491_v20 = vmul.f32 %v1485_v16, %v4470_v63  ;;  %v1492_v32 = vmul.f32 %v1488_v41, %v4463_v10  ;;  %3579 = vmatprep.subr.msk.bf16.mxu0 %vm1159_vm8, %v4880_v4  ;;  %v4891_v44 = vsel %vm1159_vm8, %v1509_v8, 0 }
 0x2d6   : > { %6414 = vst [vmem:[#allocation45_spill] sm:$0xff] %v4891_v44  ;;  %1544 = vmatpush1.bf16.msra.mxu0 %v4891_v44 }
 0x2d7   : > { %v1511_v52 = vpack.c.bf16 %v1491_v20, %v1491_v20  ;;  %v4897_v42 = vpack.c.bf16 %v1492_v32, %v1492_v32 }
 0x2d9   : > { %6416 = vst [vmem:[#allocation46_spill] sm:$0xff] %v4897_v42  ;;  %3580 = vmatmul.mubr.msk.bf16.vlgmr.msra.gmra.mrb[8].mxu0 %vm1155_vm9, %v1513_v47  ;;  %3581 = vmatprep.subr.msk.bf16.mxu1 %vm1159_vm8, %v4897_v42  ;;  %v4903_v1 = vsel %vm1159_vm8, %v1511_v52, 0 }
 0x2da   : > { %6417 = vst [vmem:[#allocation47_spill] sm:$0xff] %v4903_v1  ;;  %1585 = vmatpush1.bf16.msra.mxu1 %v4903_v1  ;;  %1814 = vmatprep.mubr.bf16.mxu0 %v6398_v48 }
 0x2dc   : > { %v1518_v19 = vpop.permute.xlu0 %1517 }
 0x2dd   : > { %3582 = vmatmul.mubr.msk.bf16.vlgmr.msra.gmra.mrb[8].mxu1 %vm1155_vm9, %v1513_v47 }
 0x2de   : > { %1855 = vmatprep.mubr.bf16.mxu1 %v6398_v48 }
 0x3ac   : > { %v1569_v17 = vpop.f32.mrb[8].mxu0 }
 0x3ad   : > { %v4910_v37 = vadd.f32 %v1569_v17, %v1518_v19  ;;  %v1571_v39 = vpop.f32.mrb[9].mxu0 }
 0x3ae   : > { %v4912_v8 = vadd.f32 %v1571_v39, %v1518_v19  ;;  %v1573_v38 = vpop.f32.mrb[10].mxu0 }
 0x3af   : > { %3459 = vst [vmem:[%s4914_s0] sm:$0xff] %v4910_v37  ;;  %v1574_v16 = vpop.f32.mrb[11].mxu0  ;;  %1617 = vrot.lane.b32.xlu1 %v4910_v37, %s3828_s20 }
 0x3b0   : > { %3460 = vst [vmem:[%s4914_s0 + $0x8] sm:$0xff] %v4912_v8  ;;  %1619 = vrot.lane.b32.xlu0 %v4912_v8, %s3828_s20  ;;  %v1610_v41 = vpop.f32.mrb[8].mxu1 }
 0x3b1   : > { %v4924_v20 = vadd.f32 %v1610_v41, %v1518_v19  ;;  %v1612_v32 = vpop.f32.mrb[9].mxu1 }
 0x3b2   : > { %v4926_v47 = vadd.f32 %v1612_v32, %v1518_v19  ;;  %v1614_v52 = vpop.f32.mrb[10].mxu1  ;;  %v1949_v19 = vld [vmem:[%s6261_s9] sm:$0xff] }
 0x3b3   : > { %3461 = vst [vmem:[%s4914_s0 + $0x10] sm:$0xff] %v4924_v20  ;;  %v1615_v17 = vpop.f32.mrb[11].mxu1  ;;  %1621 = vrot.lane.b32.xlu1 %v4924_v20, %s3828_s20 }
 0x3b4   : > { %3462 = vst [vmem:[%s4914_s0 + $0x18] sm:$0xff] %v4926_v47  ;;  %1623 = vrot.lane.b32.xlu0 %v4926_v47, %s3828_s20 }
 0x3b7   : > { %1633 = vrot.lane.b32.xlu1 %v4910_v37, %s3829_s29 }
 0x3b8   : > { %1635 = vrot.lane.b32.xlu0 %v4912_v8, %s3829_s29 }
 0x3bb   : > { %1637 = vrot.lane.b32.xlu1 %v4924_v20, %s3829_s29 }
 0x3bc   : > { %1639 = vrot.lane.b32.xlu0 %v4926_v47, %s3829_s29 }
 0x3bf   : > { %1649 = vrot.lane.b32.xlu1 %v4910_v37, %s6399_s25 }
 0x3c0   : > { %1651 = vrot.lane.b32.xlu0 %v4912_v8, %s6399_s25 }
 0x3c3   : > { %1653 = vrot.lane.b32.xlu1 %v4924_v20, %s6399_s25 }
 0x3c4   : > { %1655 = vrot.lane.b32.xlu0 %v4926_v47, %s6399_s25 }
 0x3c7   : > { %1665 = vrot.lane.b32.xlu1 %v4910_v37, %s6400_s26 }
 0x3c8   : > { %1667 = vrot.lane.b32.xlu0 %v4912_v8, %s6400_s26 }
 0x3cb   : > { %1669 = vrot.lane.b32.xlu1 %v4924_v20, %s6400_s26 }
 0x3cc   : > { %1671 = vrot.lane.b32.xlu0 %v4926_v47, %s6400_s26 }
 0x3cf   : > { %1681 = vrot.lane.b32.xlu1 %v4910_v37, %s6401_s3 }
 0x3d0   : > { %1683 = vrot.lane.b32.xlu0 %v4912_v8, %s6401_s3 }
 0x3d3   : > { %1685 = vrot.lane.b32.xlu1 %v4924_v20, %s6401_s3 }
 0x3d4   : > { %1687 = vrot.lane.b32.xlu0 %v4926_v47, %s6401_s3 }
 0x3d7   : > { %1697 = vrot.lane.b32.xlu1 %v4910_v37, %s6402_s24 }
 0x3d8   : > { %1699 = vrot.lane.b32.xlu0 %v4912_v8, %s6402_s24 }
 0x3db   : > { %1701 = vrot.lane.b32.xlu1 %v4924_v20, %s6402_s24 }
 0x3dc   : > { %1703 = vrot.lane.b32.xlu0 %v4926_v47, %s6402_s24 }
 0x3df   : > { %1713 = vrot.lane.b32.xlu1 %v4910_v37, %s6403_s6 }
 0x3e0   : > { %1715 = vrot.lane.b32.xlu0 %v4912_v8, %s6403_s6 }
 0x3e3   : > { %1717 = vrot.lane.b32.xlu1 %v4924_v20, %s6403_s6 }
 0x3e4   : > { %1719 = vrot.lane.b32.xlu0 %v4926_v47, %s6403_s6 }
 0x3e7   : > { %1729 = vrot.lane.b32.xlu1 %v4910_v37, %s3835_s23 }
 0x3e8   : > { %1731 = vrot.lane.b32.xlu0 %v4912_v8, %s3835_s23 }
 0x3eb   : > { %1733 = vrot.lane.b32.xlu1 %v4924_v20, %s3835_s23 }
 0x3ec   : > { %1735 = vrot.lane.b32.xlu0 %v4926_v47, %s3835_s23 }
 0x3ef   : > { %1952 = vperm.xlu1 %3694, %v1949_v19  }
 0x421   : > { %v1618_v39 = vpop.permute.xlu1 %1617 }
 0x422   : > { %v1620_v38 = vpop.permute.xlu0 %1619 }
 0x423   : > { %v1627_v32 = vsel %vm729_vm0, %v1618_v39, %v1620_v38 }
 0x424   : > { %v1630_v44 = vmul.f32 %v1627_v32, %v4253_v22 }
 0x425   : > { %v1622_v16 = vpop.permute.xlu1 %1621 }
 0x426   : > { %v1624_v41 = vpop.permute.xlu0 %1623  ;;  %v1626_v24 = vsel %vm729_vm0, %v1620_v38, %v1622_v16 }
 0x427   : > { %v1625_v45 = vsel %vm729_vm0, %v1622_v16, %v1624_v41  ;;  %v1628_v19 = vsel %vm729_vm0, %v1624_v41, %v1618_v39  ;;  %v1631_v16 = vmul.f32 %v1626_v24, %v4276_v31 }
 0x428   : > { %v1632_v39 = vmul.f32 %v1625_v45, %v4269_v29 }
 0x429   : > { %v1634_v52 = vpop.permute.xlu1 %1633 }
 0x42a   : > { %v1636_v17 = vpop.permute.xlu0 %1635 }
 0x42b   : > { %v1643_v1 = vsel %vm762_vm1, %v1634_v52, %v1636_v17 }
 0x42c   : > { %v1646_v42 = vmul.f32 %v1643_v1, %v4256_v23  ;;  %v1629_v23 = vmul.f32 %v1628_v19, %v4262_v25 }
 0x42d   : > { %v1638_v4 = vpop.permute.xlu1 %1637 }
 0x42e   : > { %v1642_v3 = vsel %vm762_vm1, %v1636_v17, %v1638_v4  ;;  %v1640_v40 = vpop.permute.xlu0 %1639  ;;  %v1746_v46 = vpack.c.bf16 %v1646_v42, %v1630_v44 }
 0x42f   : > { %v1647_v6 = vmul.f32 %v1642_v3, %v4285_v35  ;;  %v1641_v1 = vsel %vm762_vm1, %v1638_v4, %v1640_v40  ;;  %v1644_v32 = vsel %vm762_vm1, %v1640_v40, %v1634_v52 }
 0x430   : > { %v1645_v41 = vmul.f32 %v1644_v32, %v4265_v28  ;;  %v1648_v38 = vmul.f32 %v1641_v1, %v4272_v30  ;;  %1782 = vmatprep.subr.bf16.mxu0 %v1746_v46 }
 0x431   : > { %v1650_v44 = vpop.permute.xlu1 %1649  ;;  %v1747_v35 = vpack.c.bf16 %v1647_v6, %v1631_v16 }
 0x432   : > { %v1745_v42 = vpack.c.bf16 %v1645_v41, %v1629_v23  ;;  %v1652_v3 = vpop.permute.xlu0 %1651  ;;  %v1748_v17 = vpack.c.bf16 %v1648_v38, %v1632_v39 }
 0x433   : > { %v1659_v45 = vsel %vm795_vm2, %v1650_v44, %v1652_v3 }
 0x434   : > { %1783 = vmatpush1.bf16.msra.mxu0 %v1745_v42  ;;  %1823 = vmatprep.subr.bf16.mxu1 %v1748_v17  ;;  %v1662_v24 = vmul.f32 %v1659_v45, %v4315_v61 }
 0x435   : > { %1824 = vmatpush1.bf16.msra.mxu1 %v1747_v35  ;;  %v1654_v40 = vpop.permute.xlu1 %1653 }
 0x436   : > { %v1656_v4 = vpop.permute.xlu0 %1655  ;;  %v1658_v32 = vsel %vm795_vm2, %v1652_v3, %v1654_v40 }
 0x437   : > { %v1657_v6 = vsel %vm795_vm2, %v1654_v40, %v1656_v4  ;;  %v1660_v35 = vsel %vm795_vm2, %v1656_v4, %v1650_v44  ;;  %v1663_v40 = vmul.f32 %v1658_v32, %v4326_v11 }
 0x438   : > { %v1661_v45 = vmul.f32 %v1660_v35, %v4323_v9  ;;  %v1664_v44 = vmul.f32 %v1657_v6, %v4329_v12 }
 0x439   : > { %v1666_v52 = vpop.permute.xlu1 %1665 }
 0x43a   : > { %v1668_v19 = vpop.permute.xlu0 %1667 }
 0x43b   : > { %v1675_v46 = vsel %vm828_vm3, %v1666_v52, %v1668_v19 }
 0x43c   : > { %v1678_v23 = vmul.f32 %v1675_v46, %v4318_v62 }
 0x43d   : > { %v1670_v1 = vpop.permute.xlu1 %1669 }
 0x43e   : > { %v1674_v39 = vsel %vm828_vm3, %v1668_v19, %v1670_v1  ;;  %v1672_v41 = vpop.permute.xlu0 %1671  ;;  %v1750_v38 = vpack.c.bf16 %v1678_v23, %v1662_v24 }
 0x43f   : > { %v1679_v16 = vmul.f32 %v1674_v39, %v4339_v27  ;;  %v1673_v42 = vsel %vm828_vm3, %v1670_v1, %v1672_v41  ;;  %v1676_v17 = vsel %vm828_vm3, %v1672_v41, %v1666_v52 }
 0x440   : > { %v1677_v4 = vmul.f32 %v1676_v17, %v4336_v26  ;;  %v1680_v3 = vmul.f32 %v1673_v42, %v4346_v36  ;;  %1784 = vmatprep.subr.bf16.mxu0 %v1750_v38 }
 0x441   : > { %v1682_v19 = vpop.permute.xlu1 %1681  ;;  %v1751_v39 = vpack.c.bf16 %v1679_v16, %v1663_v40 }
 0x442   : > { %v1749_v46 = vpack.c.bf16 %v1677_v4, %v1661_v45  ;;  %v1684_v24 = vpop.permute.xlu0 %1683  ;;  %v1752_v23 = vpack.c.bf16 %v1680_v3, %v1664_v44 }
 0x443   : > { %v1691_v1 = vsel %vm861_vm4, %v1682_v19, %v1684_v24 }
 0x444   : > { %1785 = vmatpush1.bf16.msra.mxu0 %v1749_v46  ;;  %1825 = vmatprep.subr.bf16.mxu1 %v1752_v23  ;;  %v1693_v6 = vmul.f32 %v1691_v1, %v4365_v56 }
 0x445   : > { %1826 = vmatpush1.bf16.msra.mxu1 %v1751_v39  ;;  %v1686_v52 = vpop.permute.xlu1 %1685 }
 0x446   : > { %v1690_v35 = vsel %vm861_vm4, %v1684_v24, %v1686_v52  ;;  %v1688_v41 = vpop.permute.xlu0 %1687  ;;  %v1753_v4 = vpack.c.bf16 %v1693_v6, %v4910_v37 }
 0x447   : > { %v1694_v32 = vmul.f32 %v1690_v35, %v4373_v59  ;;  %v1689_v38 = vsel %vm861_vm4, %v1686_v52, %v1688_v41  ;;  %v1692_v16 = vsel %vm861_vm4, %v1688_v41, %v1682_v19 }
 0x448   : > { %v1695_v42 = vmul.f32 %v1689_v38, %v4376_v60  ;;  %v1696_v17 = vmul.f32 %v1692_v16, %v4368_v57 }
 0x449   : > { %v1698_v45 = vpop.permute.xlu1 %1697  ;;  %v1754_v44 = vpack.c.bf16 %v1694_v32, %v4912_v8 }
 0x44a   : > { %v1755_v3 = vpack.c.bf16 %v1695_v42, %v4924_v20  ;;  %v1700_v40 = vpop.permute.xlu0 %1699  ;;  %v1756_v46 = vpack.c.bf16 %v1696_v17, %v4926_v47 }
 0x44b   : > { %1786 = vmatprep.subr.bf16.mxu0 %v1754_v44  ;;  %v1707_v1 = vsel %vm894_vm6, %v1698_v45, %v1700_v40 }
 0x44c   : > { %1787 = vmatpush1.bf16.msra.mxu0 %v1753_v4  ;;  %1827 = vmatprep.subr.bf16.mxu1 %v1756_v46  ;;  %v1709_v6 = vmul.f32 %v1707_v1, %v4428_v58 }
 0x44d   : > { %1828 = vmatpush1.bf16.msra.mxu1 %v1755_v3  ;;  %v1702_v24 = vpop.permute.xlu1 %1701 }
 0x44e   : > { %v1704_v19 = vpop.permute.xlu0 %1703  ;;  %v1706_v37 = vsel %vm894_vm6, %v1700_v40, %v1702_v24 }
 0x44f   : > { %v1705_v20 = vsel %vm894_vm6, %v1702_v24, %v1704_v19  ;;  %v1708_v47 = vsel %vm894_vm6, %v1704_v19, %v1698_v45  ;;  %v1710_v38 = vmul.f32 %v1706_v37, %v4400_v0 }
 0x450   : > { %v1711_v45 = vmul.f32 %v1705_v20, %v4405_v49  ;;  %v1712_v44 = vmul.f32 %v1708_v47, %v4397_v2 }
 0x451   : > { %v1714_v23 = vpop.permute.xlu1 %1713 }
 0x452   : > { %v1716_v39 = vpop.permute.xlu0 %1715 }
 0x453   : > { %v1723_v8 = vsel %vm927_vm5, %v1714_v23, %v1716_v39 }
 0x454   : > { %v1725_v35 = vmul.f32 %v1723_v8, %v4410_v50 }
 0x455   : > { %v1718_v52 = vpop.permute.xlu1 %1717 }
 0x456   : > { %v1722_v41 = vsel %vm927_vm5, %v1716_v39, %v1718_v52  ;;  %v1720_v32 = vpop.permute.xlu0 %1719  ;;  %v1757_v24 = vpack.c.bf16 %v1725_v35, %v1709_v6 }
 0x457   : > { %v1726_v16 = vmul.f32 %v1722_v41, %v4421_v54  ;;  %v1721_v42 = vsel %vm927_vm5, %v1718_v52, %v1720_v32  ;;  %v1724_v17 = vsel %vm927_vm5, %v1720_v32, %v1714_v23 }
 0x458   : > { %v1727_v4 = vmul.f32 %v1721_v42, %v4424_v55  ;;  %v1728_v3 = vmul.f32 %v1724_v17, %v4418_v53 }
 0x459   : > { %v1730_v40 = vpop.permute.xlu1 %1729  ;;  %v1758_v46 = vpack.c.bf16 %v1726_v16, %v1710_v38 }
 0x45a   : > { %v1759_v19 = vpack.c.bf16 %v1727_v4, %v1711_v45  ;;  %v1732_v39 = vpop.permute.xlu0 %1731  ;;  %v1760_v1 = vpack.c.bf16 %v1728_v3, %v1712_v44  ;;  %v1766_v4 = vld [vmem:[%s6418_s8] sm:$0xf]  ;;  %v6422_v3 = vld [vmem:[#allocation41_spill] sm:$0xff] }
 0x45b   : > { %v1739_v8 = vsel %vm960_vm7, %v1730_v40, %v1732_v39  ;;  %1788 = vmatprep.subr.bf16.mxu0 %v1758_v46  ;;  %v6429_v46 = vld [vmem:[#allocation45_spill] sm:$0xff] }
 0x45c   : > { %v1741_v23 = vmul.f32 %v1739_v8, %v4437_v21  ;;  %1789 = vmatpush1.bf16.msra.mxu0 %v1757_v24  ;;  %1829 = vmatprep.subr.bf16.mxu1 %v1760_v1  ;;  %v1765_v24 = vld [vmem:[%s6430_s7] sm:$0xf]  ;;  %s3837_s7 = smov [#allocation5]  }
 0x45d   : > { %1830 = vmatpush1.bf16.msra.mxu1 %v1759_v19  ;;  %v1734_v37 = vpop.permute.xlu1 %1733  ;;  %v6431_v19 = vld [vmem:[#allocation47_spill] sm:$0xff]  ;;  %s3761_s5 = sshll.u32 %s3837_s7, 4  ;;  %s3762_s5 = int_to_ptr.vmem [resolvable:$false] %s3761_s5 }
 0x45e   : > { %v1738_v20 = vsel %vm960_vm7, %v1732_v39, %v1734_v37  ;;  %v1736_v47 = vpop.permute.xlu0 %1735  ;;  %v1761_v52 = vpack.c.bf16 %v1741_v23, %v1741_v23  ;;  %p3764_p8 = scmp.lt.s32.totalorder %s6205_s4, %s3762_s5 }
 0x45f   : > { %v1742_v6 = vmul.f32 %v1738_v20, %v4466_v51  ;;  %v1737_v35 = vsel %vm960_vm7, %v1734_v37, %v1736_v47  ;;  %v1740_v41 = vsel %vm960_vm7, %v1736_v47, %v1730_v40  ;;  %v6426_v40 = vld [vmem:[#allocation44_spill] sm:$0xff] }
 0x460   : > { %v1743_v32 = vmul.f32 %v1737_v35, %v4470_v63  ;;  %v1744_v38 = vmul.f32 %v1740_v41, %v4463_v10  ;;  %v1771_v45 = vsel %vm1159_vm8, %v1761_v52, 0 }
 0x461   : > { %v1762_v16 = vpack.c.bf16 %v1742_v6, %v1742_v6 }
 0x462   : > { %v1763_v42 = vpack.c.bf16 %v1743_v32, %v1743_v32  ;;  %v1764_v17 = vpack.c.bf16 %v1744_v38, %v1744_v38 }
 0x463   : > { %3583 = vmatprep.subr.msk.bf16.mxu0 %vm1159_vm8, %v1762_v16 }
 0x464   : > { %1791 = vmatpush1.bf16.msra.mxu0 %v1771_v45  ;;  %3585 = vmatprep.subr.msk.bf16.mxu1 %vm1159_vm8, %v1764_v17  ;;  %v1777_v44 = vsel %vm1159_vm8, %v1763_v42, 0 }
 0x465   : > { %1832 = vmatpush1.bf16.msra.mxu1 %v1777_v44  ;;  %1867 = vmatprep.subr.bf16.mxu0 %v4752_v15  ;;  %v6419_v15 = vld [vmem:[#allocation36_spill] sm:$0xff] }
 0x466   : > { %1908 = vmatprep.subr.bf16.mxu1 %v4767_v5  ;;  %v6420_v5 = vld [vmem:[#allocation39_spill] sm:$0xff] }
 0x467   : > { %3584 = vmatmul.mubr.msk.bf16.vlgmr.msra.gmra.mrb[12].mxu0 %vm1155_vm9, %v1766_v4 }
 0x468   : > { %1868 = vmatpush1.bf16.msra.mxu0 %v4765_v18  ;;  %3586 = vmatmul.mubr.msk.bf16.vlgmr.msra.gmra.mrb[12].mxu1 %vm1155_vm9, %v1766_v4  ;;  %v6421_v18 = vld [vmem:[#allocation37_spill] sm:$0xff] }
 0x469   : > { %1869 = vmatprep.subr.bf16.mxu0 %v4788_v14  ;;  %1909 = vmatpush1.bf16.msra.mxu1 %v4769_v33  ;;  %v6423_v14 = vld [vmem:[#allocation38_spill] sm:$0xff]  ;;  %v6424_v33 = vld [vmem:[#allocation43_spill] sm:$0xff] }
 0x46a   : > { %1910 = vmatprep.subr.bf16.mxu1 %v4803_v43  ;;  %1899 = vmatprep.mubr.bf16.mxu0 %v6398_v48  ;;  %v6425_v43 = vld [vmem:[#allocation40_spill] sm:$0xff] }
 0x46b   : > { %1940 = vmatprep.mubr.bf16.mxu1 %v6398_v48 }
 0x46c   : > { %1870 = vmatpush1.bf16.msra.mxu0 %v4801_v34  ;;  %v6427_v34 = vld [vmem:[#allocation42_spill] sm:$0xff] }
 0x46d   : > { %1871 = vmatprep.subr.bf16.mxu0 %v4820_v7  ;;  %1911 = vmatpush1.bf16.msra.mxu1 %v6419_v15  ;;  %v6428_v7 = vld [vmem:[#allocation46_spill] sm:$0xff] }
 0x46e   : > { %1912 = vmatprep.subr.bf16.mxu1 %v6420_v5  ;;  %v1953_v35 = vpop.permute.xlu1 %1952 }
 0x470   : > { %1872 = vmatpush1.bf16.msra.mxu0 %v6421_v18 }
 0x471   : > { %1873 = vmatprep.subr.bf16.mxu0 %v6422_v3  ;;  %1913 = vmatpush1.bf16.msra.mxu1 %v6423_v14 }
 0x472   : > { %1914 = vmatprep.subr.bf16.mxu1 %v6424_v33 }
 0x474   : > { %1874 = vmatpush1.bf16.msra.mxu0 %v6425_v43 }
 0x475   : > { %3587 = vmatprep.subr.msk.bf16.mxu0 %vm1159_vm8, %v6426_v40  ;;  %1915 = vmatpush1.bf16.msra.mxu1 %v6427_v34 }
 0x476   : > { %3589 = vmatprep.subr.msk.bf16.mxu1 %vm1159_vm8, %v6428_v7 }
 0x478   : > { %1876 = vmatpush1.bf16.msra.mxu0 %v6429_v46  ;;  %v2112_v46 = vld [vmem:[%s6263_s11] sm:$0xff] }
 0x479   : > { %1917 = vmatpush1.bf16.msra.mxu1 %v6431_v19 }
 0x47b   : > { %3588 = vmatmul.mubr.msk.bf16.vlgmr.msra.gmra.mrb[16].mxu0 %vm1155_vm9, %v1765_v24 }
 0x47c   : > { %3590 = vmatmul.mubr.msk.bf16.vlgmr.msra.gmra.mrb[16].mxu1 %vm1155_vm9, %v1765_v24  ;;  %2165 = vmatprep.mubr.bf16.mxu0 %v6398_v48 }
 0x47d   : > { %2206 = vmatprep.mubr.bf16.mxu1 %v6398_v48 }
 0x53a   : > { %v1816_v39 = vpop.f32.mrb[12].mxu0 }
 0x53b   : > { %v1818_v1 = vpop.f32.mrb[13].mxu0  ;;  %v1857_v8 = vpop.f32.mrb[12].mxu1 }
 0x53c   : > { %v1820_v23 = vpop.f32.mrb[14].mxu0  ;;  %v1859_v37 = vpop.f32.mrb[13].mxu1 }
 0x53d   : > { %v1821_v20 = vpop.f32.mrb[15].mxu0  ;;  %v1861_v47 = vpop.f32.mrb[14].mxu1 }
 0x53e   : > { %v1862_v52 = vpop.f32.mrb[15].mxu1 }
 0x53f   : > { %v6432_v52 = vld [vmem:[#allocation14_spill] sm:$0xff] }
 0x54e   : > { %v1901_v6 = vpop.f32.mrb[16].mxu0 }
 0x54f   : > { %v1902_v41 = vadd.f32 %v1901_v6, %v1816_v39  ;;  %v1903_v32 = vpop.f32.mrb[17].mxu0  ;;  %v1942_v38 = vpop.f32.mrb[16].mxu1 }
 0x550   : > { %v1904_v16 = vadd.f32 %v1903_v32, %v1818_v1  ;;  %v1943_v42 = vadd.f32 %v1942_v38, %v1857_v8  ;;  %v1905_v17 = vpop.f32.mrb[18].mxu0  ;;  %v1944_v45 = vpop.f32.mrb[17].mxu1 }
 0x551   : > { %v1945_v44 = vadd.f32 %v1944_v45, %v1859_v37  ;;  %v1955_v4 = vadd.f32 %v1953_v35, %v1902_v41  ;;  %v1906_v15 = vpop.f32.mrb[19].mxu0  ;;  %v1946_v5 = vpop.f32.mrb[18].mxu1  ;;  %v6433_v45 = vld [vmem:[#allocation15_spill] sm:$0xff] }
 0x552   : > { %v1956_v18 = vadd.f32 %v1953_v35, %v1904_v16  ;;  %v1947_v3 = vpop.f32.mrb[19].mxu1  ;;  %v1957_v14 = vadd.f32 %v1953_v35, %v1943_v42 }
 0x553   : > { %v5135_v33 = vmax.f32 %v1955_v4, 0.0  ;;  %v1958_v43 = vadd.f32 %v1953_v35, %v1945_v44 }
 0x554   : > { %v5137_v40 = vmax.f32 %v1956_v18, 0.0  ;;  %v5143_v34 = vmax.f32 %v1957_v14, 0.0 }
 0x555   : > { %1963 = vrot.lane.b32.xlu0 %v5135_v33, %s3828_s20  ;;  %v5145_v7 = vmax.f32 %v1958_v43, 0.0 }
 0x556   : > { %1965 = vrot.lane.b32.xlu1 %v5137_v40, %s3828_s20 }
 0x559   : > { %1967 = vrot.lane.b32.xlu0 %v5143_v34, %s3828_s20 }
 0x55a   : > { %1969 = vrot.lane.b32.xlu1 %v5145_v7, %s3828_s20 }
 0x55d   : > { %1979 = vrot.lane.b32.xlu0 %v5135_v33, %s3829_s29 }
 0x55e   : > { %1981 = vrot.lane.b32.xlu1 %v5137_v40, %s3829_s29 }
 0x561   : > { %1983 = vrot.lane.b32.xlu0 %v5143_v34, %s3829_s29 }
 0x562   : > { %1985 = vrot.lane.b32.xlu1 %v5145_v7, %s3829_s29 }
 0x565   : > { %1995 = vrot.lane.b32.xlu0 %v5135_v33, %s6399_s25 }
 0x566   : > { %1997 = vrot.lane.b32.xlu1 %v5137_v40, %s6399_s25 }
 0x569   : > { %1999 = vrot.lane.b32.xlu0 %v5143_v34, %s6399_s25 }
 0x56a   : > { %2001 = vrot.lane.b32.xlu1 %v5145_v7, %s6399_s25 }
 0x56d   : > { %2011 = vrot.lane.b32.xlu0 %v5135_v33, %s6400_s26 }
 0x56e   : > { %2013 = vrot.lane.b32.xlu1 %v5137_v40, %s6400_s26 }
 0x571   : > { %2015 = vrot.lane.b32.xlu0 %v5143_v34, %s6400_s26 }
 0x572   : > { %2017 = vrot.lane.b32.xlu1 %v5145_v7, %s6400_s26 }
 0x575   : > { %2027 = vrot.lane.b32.xlu0 %v5135_v33, %s6401_s3 }
 0x576   : > { %2029 = vrot.lane.b32.xlu1 %v5137_v40, %s6401_s3 }
 0x579   : > { %2031 = vrot.lane.b32.xlu0 %v5143_v34, %s6401_s3 }
 0x57a   : > { %2033 = vrot.lane.b32.xlu1 %v5145_v7, %s6401_s3 }
 0x57d   : > { %2043 = vrot.lane.b32.xlu0 %v5135_v33, %s6402_s24 }
 0x57e   : > { %2045 = vrot.lane.b32.xlu1 %v5137_v40, %s6402_s24 }
 0x581   : > { %2047 = vrot.lane.b32.xlu0 %v5143_v34, %s6402_s24 }
 0x582   : > { %2049 = vrot.lane.b32.xlu1 %v5145_v7, %s6402_s24 }
 0x585   : > { %2059 = vrot.lane.b32.xlu0 %v5135_v33, %s6403_s6 }
 0x586   : > { %2061 = vrot.lane.b32.xlu1 %v5137_v40, %s6403_s6 }
 0x589   : > { %2063 = vrot.lane.b32.xlu0 %v5143_v34, %s6403_s6 }
 0x58a   : > { %2065 = vrot.lane.b32.xlu1 %v5145_v7, %s6403_s6 }
 0x58d   : > { %2075 = vrot.lane.b32.xlu0 %v5135_v33, %s3835_s23 }
 0x58e   : > { %2077 = vrot.lane.b32.xlu1 %v5137_v40, %s3835_s23 }
 0x591   : > { %2079 = vrot.lane.b32.xlu0 %v5143_v34, %s3835_s23 }
 0x592   : > { %2081 = vrot.lane.b32.xlu1 %v5145_v7, %s3835_s23 }
 0x595   : > { %2115 = vperm.xlu0 %3693, %v2112_v46  }
 0x5c7   : > { %v1964_v24 = vpop.permute.xlu0 %1963 }
 0x5c8   : > { %v1966_v19 = vpop.permute.xlu1 %1965 }
 0x5c9   : > { %v1973_v8 = vsel %vm729_vm0, %v1964_v24, %v1966_v19 }
 0x5ca   : > { %v1976_v47 = vmul.f32 %v1973_v8, %v4253_v22 }
 0x5cb   : > { %v1968_v39 = vpop.permute.xlu0 %1967 }
 0x5cc   : > { %v1970_v1 = vpop.permute.xlu1 %1969  ;;  %v1972_v38 = vsel %vm729_vm0, %v1966_v19, %v1968_v39 }
 0x5cd   : > { %v1971_v35 = vsel %vm729_vm0, %v1968_v39, %v1970_v1  ;;  %v1974_v41 = vsel %vm729_vm0, %v1970_v1, %v1964_v24  ;;  %v1977_v43 = vmul.f32 %v1972_v38, %v4276_v31 }
 0x5ce   : > { %v1975_v5 = vmul.f32 %v1974_v41, %v4262_v25  ;;  %v1978_v18 = vmul.f32 %v1971_v35, %v4269_v29 }
 0x5cf   : > { %v1980_v23 = vpop.permute.xlu0 %1979 }
 0x5d0   : > { %v1982_v37 = vpop.permute.xlu1 %1981 }
 0x5d1   : > { %v1989_v20 = vsel %vm762_vm1, %v1980_v23, %v1982_v37 }
 0x5d2   : > { %v1992_v6 = vmul.f32 %v1989_v20, %v6432_v52 }
 0x5d3   : > { %v1984_v32 = vpop.permute.xlu0 %1983 }
 0x5d4   : > { %v1988_v16 = vsel %vm762_vm1, %v1982_v37, %v1984_v32  ;;  %v1986_v42 = vpop.permute.xlu1 %1985  ;;  %v2092_v17 = vpack.c.bf16 %v1992_v6, %v1976_v47 }
 0x5d5   : > { %v1993_v44 = vmul.f32 %v1988_v16, %v6433_v45  ;;  %v1987_v4 = vsel %vm762_vm1, %v1984_v32, %v1986_v42  ;;  %v1990_v15 = vsel %vm762_vm1, %v1986_v42, %v1980_v23 }
 0x5d6   : > { %v1991_v3 = vmul.f32 %v1990_v15, %v4265_v28  ;;  %v1994_v14 = vmul.f32 %v1987_v4, %v4272_v30  ;;  %2133 = vmatprep.subr.bf16.mxu0 %v2092_v17 }
 0x5d7   : > { %v1996_v46 = vpop.permute.xlu0 %1995  ;;  %v2093_v1 = vpack.c.bf16 %v1993_v44, %v1977_v43 }
 0x5d8   : > { %v2091_v24 = vpack.c.bf16 %v1991_v3, %v1975_v5  ;;  %v1998_v19 = vpop.permute.xlu1 %1997  ;;  %v2094_v39 = vpack.c.bf16 %v1994_v14, %v1978_v18 }
 0x5d9   : > { %v2005_v37 = vsel %vm795_vm2, %v1996_v46, %v1998_v19 }
 0x5da   : > { %2134 = vmatpush1.bf16.msra.mxu0 %v2091_v24  ;;  %2174 = vmatprep.subr.bf16.mxu1 %v2094_v39  ;;  %v2008_v35 = vmul.f32 %v2005_v37, %v4315_v61 }
 0x5db   : > { %2175 = vmatpush1.bf16.msra.mxu1 %v2093_v1  ;;  %v2000_v8 = vpop.permute.xlu0 %1999 }
 0x5dc   : > { %v2002_v23 = vpop.permute.xlu1 %2001  ;;  %v2004_v42 = vsel %vm795_vm2, %v1998_v19, %v2000_v8 }
 0x5dd   : > { %v2003_v32 = vsel %vm795_vm2, %v2000_v8, %v2002_v23  ;;  %v2006_v38 = vsel %vm795_vm2, %v2002_v23, %v1996_v46  ;;  %v2009_v24 = vmul.f32 %v2004_v42, %v4326_v11 }
 0x5de   : > { %v2007_v3 = vmul.f32 %v2006_v38, %v4323_v9  ;;  %v2010_v14 = vmul.f32 %v2003_v32, %v4329_v12 }
 0x5df   : > { %v2012_v20 = vpop.permute.xlu0 %2011 }
 0x5e0   : > { %v2014_v47 = vpop.permute.xlu1 %2013 }
 0x5e1   : > { %v2021_v6 = vsel %vm828_vm3, %v2012_v20, %v2014_v47 }
 0x5e2   : > { %v2024_v41 = vmul.f32 %v2021_v6, %v4318_v62 }
 0x5e3   : > { %v2016_v16 = vpop.permute.xlu0 %2015 }
 0x5e4   : > { %v2020_v17 = vsel %vm828_vm3, %v2014_v47, %v2016_v16  ;;  %v2018_v44 = vpop.permute.xlu1 %2017  ;;  %v2096_v4 = vpack.c.bf16 %v2024_v41, %v2008_v35 }
 0x5e5   : > { %v2025_v15 = vmul.f32 %v2020_v17, %v4339_v27  ;;  %v2019_v5 = vsel %vm828_vm3, %v2016_v16, %v2018_v44  ;;  %v2022_v18 = vsel %vm828_vm3, %v2018_v44, %v2012_v20 }
 0x5e6   : > { %v2023_v43 = vmul.f32 %v2022_v18, %v4336_v26  ;;  %v2026_v46 = vmul.f32 %v2019_v5, %v4346_v36  ;;  %2135 = vmatprep.subr.bf16.mxu0 %v2096_v4 }
 0x5e7   : > { %v2028_v19 = vpop.permute.xlu0 %2027  ;;  %v2097_v23 = vpack.c.bf16 %v2025_v15, %v2009_v24 }
 0x5e8   : > { %v2095_v39 = vpack.c.bf16 %v2023_v43, %v2007_v3  ;;  %v2030_v1 = vpop.permute.xlu1 %2029  ;;  %v2098_v8 = vpack.c.bf16 %v2026_v46, %v2010_v14 }
 0x5e9   : > { %v2037_v37 = vsel %vm861_vm4, %v2028_v19, %v2030_v1 }
 0x5ea   : > { %2136 = vmatpush1.bf16.msra.mxu0 %v2095_v39  ;;  %2176 = vmatprep.subr.bf16.mxu1 %v2098_v8  ;;  %v2039_v47 = vmul.f32 %v2037_v37, %v4365_v56 }
 0x5eb   : > { %2177 = vmatpush1.bf16.msra.mxu1 %v2097_v23  ;;  %v2032_v20 = vpop.permute.xlu0 %2031 }
 0x5ec   : > { %v2036_v6 = vsel %vm861_vm4, %v2030_v1, %v2032_v20  ;;  %v2034_v35 = vpop.permute.xlu1 %2033  ;;  %v2099_v4 = vpack.c.bf16 %v2039_v47, %v5135_v33 }
 0x5ed   : > { %v2040_v41 = vmul.f32 %v2036_v6, %v4373_v59  ;;  %v2035_v32 = vsel %vm861_vm4, %v2032_v20, %v2034_v35  ;;  %v2038_v38 = vsel %vm861_vm4, %v2034_v35, %v2028_v19 }
 0x5ee   : > { %v2041_v16 = vmul.f32 %v2035_v32, %v4376_v60  ;;  %v2042_v42 = vmul.f32 %v2038_v38, %v4368_v57 }
 0x5ef   : > { %v2044_v17 = vpop.permute.xlu0 %2043  ;;  %v2100_v44 = vpack.c.bf16 %v2040_v41, %v5137_v40 }
 0x5f0   : > { %v2101_v15 = vpack.c.bf16 %v2041_v16, %v5143_v34  ;;  %v2046_v5 = vpop.permute.xlu1 %2045  ;;  %v2102_v18 = vpack.c.bf16 %v2042_v42, %v5145_v7 }
 0x5f1   : > { %2137 = vmatprep.subr.bf16.mxu0 %v2100_v44  ;;  %v2053_v24 = vsel %vm894_vm6, %v2044_v17, %v2046_v5 }
 0x5f2   : > { %2138 = vmatpush1.bf16.msra.mxu0 %v2099_v4  ;;  %2178 = vmatprep.subr.bf16.mxu1 %v2102_v18  ;;  %v2055_v39 = vmul.f32 %v2053_v24, %v4428_v58 }
 0x5f3   : > { %2179 = vmatpush1.bf16.msra.mxu1 %v2101_v15  ;;  %v2048_v3 = vpop.permute.xlu0 %2047 }
 0x5f4   : > { %v2050_v14 = vpop.permute.xlu1 %2049  ;;  %v2052_v33 = vsel %vm894_vm6, %v2046_v5, %v2048_v3 }
 0x5f5   : > { %v2051_v34 = vsel %vm894_vm6, %v2048_v3, %v2050_v14  ;;  %v2054_v7 = vsel %vm894_vm6, %v2050_v14, %v2044_v17  ;;  %v2056_v37 = vmul.f32 %v2052_v33, %v4400_v0 }
 0x5f6   : > { %v2057_v35 = vmul.f32 %v2051_v34, %v4405_v49  ;;  %v2058_v41 = vmul.f32 %v2054_v7, %v4397_v2 }
 0x5f7   : > { %v2060_v43 = vpop.permute.xlu0 %2059 }
 0x5f8   : > { %v2062_v46 = vpop.permute.xlu1 %2061 }
 0x5f9   : > { %v2069_v40 = vsel %vm927_vm5, %v2060_v43, %v2062_v46 }
 0x5fa   : > { %v2071_v1 = vmul.f32 %v2069_v40, %v4410_v50 }
 0x5fb   : > { %v2064_v19 = vpop.permute.xlu0 %2063 }
 0x5fc   : > { %v2068_v8 = vsel %vm927_vm5, %v2062_v46, %v2064_v19  ;;  %v2066_v23 = vpop.permute.xlu1 %2065  ;;  %v2103_v17 = vpack.c.bf16 %v2071_v1, %v2055_v39 }
 0x5fd   : > { %v2072_v20 = vmul.f32 %v2068_v8, %v4421_v54  ;;  %v2067_v47 = vsel %vm927_vm5, %v2064_v19, %v2066_v23  ;;  %v2070_v6 = vsel %vm927_vm5, %v2066_v23, %v2060_v43 }
 0x5fe   : > { %v2073_v32 = vmul.f32 %v2067_v47, %v4424_v55  ;;  %v2074_v38 = vmul.f32 %v2070_v6, %v4418_v53 }
 0x5ff   : > { %v2076_v16 = vpop.permute.xlu0 %2075  ;;  %v2104_v42 = vpack.c.bf16 %v2072_v20, %v2056_v37  ;;  %v2111_v37 = vld [vmem:[%s6262_s10] sm:$0xf] }
 0x600   : > { %v2105_v44 = vpack.c.bf16 %v2073_v32, %v2057_v35  ;;  %v2078_v4 = vpop.permute.xlu1 %2077  ;;  %v2106_v15 = vpack.c.bf16 %v2074_v38, %v2058_v41 }
 0x601   : > { %v2085_v5 = vsel %vm960_vm7, %v2076_v16, %v2078_v4  ;;  %2139 = vmatprep.subr.bf16.mxu0 %v2104_v42 }
 0x602   : > { %v2087_v18 = vmul.f32 %v2085_v5, %v4437_v21  ;;  %2140 = vmatpush1.bf16.msra.mxu0 %v2103_v17  ;;  %2180 = vmatprep.subr.bf16.mxu1 %v2106_v15  ;;  %v2547_v5 = vld [vmem:[%s6266_s14] sm:$0xff] }
 0x603   : > { %2181 = vmatpush1.bf16.msra.mxu1 %v2105_v44  ;;  %v2080_v3 = vpop.permute.xlu0 %2079 }
 0x604   : > { %v2084_v14 = vsel %vm960_vm7, %v2078_v4, %v2080_v3  ;;  %v2082_v43 = vpop.permute.xlu1 %2081  ;;  %v2107_v46 = vpack.c.bf16 %v2087_v18, %v2087_v18 }
 0x605   : > { %v2088_v24 = vmul.f32 %v2084_v14, %v4466_v51  ;;  %v2083_v40 = vsel %vm960_vm7, %v2080_v3, %v2082_v43  ;;  %v2086_v33 = vsel %vm960_vm7, %v2082_v43, %v2076_v16 }
 0x606   : > { %v2089_v34 = vmul.f32 %v2083_v40, %v4470_v63  ;;  %v2090_v7 = vmul.f32 %v2086_v33, %v4463_v10  ;;  %v2122_v8 = vsel %vm1159_vm8, %v2107_v46, 0 }
 0x607   : > { %v2108_v19 = vpack.c.bf16 %v2088_v24, %v2088_v24 }
 0x608   : > { %v2109_v39 = vpack.c.bf16 %v2089_v34, %v2089_v34  ;;  %v2110_v1 = vpack.c.bf16 %v2090_v7, %v2090_v7 }
 0x609   : > { %3591 = vmatprep.subr.msk.bf16.mxu0 %vm1159_vm8, %v2108_v19 }
 0x60a   : > { %2142 = vmatpush1.bf16.msra.mxu0 %v2122_v8  ;;  %3593 = vmatprep.subr.msk.bf16.mxu1 %vm1159_vm8, %v2110_v1  ;;  %v2128_v23 = vsel %vm1159_vm8, %v2109_v39, 0 }
 0x60b   : > { %2183 = vmatpush1.bf16.msra.mxu1 %v2128_v23 }
 0x60d   : > { %3592 = vmatmul.mubr.msk.bf16.vlgmr.msra.gmra.mrb[20].mxu0 %vm1155_vm9, %v2111_v37 }
 0x60e   : > { %3594 = vmatmul.mubr.msk.bf16.vlgmr.msra.gmra.mrb[20].mxu1 %vm1155_vm9, %v2111_v37  ;;  %2412 = vmatprep.mubr.bf16.mxu0 %v6398_v48 }
 0x60f   : > { %2453 = vmatprep.mubr.bf16.mxu1 %v6398_v48 }
 0x614   : > { %v2116_v20 = vpop.permute.xlu0 %2115 }
 0x6e0   : > { %v2167_v47 = vpop.f32.mrb[20].mxu0 }
 0x6e1   : > { %v5321_v6 = vadd.f32 %v2167_v47, %v2116_v20  ;;  %v2169_v35 = vpop.f32.mrb[21].mxu0  ;;  %v2208_v41 = vpop.f32.mrb[20].mxu1 }
 0x6e2   : > { %v5323_v32 = vadd.f32 %v2169_v35, %v2116_v20  ;;  %v5325_v38 = vadd.f32 %v2208_v41, %v2116_v20  ;;  %v2171_v16 = vpop.f32.mrb[22].mxu0  ;;  %v2210_v42 = vpop.f32.mrb[21].mxu1 }
 0x6e3   : > { %3463 = vst [vmem:[%s4914_s0 + $0x20] sm:$0xff] %v5321_v6  ;;  %v5329_v17 = vadd.f32 %v2210_v42, %v2116_v20  ;;  %v2172_v44 = vpop.f32.mrb[23].mxu0  ;;  %v2212_v4 = vpop.f32.mrb[22].mxu1  ;;  %2215 = vrot.lane.b32.xlu1 %v5321_v6, %s3828_s20 }
 0x6e4   : > { %3464 = vst [vmem:[%s4914_s0 + $0x28] sm:$0xff] %v5323_v32  ;;  %3465 = vst [vmem:[%s4914_s0 + $0x30] sm:$0xff] %v5325_v38  ;;  %v2213_v15 = vpop.f32.mrb[23].mxu1  ;;  %2217 = vrot.lane.b32.xlu0 %v5323_v32, %s3828_s20 }
 0x6e5   : > { %3466 = vst [vmem:[%s4914_s0 + $0x38] sm:$0xff] %v5329_v17 }
 0x6e7   : > { %2219 = vrot.lane.b32.xlu1 %v5325_v38, %s3828_s20 }
 0x6e8   : > { %2221 = vrot.lane.b32.xlu0 %v5329_v17, %s3828_s20 }
 0x6eb   : > { %2231 = vrot.lane.b32.xlu1 %v5321_v6, %s3829_s29 }
 0x6ec   : > { %2233 = vrot.lane.b32.xlu0 %v5323_v32, %s3829_s29 }
 0x6ef   : > { %2235 = vrot.lane.b32.xlu1 %v5325_v38, %s3829_s29 }
 0x6f0   : > { %2237 = vrot.lane.b32.xlu0 %v5329_v17, %s3829_s29 }
 0x6f3   : > { %2247 = vrot.lane.b32.xlu1 %v5321_v6, %s6399_s25 }
 0x6f4   : > { %2249 = vrot.lane.b32.xlu0 %v5323_v32, %s6399_s25 }
 0x6f7   : > { %2251 = vrot.lane.b32.xlu1 %v5325_v38, %s6399_s25 }
 0x6f8   : > { %2253 = vrot.lane.b32.xlu0 %v5329_v17, %s6399_s25 }
 0x6fb   : > { %2263 = vrot.lane.b32.xlu1 %v5321_v6, %s6400_s26 }
 0x6fc   : > { %2265 = vrot.lane.b32.xlu0 %v5323_v32, %s6400_s26 }
 0x6ff   : > { %2267 = vrot.lane.b32.xlu1 %v5325_v38, %s6400_s26 }
 0x700   : > { %2269 = vrot.lane.b32.xlu0 %v5329_v17, %s6400_s26 }
 0x703   : > { %2279 = vrot.lane.b32.xlu1 %v5321_v6, %s6401_s3 }
 0x704   : > { %2281 = vrot.lane.b32.xlu0 %v5323_v32, %s6401_s3 }
 0x707   : > { %2283 = vrot.lane.b32.xlu1 %v5325_v38, %s6401_s3 }
 0x708   : > { %2285 = vrot.lane.b32.xlu0 %v5329_v17, %s6401_s3 }
 0x70b   : > { %2295 = vrot.lane.b32.xlu1 %v5321_v6, %s6402_s24 }
 0x70c   : > { %2297 = vrot.lane.b32.xlu0 %v5323_v32, %s6402_s24 }
 0x70f   : > { %2299 = vrot.lane.b32.xlu1 %v5325_v38, %s6402_s24 }
 0x710   : > { %2301 = vrot.lane.b32.xlu0 %v5329_v17, %s6402_s24 }
 0x713   : > { %2311 = vrot.lane.b32.xlu1 %v5321_v6, %s6403_s6 }
 0x714   : > { %2313 = vrot.lane.b32.xlu0 %v5323_v32, %s6403_s6 }
 0x717   : > { %2315 = vrot.lane.b32.xlu1 %v5325_v38, %s6403_s6 }
 0x718   : > { %2317 = vrot.lane.b32.xlu0 %v5329_v17, %s6403_s6 }
 0x71b   : > { %2327 = vrot.lane.b32.xlu1 %v5321_v6, %s3835_s23 }
 0x71c   : > { %2329 = vrot.lane.b32.xlu0 %v5323_v32, %s3835_s23 }
 0x71f   : > { %2331 = vrot.lane.b32.xlu1 %v5325_v38, %s3835_s23 }
 0x720   : > { %2333 = vrot.lane.b32.xlu0 %v5329_v17, %s3835_s23 }
 0x723   : > { %2550 = vperm.xlu1 %3694, %v2547_v5  }
 0x755   : > { %v2216_v18 = vpop.permute.xlu1 %2215 }
 0x756   : > { %v2218_v3 = vpop.permute.xlu0 %2217 }
 0x757   : > { %v2225_v46 = vsel %vm729_vm0, %v2216_v18, %v2218_v3 }
 0x758   : > { %v2228_v34 = vmul.f32 %v2225_v46, %v4253_v22 }
 0x759   : > { %v2220_v14 = vpop.permute.xlu1 %2219 }
 0x75a   : > { %v2222_v43 = vpop.permute.xlu0 %2221  ;;  %v2224_v8 = vsel %vm729_vm0, %v2218_v3, %v2220_v14 }
 0x75b   : > { %v2223_v19 = vsel %vm729_vm0, %v2220_v14, %v2222_v43  ;;  %v2226_v39 = vsel %vm729_vm0, %v2222_v43, %v2216_v18  ;;  %v2229_v15 = vmul.f32 %v2224_v8, %v4276_v31 }
 0x75c   : > { %v2227_v16 = vmul.f32 %v2226_v39, %v4262_v25  ;;  %v2230_v42 = vmul.f32 %v2223_v19, %v4269_v29 }
 0x75d   : > { %v2232_v24 = vpop.permute.xlu1 %2231 }
 0x75e   : > { %v2234_v40 = vpop.permute.xlu0 %2233 }
 0x75f   : > { %v2241_v33 = vsel %vm762_vm1, %v2232_v24, %v2234_v40 }
 0x760   : > { %v2244_v7 = vmul.f32 %v2241_v33, %v6432_v52 }
 0x761   : > { %v2236_v1 = vpop.permute.xlu1 %2235 }
 0x762   : > { %v2240_v23 = vsel %vm762_vm1, %v2234_v40, %v2236_v1  ;;  %v2238_v37 = vpop.permute.xlu0 %2237  ;;  %v2344_v20 = vpack.c.bf16 %v2244_v7, %v2228_v34 }
 0x763   : > { %v2245_v47 = vmul.f32 %v2240_v23, %v6433_v45  ;;  %v2239_v35 = vsel %vm762_vm1, %v2236_v1, %v2238_v37  ;;  %v2242_v41 = vsel %vm762_vm1, %v2238_v37, %v2232_v24 }
 0x764   : > { %v2243_v44 = vmul.f32 %v2242_v41, %v4265_v28  ;;  %v2246_v4 = vmul.f32 %v2239_v35, %v4272_v30  ;;  %2380 = vmatprep.subr.bf16.mxu0 %v2344_v20 }
 0x765   : > { %v2248_v5 = vpop.permute.xlu1 %2247  ;;  %v2345_v43 = vpack.c.bf16 %v2245_v47, %v2229_v15 }
 0x766   : > { %v2343_v18 = vpack.c.bf16 %v2243_v44, %v2227_v16  ;;  %v2250_v3 = vpop.permute.xlu0 %2249  ;;  %v2346_v14 = vpack.c.bf16 %v2246_v4, %v2230_v42 }
 0x767   : > { %v2257_v40 = vsel %vm795_vm2, %v2248_v5, %v2250_v3 }
 0x768   : > { %2381 = vmatpush1.bf16.msra.mxu0 %v2343_v18  ;;  %2421 = vmatprep.subr.bf16.mxu1 %v2346_v14  ;;  %v2260_v19 = vmul.f32 %v2257_v40, %v4315_v61 }
 0x769   : > { %2422 = vmatpush1.bf16.msra.mxu1 %v2345_v43  ;;  %v2252_v46 = vpop.permute.xlu1 %2251 }
 0x76a   : > { %v2254_v24 = vpop.permute.xlu0 %2253  ;;  %v2256_v37 = vsel %vm795_vm2, %v2250_v3, %v2252_v46 }
 0x76b   : > { %v2255_v1 = vsel %vm795_vm2, %v2252_v46, %v2254_v24  ;;  %v2258_v8 = vsel %vm795_vm2, %v2254_v24, %v2248_v5  ;;  %v2261_v18 = vmul.f32 %v2256_v37, %v4326_v11 }
 0x76c   : > { %v2259_v44 = vmul.f32 %v2258_v8, %v4323_v9  ;;  %v2262_v4 = vmul.f32 %v2255_v1, %v4329_v12 }
 0x76d   : > { %v2264_v33 = vpop.permute.xlu1 %2263 }
 0x76e   : > { %v2266_v34 = vpop.permute.xlu0 %2265 }
 0x76f   : > { %v2273_v7 = vsel %vm828_vm3, %v2264_v33, %v2266_v34 }
 0x770   : > { %v2276_v39 = vmul.f32 %v2273_v7, %v4318_v62 }
 0x771   : > { %v2268_v23 = vpop.permute.xlu1 %2267 }
 0x772   : > { %v2272_v20 = vsel %vm828_vm3, %v2266_v34, %v2268_v23  ;;  %v2270_v47 = vpop.permute.xlu0 %2269  ;;  %v2348_v35 = vpack.c.bf16 %v2276_v39, %v2260_v19 }
 0x773   : > { %v2277_v41 = vmul.f32 %v2272_v20, %v4339_v27  ;;  %v2271_v16 = vsel %vm828_vm3, %v2268_v23, %v2270_v47  ;;  %v2274_v42 = vsel %vm828_vm3, %v2270_v47, %v2264_v33 }
 0x774   : > { %v2275_v15 = vmul.f32 %v2274_v42, %v4336_v26  ;;  %v2278_v5 = vmul.f32 %v2271_v16, %v4346_v36  ;;  %2382 = vmatprep.subr.bf16.mxu0 %v2348_v35 }
 0x775   : > { %v2280_v3 = vpop.permute.xlu1 %2279  ;;  %v2349_v24 = vpack.c.bf16 %v2277_v41, %v2261_v18 }
 0x776   : > { %v2347_v14 = vpack.c.bf16 %v2275_v15, %v2259_v44  ;;  %v2282_v43 = vpop.permute.xlu0 %2281  ;;  %v2350_v46 = vpack.c.bf16 %v2278_v5, %v2262_v4 }
 0x777   : > { %v2289_v40 = vsel %vm861_vm4, %v2280_v3, %v2282_v43 }
 0x778   : > { %2383 = vmatpush1.bf16.msra.mxu0 %v2347_v14  ;;  %2423 = vmatprep.subr.bf16.mxu1 %v2350_v46  ;;  %v2291_v34 = vmul.f32 %v2289_v40, %v4365_v56 }
 0x779   : > { %2424 = vmatpush1.bf16.msra.mxu1 %v2349_v24  ;;  %v2284_v33 = vpop.permute.xlu1 %2283 }
 0x77a   : > { %v2288_v7 = vsel %vm861_vm4, %v2282_v43, %v2284_v33  ;;  %v2286_v19 = vpop.permute.xlu0 %2285  ;;  %v2351_v35 = vpack.c.bf16 %v2291_v34, %v5321_v6 }
 0x77b   : > { %v2292_v39 = vmul.f32 %v2288_v7, %v4373_v59  ;;  %v2287_v1 = vsel %vm861_vm4, %v2284_v33, %v2286_v19  ;;  %v2290_v8 = vsel %vm861_vm4, %v2286_v19, %v2280_v3 }
 0x77c   : > { %v2293_v23 = vmul.f32 %v2287_v1, %v4376_v60  ;;  %v2294_v37 = vmul.f32 %v2290_v8, %v4368_v57 }
 0x77d   : > { %v2296_v20 = vpop.permute.xlu1 %2295  ;;  %v2352_v47 = vpack.c.bf16 %v2292_v39, %v5323_v32 }
 0x77e   : > { %v2353_v41 = vpack.c.bf16 %v2293_v23, %v5325_v38  ;;  %v2298_v16 = vpop.permute.xlu0 %2297  ;;  %v2354_v42 = vpack.c.bf16 %v2294_v37, %v5329_v17 }
 0x77f   : > { %2384 = vmatprep.subr.bf16.mxu0 %v2352_v47  ;;  %v2305_v18 = vsel %vm894_vm6, %v2296_v20, %v2298_v16 }
 0x780   : > { %2385 = vmatpush1.bf16.msra.mxu0 %v2351_v35  ;;  %2425 = vmatprep.subr.bf16.mxu1 %v2354_v42  ;;  %v2307_v14 = vmul.f32 %v2305_v18, %v4428_v58 }
 0x781   : > { %2426 = vmatpush1.bf16.msra.mxu1 %v2353_v41  ;;  %v2300_v44 = vpop.permute.xlu1 %2299 }
 0x782   : > { %v2302_v4 = vpop.permute.xlu0 %2301  ;;  %v2304_v6 = vsel %vm894_vm6, %v2298_v16, %v2300_v44 }
 0x783   : > { %v2303_v38 = vsel %vm894_vm6, %v2300_v44, %v2302_v4  ;;  %v2306_v17 = vsel %vm894_vm6, %v2302_v4, %v2296_v20  ;;  %v2308_v40 = vmul.f32 %v2304_v6, %v4400_v0 }
 0x784   : > { %v2309_v19 = vmul.f32 %v2303_v38, %v4405_v49  ;;  %v2310_v39 = vmul.f32 %v2306_v17, %v4397_v2 }
 0x785   : > { %v2312_v15 = vpop.permute.xlu1 %2311 }
 0x786   : > { %v2314_v5 = vpop.permute.xlu0 %2313 }
 0x787   : > { %v2321_v32 = vsel %vm927_vm5, %v2312_v15, %v2314_v5 }
 0x788   : > { %v2323_v43 = vmul.f32 %v2321_v32, %v4410_v50 }
 0x789   : > { %v2316_v3 = vpop.permute.xlu1 %2315 }
 0x78a   : > { %v2320_v46 = vsel %vm927_vm5, %v2314_v5, %v2316_v3  ;;  %v2318_v24 = vpop.permute.xlu0 %2317  ;;  %v2355_v20 = vpack.c.bf16 %v2323_v43, %v2307_v14 }
 0x78b   : > { %v2324_v33 = vmul.f32 %v2320_v46, %v4421_v54  ;;  %v2319_v34 = vsel %vm927_vm5, %v2316_v3, %v2318_v24  ;;  %v2322_v7 = vsel %vm927_vm5, %v2318_v24, %v2312_v15 }
 0x78c   : > { %v2325_v1 = vmul.f32 %v2319_v34, %v4424_v55  ;;  %v2326_v8 = vmul.f32 %v2322_v7, %v4418_v53  ;;  %v6435_v34 = vld [vmem:[#allocation19_spill] sm:$0xff]  ;;  %v6436_v7 = vld [vmem:[#allocation17_spill] sm:$0xff] }
 0x78d   : > { %v2328_v23 = vpop.permute.xlu1 %2327  ;;  %v2356_v37 = vpack.c.bf16 %v2324_v33, %v2308_v40  ;;  %v2364_v40 = vld [vmem:[%s6265_s13] sm:$0xf]  ;;  %v6434_v33 = vld [vmem:[#allocation16_spill] sm:$0xff] }
 0x78e   : > { %v2357_v47 = vpack.c.bf16 %v2325_v1, %v2309_v19  ;;  %v2330_v35 = vpop.permute.xlu0 %2329  ;;  %v2358_v41 = vpack.c.bf16 %v2326_v8, %v2310_v39  ;;  %v6437_v19 = vld [vmem:[#allocation20_spill] sm:$0xff]  ;;  %v6438_v39 = vld [vmem:[#allocation18_spill] sm:$0xff]  ;;  %v6439_v1 = vld [vmem:[#allocation23_spill] sm:$0xff] }
 0x78f   : > { %v2337_v16 = vsel %vm960_vm7, %v2328_v23, %v2330_v35  ;;  %2386 = vmatprep.subr.bf16.mxu0 %v2356_v37  ;;  %v6440_v8 = vld [vmem:[#allocation21_spill] sm:$0xff]  ;;  %v6442_v37 = vld [vmem:[#allocation22_spill] sm:$0xff] }
 0x790   : > { %v2339_v42 = vmul.f32 %v2337_v16, %v4437_v21  ;;  %2387 = vmatpush1.bf16.msra.mxu0 %v2355_v20  ;;  %2427 = vmatprep.subr.bf16.mxu1 %v2358_v41  ;;  %v6443_v20 = vld [vmem:[#allocation26_spill] sm:$0xff]  ;;  %v6446_v41 = vld [vmem:[#allocation24_spill] sm:$0xff] }
 0x791   : > { %2428 = vmatpush1.bf16.msra.mxu1 %v2357_v47  ;;  %v2332_v44 = vpop.permute.xlu1 %2331  ;;  %v6444_v47 = vld [vmem:[#allocation27_spill] sm:$0xff]  ;;  %v6447_v16 = vld [vmem:[#allocation30_spill] sm:$0xff] }
 0x792   : > { %v2336_v4 = vsel %vm960_vm7, %v2330_v35, %v2332_v44  ;;  %v2334_v15 = vpop.permute.xlu0 %2333  ;;  %v2359_v5 = vpack.c.bf16 %v2339_v42, %v2339_v42  ;;  %v6445_v35 = vld [vmem:[#allocation29_spill] sm:$0xff]  ;;  %v6448_v42 = vld [vmem:[#allocation31_spill] sm:$0xff] }
 0x793   : > { %v2340_v18 = vmul.f32 %v2336_v4, %v4466_v51  ;;  %v2335_v32 = vsel %vm960_vm7, %v2332_v44, %v2334_v15  ;;  %v2338_v6 = vsel %vm960_vm7, %v2334_v15, %v2328_v23  ;;  %v6441_v23 = vld [vmem:[#allocation25_spill] sm:$0xff]  ;;  %v6450_v4 = vld [vmem:[#allocation28_spill] sm:$0xff] }
 0x794   : > { %v2341_v38 = vmul.f32 %v2335_v32, %v4470_v63  ;;  %v2342_v17 = vmul.f32 %v2338_v6, %v4463_v10  ;;  %v2369_v46 = vsel %vm1159_vm8, %v2359_v5, 0  ;;  %v6449_v44 = vld [vmem:[#allocation33_spill] sm:$0xff]  ;;  %v6451_v15 = vld [vmem:[#allocation32_spill] sm:$0xff]  ;;  %v6452_v5 = vld [vmem:[#allocation34_spill] sm:$0xff] }
 0x795   : > { %v2360_v3 = vpack.c.bf16 %v2340_v18, %v2340_v18  ;;  %v2363_v18 = vld [vmem:[%s6264_s12] sm:$0xf]  ;;  %v6453_v32 = vld [vmem:[#allocation35_spill] sm:$0xff] }
 0x796   : > { %v2361_v14 = vpack.c.bf16 %v2341_v38, %v2341_v38  ;;  %v2362_v43 = vpack.c.bf16 %v2342_v17, %v2342_v17 }
 0x797   : > { %3595 = vmatprep.subr.msk.bf16.mxu0 %vm1159_vm8, %v2360_v3 }
 0x798   : > { %2389 = vmatpush1.bf16.msra.mxu0 %v2369_v46  ;;  %3597 = vmatprep.subr.msk.bf16.mxu1 %vm1159_vm8, %v2362_v43  ;;  %v2375_v24 = vsel %vm1159_vm8, %v2361_v14, 0 }
 0x799   : > { %2430 = vmatpush1.bf16.msra.mxu1 %v2375_v24  ;;  %2465 = vmatprep.subr.bf16.mxu0 %v6434_v33 }
 0x79a   : > { %2506 = vmatprep.subr.bf16.mxu1 %v6435_v34 }
 0x79b   : > { %3596 = vmatmul.mubr.msk.bf16.vlgmr.msra.gmra.mrb[24].mxu0 %vm1155_vm9, %v2364_v40 }
 0x79c   : > { %2466 = vmatpush1.bf16.msra.mxu0 %v6436_v7  ;;  %3598 = vmatmul.mubr.msk.bf16.vlgmr.msra.gmra.mrb[24].mxu1 %vm1155_vm9, %v2364_v40 }
 0x79d   : > { %2467 = vmatprep.subr.bf16.mxu0 %v6437_v19  ;;  %2507 = vmatpush1.bf16.msra.mxu1 %v6438_v39 }
 0x79e   : > { %2508 = vmatprep.subr.bf16.mxu1 %v6439_v1  ;;  %2497 = vmatprep.mubr.bf16.mxu0 %v6398_v48 }
 0x79f   : > { %2538 = vmatprep.mubr.bf16.mxu1 %v6398_v48 }
 0x7a0   : > { %2468 = vmatpush1.bf16.msra.mxu0 %v6440_v8 }
 0x7a1   : > { %2469 = vmatprep.subr.bf16.mxu0 %v6441_v23  ;;  %2509 = vmatpush1.bf16.msra.mxu1 %v6442_v37 }
 0x7a2   : > { %2510 = vmatprep.subr.bf16.mxu1 %v6443_v20  ;;  %v2551_v40 = vpop.permute.xlu1 %2550 }
 0x7a4   : > { %2470 = vmatpush1.bf16.msra.mxu0 %v6444_v47 }
 0x7a5   : > { %2471 = vmatprep.subr.bf16.mxu0 %v6445_v35  ;;  %2511 = vmatpush1.bf16.msra.mxu1 %v6446_v41 }
 0x7a6   : > { %2512 = vmatprep.subr.bf16.mxu1 %v6447_v16 }
 0x7a8   : > { %2472 = vmatpush1.bf16.msra.mxu0 %v6448_v42 }
 0x7a9   : > { %3599 = vmatprep.subr.msk.bf16.mxu0 %vm1159_vm8, %v6449_v44  ;;  %2513 = vmatpush1.bf16.msra.mxu1 %v6450_v4 }
 0x7aa   : > { %3601 = vmatprep.subr.msk.bf16.mxu1 %vm1159_vm8, %v6451_v15 }
 0x7ac   : > { %2474 = vmatpush1.bf16.msra.mxu0 %v6452_v5 }
 0x7ad   : > { %2515 = vmatpush1.bf16.msra.mxu1 %v6453_v32  ;;  %v2710_v32 = vld [vmem:[%s6268_s16] sm:$0xff] }
 0x7af   : > { %3600 = vmatmul.mubr.msk.bf16.vlgmr.msra.gmra.mrb[28].mxu0 %vm1155_vm9, %v2363_v18 }
 0x7b0   : > { %3602 = vmatmul.mubr.msk.bf16.vlgmr.msra.gmra.mrb[28].mxu1 %vm1155_vm9, %v2363_v18  ;;  %2763 = vmatprep.mubr.bf16.mxu0 %v6398_v48 }
 0x7b1   : > { %2804 = vmatprep.mubr.bf16.mxu1 %v6398_v48 }
 0x86e   : > { %v2414_v6 = vpop.f32.mrb[24].mxu0 }
 0x86f   : > { %v2416_v38 = vpop.f32.mrb[25].mxu0  ;;  %v2455_v17 = vpop.f32.mrb[24].mxu1 }
 0x870   : > { %v2418_v3 = vpop.f32.mrb[26].mxu0  ;;  %v2457_v14 = vpop.f32.mrb[25].mxu1 }
 0x871   : > { %v2419_v43 = vpop.f32.mrb[27].mxu0  ;;  %v2459_v46 = vpop.f32.mrb[26].mxu1 }
 0x872   : > { %v2460_v24 = vpop.f32.mrb[27].mxu1 }
 0x882   : > { %v2499_v33 = vpop.f32.mrb[28].mxu0 }
 0x883   : > { %v2500_v34 = vadd.f32 %v2499_v33, %v2414_v6  ;;  %v2501_v7 = vpop.f32.mrb[29].mxu0  ;;  %v2540_v19 = vpop.f32.mrb[28].mxu1 }
 0x884   : > { %v2502_v39 = vadd.f32 %v2501_v7, %v2416_v38  ;;  %v2541_v1 = vadd.f32 %v2540_v19, %v2455_v17  ;;  %v2503_v8 = vpop.f32.mrb[30].mxu0  ;;  %v2542_v23 = vpop.f32.mrb[29].mxu1 }
 0x885   : > { %v2553_v37 = vadd.f32 %v2551_v40, %v2500_v34  ;;  %v2543_v20 = vadd.f32 %v2542_v23, %v2457_v14  ;;  %v2504_v47 = vpop.f32.mrb[31].mxu0  ;;  %v2544_v35 = vpop.f32.mrb[30].mxu1 }
 0x886   : > { %v2554_v41 = vadd.f32 %v2551_v40, %v2502_v39  ;;  %v2545_v16 = vpop.f32.mrb[31].mxu1  ;;  %v2555_v44 = vadd.f32 %v2551_v40, %v2541_v1 }
 0x887   : > { %v5544_v42 = vmax.f32 %v2553_v37, 0.0  ;;  %v2556_v15 = vadd.f32 %v2551_v40, %v2543_v20 }
 0x888   : > { %v5546_v4 = vmax.f32 %v2554_v41, 0.0  ;;  %v5552_v5 = vmax.f32 %v2555_v44, 0.0 }
 0x889   : > { %2561 = vrot.lane.b32.xlu0 %v5544_v42, %s3828_s20  ;;  %v5554_v18 = vmax.f32 %v2556_v15, 0.0 }
 0x88a   : > { %2563 = vrot.lane.b32.xlu1 %v5546_v4, %s3828_s20 }
 0x88d   : > { %2565 = vrot.lane.b32.xlu0 %v5552_v5, %s3828_s20 }
 0x88e   : > { %2567 = vrot.lane.b32.xlu1 %v5554_v18, %s3828_s20 }
 0x891   : > { %2577 = vrot.lane.b32.xlu0 %v5544_v42, %s3829_s29 }
 0x892   : > { %2579 = vrot.lane.b32.xlu1 %v5546_v4, %s3829_s29 }
 0x895   : > { %2581 = vrot.lane.b32.xlu0 %v5552_v5, %s3829_s29 }
 0x896   : > { %2583 = vrot.lane.b32.xlu1 %v5554_v18, %s3829_s29 }
 0x899   : > { %2593 = vrot.lane.b32.xlu0 %v5544_v42, %s6399_s25 }
 0x89a   : > { %2595 = vrot.lane.b32.xlu1 %v5546_v4, %s6399_s25 }
 0x89d   : > { %2597 = vrot.lane.b32.xlu0 %v5552_v5, %s6399_s25 }
 0x89e   : > { %2599 = vrot.lane.b32.xlu1 %v5554_v18, %s6399_s25 }
 0x8a1   : > { %2609 = vrot.lane.b32.xlu0 %v5544_v42, %s6400_s26 }
 0x8a2   : > { %2611 = vrot.lane.b32.xlu1 %v5546_v4, %s6400_s26 }
 0x8a5   : > { %2613 = vrot.lane.b32.xlu0 %v5552_v5, %s6400_s26 }
 0x8a6   : > { %2615 = vrot.lane.b32.xlu1 %v5554_v18, %s6400_s26 }
 0x8a9   : > { %2625 = vrot.lane.b32.xlu0 %v5544_v42, %s6401_s3 }
 0x8aa   : > { %2627 = vrot.lane.b32.xlu1 %v5546_v4, %s6401_s3 }
 0x8ad   : > { %2629 = vrot.lane.b32.xlu0 %v5552_v5, %s6401_s3 }
 0x8ae   : > { %2631 = vrot.lane.b32.xlu1 %v5554_v18, %s6401_s3 }
 0x8b1   : > { %2641 = vrot.lane.b32.xlu0 %v5544_v42, %s6402_s24 }
 0x8b2   : > { %2643 = vrot.lane.b32.xlu1 %v5546_v4, %s6402_s24 }
 0x8b5   : > { %2645 = vrot.lane.b32.xlu0 %v5552_v5, %s6402_s24 }
 0x8b6   : > { %2647 = vrot.lane.b32.xlu1 %v5554_v18, %s6402_s24 }
 0x8b9   : > { %2657 = vrot.lane.b32.xlu0 %v5544_v42, %s6403_s6 }
 0x8ba   : > { %2659 = vrot.lane.b32.xlu1 %v5546_v4, %s6403_s6 }
 0x8bd   : > { %2661 = vrot.lane.b32.xlu0 %v5552_v5, %s6403_s6 }
 0x8be   : > { %2663 = vrot.lane.b32.xlu1 %v5554_v18, %s6403_s6 }
 0x8c1   : > { %2673 = vrot.lane.b32.xlu0 %v5544_v42, %s3835_s23 }
 0x8c2   : > { %2675 = vrot.lane.b32.xlu1 %v5546_v4, %s3835_s23 }
 0x8c5   : > { %2677 = vrot.lane.b32.xlu0 %v5552_v5, %s3835_s23 }
 0x8c6   : > { %2679 = vrot.lane.b32.xlu1 %v5554_v18, %s3835_s23 }
 0x8c9   : > { %2713 = vperm.xlu0 %3693, %v2710_v32  }
 0x8fb   : > { %v2562_v6 = vpop.permute.xlu0 %2561 }
 0x8fc   : > { %v2564_v38 = vpop.permute.xlu1 %2563 }
 0x8fd   : > { %v2571_v14 = vsel %vm729_vm0, %v2562_v6, %v2564_v38 }
 0x8fe   : > { %v2574_v40 = vmul.f32 %v2571_v14, %v4253_v22 }
 0x8ff   : > { %v2566_v17 = vpop.permute.xlu0 %2565 }
 0x900   : > { %v2568_v3 = vpop.permute.xlu1 %2567  ;;  %v2570_v39 = vsel %vm729_vm0, %v2564_v38, %v2566_v17 }
 0x901   : > { %v2569_v34 = vsel %vm729_vm0, %v2566_v17, %v2568_v3  ;;  %v2572_v7 = vsel %vm729_vm0, %v2568_v3, %v2562_v6  ;;  %v2575_v15 = vmul.f32 %v2570_v39, %v4276_v31 }
 0x902   : > { %v2573_v35 = vmul.f32 %v2572_v7, %v4262_v25  ;;  %v2576_v41 = vmul.f32 %v2569_v34, %v4269_v29 }
 0x903   : > { %v2578_v43 = vpop.permute.xlu0 %2577 }
 0x904   : > { %v2580_v46 = vpop.permute.xlu1 %2579 }
 0x905   : > { %v2587_v24 = vsel %vm762_vm1, %v2578_v43, %v2580_v46 }
 0x906   : > { %v2590_v33 = vmul.f32 %v2587_v24, %v6432_v52 }
 0x907   : > { %v2582_v19 = vpop.permute.xlu0 %2581 }
 0x908   : > { %v2586_v1 = vsel %vm762_vm1, %v2580_v46, %v2582_v19  ;;  %v2584_v8 = vpop.permute.xlu1 %2583  ;;  %v5633_v23 = vpack.c.bf16 %v2590_v33, %v2574_v40 }
 0x909   : > { %v2591_v37 = vmul.f32 %v2586_v1, %v6433_v45  ;;  %v2585_v20 = vsel %vm762_vm1, %v2582_v19, %v2584_v8  ;;  %v2588_v47 = vsel %vm762_vm1, %v2584_v8, %v2578_v43 }
 0x90a   : > { %v2589_v16 = vmul.f32 %v2588_v47, %v4265_v28  ;;  %v2592_v44 = vmul.f32 %v2585_v20, %v4272_v30  ;;  %2731 = vmatprep.subr.bf16.mxu0 %v5633_v23 }
 0x90b   : > { %v2594_v32 = vpop.permute.xlu0 %2593  ;;  %v5650_v3 = vpack.c.bf16 %v2591_v37, %v2575_v15 }
 0x90c   : > { %v5646_v6 = vpack.c.bf16 %v2589_v16, %v2573_v35  ;;  %v2596_v38 = vpop.permute.xlu1 %2595  ;;  %v5648_v17 = vpack.c.bf16 %v2592_v44, %v2576_v41 }
 0x90d   : > { %v2603_v46 = vsel %vm795_vm2, %v2594_v32, %v2596_v38 }
 0x90e   : > { %2732 = vmatpush1.bf16.msra.mxu0 %v5646_v6  ;;  %2772 = vmatprep.subr.bf16.mxu1 %v5648_v17  ;;  %v2606_v34 = vmul.f32 %v2603_v46, %v4315_v61 }
 0x90f   : > { %2773 = vmatpush1.bf16.msra.mxu1 %v5650_v3  ;;  %v2598_v14 = vpop.permute.xlu0 %2597 }
 0x910   : > { %v2600_v43 = vpop.permute.xlu1 %2599  ;;  %v2602_v8 = vsel %vm795_vm2, %v2596_v38, %v2598_v14 }
 0x911   : > { %v2601_v19 = vsel %vm795_vm2, %v2598_v14, %v2600_v43  ;;  %v2604_v39 = vsel %vm795_vm2, %v2600_v43, %v2594_v32  ;;  %v2607_v14 = vmul.f32 %v2602_v8, %v4326_v11 }
 0x912   : > { %v2605_v44 = vmul.f32 %v2604_v39, %v4323_v9  ;;  %v2608_v15 = vmul.f32 %v2601_v19, %v4329_v12 }
 0x913   : > { %v2610_v24 = vpop.permute.xlu0 %2609 }
 0x914   : > { %v2612_v40 = vpop.permute.xlu1 %2611 }
 0x915   : > { %v2619_v33 = vsel %vm828_vm3, %v2610_v24, %v2612_v40 }
 0x916   : > { %v2622_v7 = vmul.f32 %v2619_v33, %v4318_v62 }
 0x917   : > { %v2614_v1 = vpop.permute.xlu0 %2613 }
 0x918   : > { %v2618_v37 = vsel %vm828_vm3, %v2612_v40, %v2614_v1  ;;  %v2616_v20 = vpop.permute.xlu1 %2615  ;;  %v5669_v47 = vpack.c.bf16 %v2622_v7, %v2606_v34 }
 0x919   : > { %v2623_v35 = vmul.f32 %v2618_v37, %v4339_v27  ;;  %v2617_v41 = vsel %vm828_vm3, %v2614_v1, %v2616_v20  ;;  %v2620_v16 = vsel %vm828_vm3, %v2616_v20, %v2610_v24 }
 0x91a   : > { %v2621_v32 = vmul.f32 %v2620_v16, %v4336_v26  ;;  %v2624_v38 = vmul.f32 %v2617_v41, %v4346_v36  ;;  %2733 = vmatprep.subr.bf16.mxu0 %v5669_v47 }
 0x91b   : > { %v2626_v43 = vpop.permute.xlu0 %2625  ;;  %v5686_v34 = vpack.c.bf16 %v2623_v35, %v2607_v14 }
 0x91c   : > { %v5682_v46 = vpack.c.bf16 %v2621_v32, %v2605_v44  ;;  %v2628_v40 = vpop.permute.xlu1 %2627  ;;  %v5684_v33 = vpack.c.bf16 %v2624_v38, %v2608_v15 }
 0x91d   : > { %6454 = vst [vmem:[#allocation36_spill] sm:$0xff] %v5686_v34  ;;  %v2635_v24 = vsel %vm861_vm4, %v2626_v43, %v2628_v40 }
 0x91e   : > { %2734 = vmatpush1.bf16.msra.mxu0 %v5682_v46  ;;  %2774 = vmatprep.subr.bf16.mxu1 %v5684_v33  ;;  %v2637_v19 = vmul.f32 %v2635_v24, %v4365_v56 }
 0x91f   : > { %2775 = vmatpush1.bf16.msra.mxu1 %v5686_v34  ;;  %v2630_v7 = vpop.permute.xlu0 %2629 }
 0x920   : > { %v2634_v39 = vsel %vm861_vm4, %v2628_v40, %v2630_v7  ;;  %v2632_v1 = vpop.permute.xlu1 %2631  ;;  %v5707_v15 = vpack.c.bf16 %v2637_v19, %v5544_v42 }
 0x921   : > { %v2638_v8 = vmul.f32 %v2634_v39, %v4373_v59  ;;  %v2633_v37 = vsel %vm861_vm4, %v2630_v7, %v2632_v1  ;;  %v2636_v20 = vsel %vm861_vm4, %v2632_v1, %v2626_v43 }
 0x922   : > { %v2639_v35 = vmul.f32 %v2633_v37, %v4376_v60  ;;  %v2640_v41 = vmul.f32 %v2636_v20, %v4368_v57  ;;  %6455 = vst [vmem:[#allocation39_spill] sm:$0xff] %v5707_v15 }
 0x923   : > { %v2642_v16 = vpop.permute.xlu0 %2641  ;;  %v5704_v44 = vpack.c.bf16 %v2638_v8, %v5546_v4 }
 0x924   : > { %v5710_v32 = vpack.c.bf16 %v2639_v35, %v5552_v5  ;;  %v2644_v38 = vpop.permute.xlu1 %2643  ;;  %v5713_v14 = vpack.c.bf16 %v2640_v41, %v5554_v18 }
 0x925   : > { %2735 = vmatprep.subr.bf16.mxu0 %v5704_v44  ;;  %v2651_v5 = vsel %vm894_vm6, %v2642_v16, %v2644_v38 }
 0x926   : > { %6456 = vst [vmem:[#allocation37_spill] sm:$0xff] %v5710_v32  ;;  %6457 = vst [vmem:[#allocation41_spill] sm:$0xff] %v5713_v14  ;;  %2736 = vmatpush1.bf16.msra.mxu0 %v5707_v15  ;;  %2776 = vmatprep.subr.bf16.mxu1 %v5713_v14  ;;  %v2653_v1 = vmul.f32 %v2651_v5, %v4428_v58 }
 0x927   : > { %2777 = vmatpush1.bf16.msra.mxu1 %v5710_v32  ;;  %v2646_v4 = vpop.permute.xlu0 %2645 }
 0x928   : > { %v2648_v43 = vpop.permute.xlu1 %2647  ;;  %v2650_v18 = vsel %vm894_vm6, %v2644_v38, %v2646_v4 }
 0x929   : > { %v2649_v7 = vsel %vm894_vm6, %v2646_v4, %v2648_v43  ;;  %v2652_v19 = vsel %vm894_vm6, %v2648_v43, %v2642_v16  ;;  %v2654_v35 = vmul.f32 %v2650_v18, %v4400_v0 }
 0x92a   : > { %v2655_v16 = vmul.f32 %v2649_v7, %v4405_v49  ;;  %v2656_v43 = vmul.f32 %v2652_v19, %v4397_v2 }
 0x92b   : > { %v2658_v40 = vpop.permute.xlu0 %2657 }
 0x92c   : > { %v2660_v42 = vpop.permute.xlu1 %2659 }
 0x92d   : > { %v2667_v24 = vsel %vm927_vm5, %v2658_v40, %v2660_v42 }
 0x92e   : > { %v2669_v8 = vmul.f32 %v2667_v24, %v4410_v50 }
 0x92f   : > { %v2662_v39 = vpop.permute.xlu0 %2661 }
 0x930   : > { %v2666_v37 = vsel %vm927_vm5, %v2660_v42, %v2662_v39  ;;  %v2664_v20 = vpop.permute.xlu1 %2663  ;;  %v5745_v18 = vpack.c.bf16 %v2669_v8, %v2653_v1 }
 0x931   : > { %v2670_v41 = vmul.f32 %v2666_v37, %v4421_v54  ;;  %v2665_v38 = vsel %vm927_vm5, %v2662_v39, %v2664_v20  ;;  %v2668_v4 = vsel %vm927_vm5, %v2664_v20, %v2658_v40 }
 0x932   : > { %v2671_v5 = vmul.f32 %v2665_v38, %v4424_v55  ;;  %v2672_v24 = vmul.f32 %v2668_v4, %v4418_v53  ;;  %6459 = vst [vmem:[#allocation43_spill] sm:$0xff] %v5745_v18 }
 0x933   : > { %v2674_v42 = vpop.permute.xlu0 %2673  ;;  %v5743_v32 = vpack.c.bf16 %v2670_v41, %v2654_v35 }
 0x934   : > { %v5747_v37 = vpack.c.bf16 %v2671_v5, %v2655_v16  ;;  %v2676_v15 = vpop.permute.xlu1 %2675  ;;  %v5749_v39 = vpack.c.bf16 %v2672_v24, %v2656_v43 }
 0x935   : > { %6458 = vst [vmem:[#allocation38_spill] sm:$0xff] %v5743_v32  ;;  %v2683_v40 = vsel %vm960_vm7, %v2674_v42, %v2676_v15  ;;  %2737 = vmatprep.subr.bf16.mxu0 %v5743_v32 }
 0x936   : > { %6460 = vst [vmem:[#allocation40_spill] sm:$0xff] %v5747_v37  ;;  %6461 = vst [vmem:[#allocation44_spill] sm:$0xff] %v5749_v39  ;;  %v2685_v7 = vmul.f32 %v2683_v40, %v4437_v21  ;;  %2738 = vmatpush1.bf16.msra.mxu0 %v5745_v18  ;;  %2778 = vmatprep.subr.bf16.mxu1 %v5749_v39  ;;  %v2709_v40 = vld [vmem:[%s6267_s15] sm:$0xf] }
 0x937   : > { %2779 = vmatpush1.bf16.msra.mxu1 %v5747_v37  ;;  %v2678_v19 = vpop.permute.xlu0 %2677 }
 0x938   : > { %v2682_v1 = vsel %vm960_vm7, %v2676_v15, %v2678_v19  ;;  %v2680_v8 = vpop.permute.xlu1 %2679  ;;  %v2705_v20 = vpack.c.bf16 %v2685_v7, %v2685_v7 }
 0x939   : > { %v2686_v35 = vmul.f32 %v2682_v1, %v4466_v51  ;;  %v2681_v41 = vsel %vm960_vm7, %v2678_v19, %v2680_v8  ;;  %v2684_v38 = vsel %vm960_vm7, %v2680_v8, %v2674_v42 }
 0x93a   : > { %v2687_v4 = vmul.f32 %v2681_v41, %v4470_v63  ;;  %v2688_v16 = vmul.f32 %v2684_v38, %v4463_v10  ;;  %v5774_v15 = vsel %vm1159_vm8, %v2705_v20, 0 }
 0x93b   : > { %v5767_v43 = vpack.c.bf16 %v2686_v35, %v2686_v35  ;;  %6464 = vst [vmem:[#allocation45_spill] sm:$0xff] %v5774_v15 }
 0x93c   : > { %v2707_v5 = vpack.c.bf16 %v2687_v4, %v2687_v4  ;;  %v5769_v24 = vpack.c.bf16 %v2688_v16, %v2688_v16 }
 0x93d   : > { %6462 = vst [vmem:[#allocation42_spill] sm:$0xff] %v5767_v43  ;;  %3603 = vmatprep.subr.msk.bf16.mxu0 %vm1159_vm8, %v5767_v43 }
 0x93e   : > { %6463 = vst [vmem:[#allocation46_spill] sm:$0xff] %v5769_v24  ;;  %2740 = vmatpush1.bf16.msra.mxu0 %v5774_v15  ;;  %3605 = vmatprep.subr.msk.bf16.mxu1 %vm1159_vm8, %v5769_v24  ;;  %v5780_v42 = vsel %vm1159_vm8, %v2707_v5, 0 }
 0x93f   : > { %6465 = vst [vmem:[#allocation47_spill] sm:$0xff] %v5780_v42  ;;  %2781 = vmatpush1.bf16.msra.mxu1 %v5780_v42 }
 0x941   : > { %3604 = vmatmul.mubr.msk.bf16.vlgmr.msra.gmra.mrb[32].mxu0 %vm1155_vm9, %v2709_v40 }
 0x942   : > { %3606 = vmatmul.mubr.msk.bf16.vlgmr.msra.gmra.mrb[32].mxu1 %vm1155_vm9, %v2709_v40  ;;  %3034 = vmatprep.mubr.bf16.mxu0 %v6398_v48 }
 0x943   : > { %3075 = vmatprep.mubr.bf16.mxu1 %v6398_v48 }
 0x948   : > { %v2714_v7 = vpop.permute.xlu0 %2713 }
 0xa14   : > { %v2765_v19 = vpop.f32.mrb[32].mxu0 }
 0xa15   : > { %v2766_v1 = vadd.f32 %v2765_v19, %v2714_v7  ;;  %v2767_v8 = vpop.f32.mrb[33].mxu0  ;;  %v2806_v20 = vpop.f32.mrb[32].mxu1 }
 0xa16   : > { %v2768_v35 = vadd.f32 %v2767_v8, %v2714_v7  ;;  %v2807_v41 = vadd.f32 %v2806_v20, %v2714_v7  ;;  %v2769_v38 = vpop.f32.mrb[34].mxu0  ;;  %v2808_v4 = vpop.f32.mrb[33].mxu1 }
 0xa17   : > { %v3607_v16 = vmul.f32 -1.442695, %v2766_v1  ;;  %v2809_v5 = vadd.f32 %v2808_v4, %v2714_v7  ;;  %v2770_v42 = vpop.f32.mrb[35].mxu0  ;;  %v2810_v15 = vpop.f32.mrb[34].mxu1 }
 0xa18   : > { %v3608_v24 = vmul.f32 -1.442695, %v2768_v35  ;;  %v3609_v37 = vmul.f32 -1.442695, %v2807_v41  ;;  %v2811_v40 = vpop.f32.mrb[35].mxu1 }
 0xa19   : > { %3695 = vpow2.f32 %v3607_v16  ;;  %v3610_v43 = vmul.f32 -1.442695, %v2809_v5 }
 0xa1a   : > { %3697 = vpow2.f32 %v3608_v24  ;;  %v3169_v24 = vld [vmem:[%s6271_s19] sm:$0xff] }
 0xa1b   : > { %3699 = vpow2.f32 %v3609_v37 }
 0xa1c   : > { %3701 = vpow2.f32 %v3610_v43 }
 0xa23   : > { %v3696_v19 = vpop.eup %3695 }
 0xa24   : > { %v3698_v18 = vpop.eup %3697  ;;  %v2825_v8 = vadd.f32 1.0, %v3696_v19 }
 0xa25   : > { %v3700_v20 = vpop.eup %3699  ;;  %v2826_v38 = vadd.f32 1.0, %v3698_v18 }
 0xa26   : > { %v3702_v1 = vpop.eup %3701  ;;  %3703 = vrcp.f32 %v2825_v8  ;;  %v2827_v15 = vadd.f32 1.0, %v3700_v20 }
 0xa27   : > { %3705 = vrcp.f32 %v2826_v38  ;;  %v2828_v42 = vadd.f32 1.0, %v3702_v1 }
 0xa28   : > { %3707 = vrcp.f32 %v2827_v15 }
 0xa29   : > { %3709 = vrcp.f32 %v2828_v42 }
 0xa30   : > { %v5790_v7 = vpop.eup %3703 }
 0xa31   : > { %v5792_v37 = vpop.eup %3705  ;;  %3467 = vst [vmem:[%s4914_s0 + $0x40] sm:$0xff] %v5790_v7  ;;  %2837 = vrot.lane.b32.xlu1 %v5790_v7, %s3828_s20 }
 0xa32   : > { %v5798_v43 = vpop.eup %3707  ;;  %3468 = vst [vmem:[%s4914_s0 + $0x48] sm:$0xff] %v5792_v37  ;;  %2839 = vrot.lane.b32.xlu0 %v5792_v37, %s3828_s20 }
 0xa33   : > { %v5804_v18 = vpop.eup %3709  ;;  %3469 = vst [vmem:[%s4914_s0 + $0x50] sm:$0xff] %v5798_v43 }
 0xa34   : > { %3470 = vst [vmem:[%s4914_s0 + $0x58] sm:$0xff] %v5804_v18 }
 0xa35   : > { %2841 = vrot.lane.b32.xlu1 %v5798_v43, %s3828_s20 }
 0xa36   : > { %2843 = vrot.lane.b32.xlu0 %v5804_v18, %s3828_s20 }
 0xa39   : > { %2853 = vrot.lane.b32.xlu1 %v5790_v7, %s3829_s29 }
 0xa3a   : > { %2855 = vrot.lane.b32.xlu0 %v5792_v37, %s3829_s29 }
 0xa3d   : > { %2857 = vrot.lane.b32.xlu1 %v5798_v43, %s3829_s29 }
 0xa3e   : > { %2859 = vrot.lane.b32.xlu0 %v5804_v18, %s3829_s29 }
 0xa41   : > { %2869 = vrot.lane.b32.xlu1 %v5790_v7, %s6399_s25 }
 0xa42   : > { %2871 = vrot.lane.b32.xlu0 %v5792_v37, %s6399_s25 }
 0xa45   : > { %2873 = vrot.lane.b32.xlu1 %v5798_v43, %s6399_s25 }
 0xa46   : > { %2875 = vrot.lane.b32.xlu0 %v5804_v18, %s6399_s25 }
 0xa49   : > { %2885 = vrot.lane.b32.xlu1 %v5790_v7, %s6400_s26 }
 0xa4a   : > { %2887 = vrot.lane.b32.xlu0 %v5792_v37, %s6400_s26 }
 0xa4d   : > { %2889 = vrot.lane.b32.xlu1 %v5798_v43, %s6400_s26 }
 0xa4e   : > { %2891 = vrot.lane.b32.xlu0 %v5804_v18, %s6400_s26 }
 0xa51   : > { %2901 = vrot.lane.b32.xlu1 %v5790_v7, %s6401_s3 }
 0xa52   : > { %2903 = vrot.lane.b32.xlu0 %v5792_v37, %s6401_s3 }
 0xa55   : > { %2905 = vrot.lane.b32.xlu1 %v5798_v43, %s6401_s3 }
 0xa56   : > { %2907 = vrot.lane.b32.xlu0 %v5804_v18, %s6401_s3 }
 0xa59   : > { %2917 = vrot.lane.b32.xlu1 %v5790_v7, %s6402_s24 }
 0xa5a   : > { %2919 = vrot.lane.b32.xlu0 %v5792_v37, %s6402_s24 }
 0xa5d   : > { %2921 = vrot.lane.b32.xlu1 %v5798_v43, %s6402_s24 }
 0xa5e   : > { %2923 = vrot.lane.b32.xlu0 %v5804_v18, %s6402_s24 }
 0xa61   : > { %2933 = vrot.lane.b32.xlu1 %v5790_v7, %s6403_s6 }
 0xa62   : > { %2935 = vrot.lane.b32.xlu0 %v5792_v37, %s6403_s6 }
 0xa65   : > { %2937 = vrot.lane.b32.xlu1 %v5798_v43, %s6403_s6 }
 0xa66   : > { %2939 = vrot.lane.b32.xlu0 %v5804_v18, %s6403_s6 }
 0xa69   : > { %2949 = vrot.lane.b32.xlu1 %v5790_v7, %s3835_s23 }
 0xa6a   : > { %2951 = vrot.lane.b32.xlu0 %v5792_v37, %s3835_s23 }
 0xa6d   : > { %2953 = vrot.lane.b32.xlu1 %v5798_v43, %s3835_s23 }
 0xa6e   : > { %2955 = vrot.lane.b32.xlu0 %v5804_v18, %s3835_s23 }
 0xa71   : > { %3172 = vperm.xlu1 %3694, %v3169_v24  }
 0xaa3   : > { %v2838_v35 = vpop.permute.xlu1 %2837 }
 0xaa4   : > { %v2840_v41 = vpop.permute.xlu0 %2839 }
 0xaa5   : > { %v2847_v5 = vsel %vm729_vm0, %v2838_v35, %v2840_v41 }
 0xaa6   : > { %v2850_v20 = vmul.f32 %v2847_v5, %v4253_v22 }
 0xaa7   : > { %v2842_v4 = vpop.permute.xlu1 %2841 }
 0xaa8   : > { %v2844_v16 = vpop.permute.xlu0 %2843  ;;  %v2846_v24 = vsel %vm729_vm0, %v2840_v41, %v2842_v4 }
 0xaa9   : > { %v2845_v1 = vsel %vm729_vm0, %v2842_v4, %v2844_v16  ;;  %v2848_v15 = vsel %vm729_vm0, %v2844_v16, %v2838_v35  ;;  %v2851_v4 = vmul.f32 %v2846_v24, %v4276_v31 }
 0xaaa   : > { %v2852_v35 = vmul.f32 %v2845_v1, %v4269_v29 }
 0xaab   : > { %v2854_v40 = vpop.permute.xlu1 %2853 }
 0xaac   : > { %v2856_v19 = vpop.permute.xlu0 %2855 }
 0xaad   : > { %v2863_v8 = vsel %vm762_vm1, %v2854_v40, %v2856_v19 }
 0xaae   : > { %v2866_v38 = vmul.f32 %v2863_v8, %v6432_v52  ;;  %v2849_v52 = vmul.f32 %v2848_v15, %v4262_v25 }
 0xaaf   : > { %v2858_v42 = vpop.permute.xlu1 %2857 }
 0xab0   : > { %v2862_v39 = vsel %vm762_vm1, %v2856_v19, %v2858_v42  ;;  %v2860_v32 = vpop.permute.xlu0 %2859  ;;  %v2966_v14 = vpack.c.bf16 %v2866_v38, %v2850_v20 }
 0xab1   : > { %v2867_v34 = vmul.f32 %v2862_v39, %v6433_v45  ;;  %v2861_v5 = vsel %vm762_vm1, %v2858_v42, %v2860_v32  ;;  %v2864_v8 = vsel %vm762_vm1, %v2860_v32, %v2854_v40 }
 0xab2   : > { %v2865_v16 = vmul.f32 %v2864_v8, %v4265_v28  ;;  %v2868_v41 = vmul.f32 %v2861_v5, %v4272_v30  ;;  %3002 = vmatprep.subr.bf16.mxu0 %v2966_v14 }
 0xab3   : > { %v2870_v19 = vpop.permute.xlu1 %2869  ;;  %v2967_v45 = vpack.c.bf16 %v2867_v34, %v2851_v4 }
 0xab4   : > { %v2965_v20 = vpack.c.bf16 %v2865_v16, %v2849_v52  ;;  %v2872_v39 = vpop.permute.xlu0 %2871  ;;  %v2968_v38 = vpack.c.bf16 %v2868_v41, %v2852_v35 }
 0xab5   : > { %v2879_v1 = vsel %vm795_vm2, %v2870_v19, %v2872_v39 }
 0xab6   : > { %3003 = vmatpush1.bf16.msra.mxu0 %v2965_v20  ;;  %3043 = vmatprep.subr.bf16.mxu1 %v2968_v38  ;;  %v2882_v24 = vmul.f32 %v2879_v1, %v4315_v61 }
 0xab7   : > { %3044 = vmatpush1.bf16.msra.mxu1 %v2967_v45  ;;  %v2874_v32 = vpop.permute.xlu1 %2873 }
 0xab8   : > { %v2876_v40 = vpop.permute.xlu0 %2875  ;;  %v2878_v8 = vsel %vm795_vm2, %v2872_v39, %v2874_v32 }
 0xab9   : > { %v2877_v34 = vsel %vm795_vm2, %v2874_v32, %v2876_v40  ;;  %v2880_v45 = vsel %vm795_vm2, %v2876_v40, %v2870_v19  ;;  %v2883_v32 = vmul.f32 %v2878_v8, %v4326_v11 }
 0xaba   : > { %v2881_v1 = vmul.f32 %v2880_v45, %v4323_v9  ;;  %v2884_v19 = vmul.f32 %v2877_v34, %v4329_v12 }
 0xabb   : > { %v2886_v15 = vpop.permute.xlu1 %2885 }
 0xabc   : > { %v2888_v42 = vpop.permute.xlu0 %2887 }
 0xabd   : > { %v2895_v14 = vsel %vm828_vm3, %v2886_v15, %v2888_v42 }
 0xabe   : > { %v2898_v52 = vmul.f32 %v2895_v14, %v4318_v62 }
 0xabf   : > { %v2890_v5 = vpop.permute.xlu1 %2889 }
 0xac0   : > { %v2894_v35 = vsel %vm828_vm3, %v2888_v42, %v2890_v5  ;;  %v2892_v16 = vpop.permute.xlu0 %2891  ;;  %v2970_v41 = vpack.c.bf16 %v2898_v52, %v2882_v24 }
 0xac1   : > { %v2899_v4 = vmul.f32 %v2894_v35, %v4339_v27  ;;  %v2893_v20 = vsel %vm828_vm3, %v2890_v5, %v2892_v16  ;;  %v2896_v38 = vsel %vm828_vm3, %v2892_v16, %v2886_v15 }
 0xac2   : > { %v2897_v40 = vmul.f32 %v2896_v38, %v4336_v26  ;;  %v2900_v39 = vmul.f32 %v2893_v20, %v4346_v36  ;;  %3004 = vmatprep.subr.bf16.mxu0 %v2970_v41 }
 0xac3   : > { %v2902_v42 = vpop.permute.xlu1 %2901  ;;  %v2971_v35 = vpack.c.bf16 %v2899_v4, %v2883_v32 }
 0xac4   : > { %v2969_v14 = vpack.c.bf16 %v2897_v40, %v2881_v1  ;;  %v2904_v24 = vpop.permute.xlu0 %2903  ;;  %v2972_v52 = vpack.c.bf16 %v2900_v39, %v2884_v19 }
 0xac5   : > { %v2911_v5 = vsel %vm861_vm4, %v2902_v42, %v2904_v24 }
 0xac6   : > { %3005 = vmatpush1.bf16.msra.mxu0 %v2969_v14  ;;  %3045 = vmatprep.subr.bf16.mxu1 %v2972_v52  ;;  %v2913_v34 = vmul.f32 %v2911_v5, %v4365_v56 }
 0xac7   : > { %3046 = vmatpush1.bf16.msra.mxu1 %v2971_v35  ;;  %v2906_v15 = vpop.permute.xlu1 %2905 }
 0xac8   : > { %v2910_v45 = vsel %vm861_vm4, %v2904_v24, %v2906_v15  ;;  %v2908_v16 = vpop.permute.xlu0 %2907  ;;  %v2973_v40 = vpack.c.bf16 %v2913_v34, %v5790_v7 }
 0xac9   : > { %v2914_v8 = vmul.f32 %v2910_v45, %v4373_v59  ;;  %v2909_v41 = vsel %vm861_vm4, %v2906_v15, %v2908_v16  ;;  %v2912_v4 = vsel %vm861_vm4, %v2908_v16, %v2902_v42 }
 0xaca   : > { %v2915_v20 = vmul.f32 %v2909_v41, %v4376_v60  ;;  %v2916_v38 = vmul.f32 %v2912_v4, %v4368_v57 }
 0xacb   : > { %v2918_v1 = vpop.permute.xlu1 %2917  ;;  %v2974_v19 = vpack.c.bf16 %v2914_v8, %v5792_v37 }
 0xacc   : > { %v2975_v39 = vpack.c.bf16 %v2915_v20, %v5798_v43  ;;  %v2920_v32 = vpop.permute.xlu0 %2919  ;;  %v2976_v14 = vpack.c.bf16 %v2916_v38, %v5804_v18 }
 0xacd   : > { %3006 = vmatprep.subr.bf16.mxu0 %v2974_v19  ;;  %v2927_v5 = vsel %vm894_vm6, %v2918_v1, %v2920_v32 }
 0xace   : > { %3007 = vmatpush1.bf16.msra.mxu0 %v2973_v40  ;;  %3047 = vmatprep.subr.bf16.mxu1 %v2976_v14  ;;  %v2929_v34 = vmul.f32 %v2927_v5, %v4428_v58 }
 0xacf   : > { %3048 = vmatpush1.bf16.msra.mxu1 %v2975_v39  ;;  %v2922_v24 = vpop.permute.xlu1 %2921 }
 0xad0   : > { %v2924_v42 = vpop.permute.xlu0 %2923  ;;  %v2926_v7 = vsel %vm894_vm6, %v2920_v32, %v2922_v24 }
 0xad1   : > { %v2925_v43 = vsel %vm894_vm6, %v2922_v24, %v2924_v42  ;;  %v2928_v18 = vsel %vm894_vm6, %v2924_v42, %v2918_v1  ;;  %v2930_v41 = vmul.f32 %v2926_v7, %v4400_v0 }
 0xad2   : > { %v2931_v1 = vmul.f32 %v2925_v43, %v4405_v49  ;;  %v2932_v19 = vmul.f32 %v2928_v18, %v4397_v2 }
 0xad3   : > { %v2934_v52 = vpop.permute.xlu1 %2933 }
 0xad4   : > { %v2936_v35 = vpop.permute.xlu0 %2935 }
 0xad5   : > { %v2943_v37 = vsel %vm927_vm5, %v2934_v52, %v2936_v35 }
 0xad6   : > { %v2945_v45 = vmul.f32 %v2943_v37, %v4410_v50 }
 0xad7   : > { %v2938_v15 = vpop.permute.xlu1 %2937 }
 0xad8   : > { %v2942_v16 = vsel %vm927_vm5, %v2936_v35, %v2938_v15  ;;  %v2940_v8 = vpop.permute.xlu0 %2939  ;;  %v2977_v24 = vpack.c.bf16 %v2945_v45, %v2929_v34 }
 0xad9   : > { %v2946_v4 = vmul.f32 %v2942_v16, %v4421_v54  ;;  %v2941_v20 = vsel %vm927_vm5, %v2938_v15, %v2940_v8  ;;  %v2944_v38 = vsel %vm927_vm5, %v2940_v8, %v2934_v52 }
 0xada   : > { %v2947_v40 = vmul.f32 %v2941_v20, %v4424_v55  ;;  %v2948_v39 = vmul.f32 %v2944_v38, %v4418_v53 }
 0xadb   : > { %v2950_v32 = vpop.permute.xlu1 %2949  ;;  %v2978_v14 = vpack.c.bf16 %v2946_v4, %v2930_v41 }
 0xadc   : > { %v2979_v42 = vpack.c.bf16 %v2947_v40, %v2931_v1  ;;  %v2952_v35 = vpop.permute.xlu0 %2951  ;;  %v2980_v5 = vpack.c.bf16 %v2948_v39, %v2932_v19  ;;  %v2986_v40 = vld [vmem:[%s6270_s18] sm:$0xf] }
 0xadd   : > { %v2959_v37 = vsel %vm960_vm7, %v2950_v32, %v2952_v35  ;;  %3008 = vmatprep.subr.bf16.mxu0 %v2978_v14  ;;  %v6469_v39 = vld [vmem:[#allocation38_spill] sm:$0xff]  ;;  %v6476_v14 = vld [vmem:[#allocation45_spill] sm:$0xff] }
 0xade   : > { %v2961_v52 = vmul.f32 %v2959_v37, %v4437_v21  ;;  %3009 = vmatpush1.bf16.msra.mxu0 %v2977_v24  ;;  %3049 = vmatprep.subr.bf16.mxu1 %v2980_v5  ;;  %v2985_v24 = vld [vmem:[%s6269_s17] sm:$0xf] }
 0xadf   : > { %3050 = vmatpush1.bf16.msra.mxu1 %v2979_v42  ;;  %v2954_v7 = vpop.permute.xlu1 %2953  ;;  %v6477_v42 = vld [vmem:[#allocation47_spill] sm:$0xff] }
 0xae0   : > { %v2958_v43 = vsel %vm960_vm7, %v2952_v35, %v2954_v7  ;;  %v2956_v18 = vpop.permute.xlu0 %2955  ;;  %v2981_v15 = vpack.c.bf16 %v2961_v52, %v2961_v52 }
 0xae1   : > { %v2962_v34 = vmul.f32 %v2958_v43, %v4466_v51  ;;  %v2957_v45 = vsel %vm960_vm7, %v2954_v7, %v2956_v18  ;;  %v2960_v16 = vsel %vm960_vm7, %v2956_v18, %v2950_v32  ;;  %v6473_v32 = vld [vmem:[#allocation42_spill] sm:$0xff] }
 0xae2   : > { %v2963_v8 = vmul.f32 %v2957_v45, %v4470_v63  ;;  %v2964_v41 = vmul.f32 %v2960_v16, %v4463_v10  ;;  %v2991_v1 = vsel %vm1159_vm8, %v2981_v15, 0 }
 0xae3   : > { %v2982_v4 = vpack.c.bf16 %v2962_v34, %v2962_v34 }
 0xae4   : > { %v2983_v20 = vpack.c.bf16 %v2963_v8, %v2963_v8  ;;  %v2984_v38 = vpack.c.bf16 %v2964_v41, %v2964_v41 }
 0xae5   : > { %3611 = vmatprep.subr.msk.bf16.mxu0 %vm1159_vm8, %v2982_v4 }
 0xae6   : > { %3011 = vmatpush1.bf16.msra.mxu0 %v2991_v1  ;;  %3613 = vmatprep.subr.msk.bf16.mxu1 %vm1159_vm8, %v2984_v38  ;;  %v2997_v19 = vsel %vm1159_vm8, %v2983_v20, 0 }
 0xae7   : > { %3052 = vmatpush1.bf16.msra.mxu1 %v2997_v19  ;;  %3087 = vmatprep.subr.bf16.mxu0 %v5633_v23  ;;  %v6466_v23 = vld [vmem:[#allocation36_spill] sm:$0xff] }
 0xae8   : > { %3128 = vmatprep.subr.bf16.mxu1 %v5648_v17  ;;  %v6467_v17 = vld [vmem:[#allocation41_spill] sm:$0xff] }
 0xae9   : > { %3612 = vmatmul.mubr.msk.bf16.vlgmr.msra.gmra.mrb[36].mxu0 %vm1155_vm9, %v2986_v40 }
 0xaea   : > { %3088 = vmatpush1.bf16.msra.mxu0 %v5646_v6  ;;  %3614 = vmatmul.mubr.msk.bf16.vlgmr.msra.gmra.mrb[36].mxu1 %vm1155_vm9, %v2986_v40  ;;  %v6468_v6 = vld [vmem:[#allocation39_spill] sm:$0xff] }
 0xaeb   : > { %3089 = vmatprep.subr.bf16.mxu0 %v5669_v47  ;;  %3129 = vmatpush1.bf16.msra.mxu1 %v5650_v3  ;;  %v6470_v47 = vld [vmem:[#allocation37_spill] sm:$0xff]  ;;  %v6471_v3 = vld [vmem:[#allocation44_spill] sm:$0xff] }
 0xaec   : > { %3130 = vmatprep.subr.bf16.mxu1 %v5684_v33  ;;  %3119 = vmatprep.mubr.bf16.mxu0 %v6398_v48  ;;  %v6472_v33 = vld [vmem:[#allocation43_spill] sm:$0xff] }
 0xaed   : > { %3160 = vmatprep.mubr.bf16.mxu1 %v6398_v48 }
 0xaee   : > { %3090 = vmatpush1.bf16.msra.mxu0 %v5682_v46  ;;  %v6474_v46 = vld [vmem:[#allocation40_spill] sm:$0xff] }
 0xaef   : > { %3091 = vmatprep.subr.bf16.mxu0 %v5704_v44  ;;  %3131 = vmatpush1.bf16.msra.mxu1 %v6466_v23  ;;  %v6475_v44 = vld [vmem:[#allocation46_spill] sm:$0xff] }
 0xaf0   : > { %3132 = vmatprep.subr.bf16.mxu1 %v6467_v17  ;;  %v3173_v34 = vpop.permute.xlu1 %3172 }
 0xaf2   : > { %3092 = vmatpush1.bf16.msra.mxu0 %v6468_v6 }
 0xaf3   : > { %3093 = vmatprep.subr.bf16.mxu0 %v6469_v39  ;;  %3133 = vmatpush1.bf16.msra.mxu1 %v6470_v47 }
 0xaf4   : > { %3134 = vmatprep.subr.bf16.mxu1 %v6471_v3 }
 0xaf6   : > { %3094 = vmatpush1.bf16.msra.mxu0 %v6472_v33 }
 0xaf7   : > { %3615 = vmatprep.subr.msk.bf16.mxu0 %vm1159_vm8, %v6473_v32  ;;  %3135 = vmatpush1.bf16.msra.mxu1 %v6474_v46 }
 0xaf8   : > { %3617 = vmatprep.subr.msk.bf16.mxu1 %vm1159_vm8, %v6475_v44  ;;  %v3332_v44 = vld [vmem:[%s6273_s21] sm:$0xff] }
 0xafa   : > { %3096 = vmatpush1.bf16.msra.mxu0 %v6476_v14 }
 0xafb   : > { %3137 = vmatpush1.bf16.msra.mxu1 %v6477_v42 }
 0xafd   : > { %3616 = vmatmul.mubr.msk.bf16.vlgmr.msra.gmra.mrb[40].mxu0 %vm1155_vm9, %v2985_v24 }
 0xafe   : > { %3618 = vmatmul.mubr.msk.bf16.vlgmr.msra.gmra.mrb[40].mxu1 %vm1155_vm9, %v2985_v24  ;;  %3385 = vmatprep.mubr.bf16.mxu0 %v6398_v48 }
 0xaff   : > { %3426 = vmatprep.mubr.bf16.mxu1 %v6398_v48 }
 0xbbc   : > { %v3036_v35 = vpop.f32.mrb[36].mxu0 }
 0xbbd   : > { %v3038_v5 = vpop.f32.mrb[37].mxu0  ;;  %v3077_v37 = vpop.f32.mrb[36].mxu1 }
 0xbbe   : > { %v3040_v52 = vpop.f32.mrb[38].mxu0  ;;  %v3079_v7 = vpop.f32.mrb[37].mxu1 }
 0xbbf   : > { %v3041_v43 = vpop.f32.mrb[39].mxu0  ;;  %v3081_v18 = vpop.f32.mrb[38].mxu1 }
 0xbc0   : > { %v3082_v15 = vpop.f32.mrb[39].mxu1  ;;  %v6478_v18 = vld [vmem:[#allocation14_spill] sm:$0xff] }
 0xbd0   : > { %v3121_v45 = vpop.f32.mrb[40].mxu0 }
 0xbd1   : > { %v3122_v16 = vadd.f32 %v3121_v45, %v3036_v35  ;;  %v3123_v8 = vpop.f32.mrb[41].mxu0  ;;  %v3162_v41 = vpop.f32.mrb[40].mxu1 }
 0xbd2   : > { %v3124_v4 = vadd.f32 %v3123_v8, %v3038_v5  ;;  %v3163_v20 = vadd.f32 %v3162_v41, %v3077_v37  ;;  %v3125_v38 = vpop.f32.mrb[42].mxu0  ;;  %v3164_v1 = vpop.f32.mrb[41].mxu1 }
 0xbd3   : > { %v3175_v19 = vadd.f32 %v3173_v34, %v3122_v16  ;;  %v3165_v40 = vadd.f32 %v3164_v1, %v3079_v7  ;;  %v3126_v48 = vpop.f32.mrb[43].mxu0  ;;  %v3166_v23 = vpop.f32.mrb[42].mxu1  ;;  %v6479_v38 = vld [vmem:[#allocation15_spill] sm:$0xff] }
 0xbd4   : > { %v3176_v17 = vadd.f32 %v3173_v34, %v3124_v4  ;;  %v3167_v6 = vpop.f32.mrb[43].mxu1  ;;  %v3177_v47 = vadd.f32 %v3173_v34, %v3163_v20 }
 0xbd5   : > { %v6013_v39 = vmax.f32 %v3175_v19, 0.0  ;;  %v3178_v33 = vadd.f32 %v3173_v34, %v3165_v40 }
 0xbd6   : > { %v6015_v3 = vmax.f32 %v3176_v17, 0.0  ;;  %v6021_v32 = vmax.f32 %v3177_v47, 0.0 }
 0xbd7   : > { %3183 = vrot.lane.b32.xlu0 %v6013_v39, %s3828_s20  ;;  %v6023_v46 = vmax.f32 %v3178_v33, 0.0 }
 0xbd8   : > { %3185 = vrot.lane.b32.xlu1 %v6015_v3, %s3828_s20 }
 0xbdb   : > { %3187 = vrot.lane.b32.xlu0 %v6021_v32, %s3828_s20 }
 0xbdc   : > { %3189 = vrot.lane.b32.xlu1 %v6023_v46, %s3828_s20 }
 0xbdf   : > { %3199 = vrot.lane.b32.xlu0 %v6013_v39, %s3829_s29 }
 0xbe0   : > { %3201 = vrot.lane.b32.xlu1 %v6015_v3, %s3829_s29 }
 0xbe3   : > { %3203 = vrot.lane.b32.xlu0 %v6021_v32, %s3829_s29 }
 0xbe4   : > { %3205 = vrot.lane.b32.xlu1 %v6023_v46, %s3829_s29  ;;  %s6483_s29 = sld [smem:[#allocation58_spill]] }
 0xbe7   : > { %3215 = vrot.lane.b32.xlu0 %v6013_v39, %s6399_s25 }
 0xbe8   : > { %3217 = vrot.lane.b32.xlu1 %v6015_v3, %s6399_s25 }
 0xbeb   : > { %3219 = vrot.lane.b32.xlu0 %v6021_v32, %s6399_s25 }
 0xbec   : > { %3221 = vrot.lane.b32.xlu1 %v6023_v46, %s6399_s25 }
 0xbef   : > { %3231 = vrot.lane.b32.xlu0 %v6013_v39, %s6400_s26 }
 0xbf0   : > { %3233 = vrot.lane.b32.xlu1 %v6015_v3, %s6400_s26 }
 0xbf3   : > { %3235 = vrot.lane.b32.xlu0 %v6021_v32, %s6400_s26 }
 0xbf4   : > { %3237 = vrot.lane.b32.xlu1 %v6023_v46, %s6400_s26  ;;  %s6480_s26 = sld [smem:[#allocation57_spill]] }
 0xbf7   : > { %3247 = vrot.lane.b32.xlu0 %v6013_v39, %s6401_s3 }
 0xbf8   : > { %3249 = vrot.lane.b32.xlu1 %v6015_v3, %s6401_s3 }
 0xbfa   : > { %v3331_v13 = vld [vmem:[%s6480_s26] sm:$0xf] }
 0xbfb   : > { %3251 = vrot.lane.b32.xlu0 %v6021_v32, %s6401_s3 }
 0xbfc   : > { %3253 = vrot.lane.b32.xlu1 %v6023_v46, %s6401_s3  ;;  %s6481_s3 = sld [smem:[#allocation10_spill]] }
 0xbff   : > { %3263 = vrot.lane.b32.xlu0 %v6013_v39, %s6402_s24 }
 0xc00   : > { %3265 = vrot.lane.b32.xlu1 %v6015_v3, %s6402_s24 }
 0xc03   : > { %3267 = vrot.lane.b32.xlu0 %v6021_v32, %s6402_s24 }
 0xc04   : > { %3269 = vrot.lane.b32.xlu1 %v6023_v46, %s6402_s24  ;;  %s6482_s24 = sld [smem:[#allocation13_spill]] }
 0xc07   : > { %3279 = vrot.lane.b32.xlu0 %v6013_v39, %s6403_s6 }
 0xc08   : > { %3281 = vrot.lane.b32.xlu1 %v6015_v3, %s6403_s6 }
 0xc0a   : > { %p6485_p11 = scmp.ne.s32.totalorder %s6482_s24, 0 }
 0xc0b   : > { %3283 = vrot.lane.b32.xlu0 %v6021_v32, %s6403_s6 }
 0xc0c   : > { %3285 = vrot.lane.b32.xlu1 %v6023_v46, %s6403_s6  ;;  %s3633_s6 = sshll.u32 %s6481_s3, 11  ;;  %s3757_s3 = scalar_lea.vmem %s6205_s4, 2048 }
 0xc0d   : > { %s6203_s25 = scalar_lea.hbm %s6483_s29, %s3633_s6  ;;  %p3758_p6 = scmp.ne.s32.totalorder %s6205_s4, %s3757_s3 }
 0xc0e   : > { %s3763_s6 = scalar_lea.vmem %s3762_s5, 4096 }
 0xc0f   : > { %3295 = vrot.lane.b32.xlu0 %v6013_v39, %s3835_s23  ;;  %p3759_p12 = pnand %p3758_p6, %p6485_p11  ;;  %p3765_p10 = scmp.lt.s32.totalorder %s3763_s6, %s3757_s3 }
 0xc10   : > { %3297 = vrot.lane.b32.xlu1 %v6015_v3, %s3835_s23 }
 0xc11   : > { %p3760_p13 = pneg %p3759_p12  ;;  %p3766_p0 = por %p3765_p10, %p3764_p8 }
 0xc13   : > { %3299 = vrot.lane.b32.xlu0 %v6021_v32, %s3835_s23  ;;  %p3767_p2 = pnand %p3766_p0, %p3760_p13 }
 0xc14   : > { %3301 = vrot.lane.b32.xlu1 %v6023_v46, %s3835_s23  ;;  %s6484_s23 = smov %s6483_s29 }
 0xc17   : > { %3335 = vperm.xlu0 %3693, %v3332_v44  }
 0xc49   : > { %v3184_v14 = vpop.permute.xlu0 %3183 }
 0xc4a   : > { %v3186_v24 = vpop.permute.xlu1 %3185 }
 0xc4b   : > { %v3193_v5 = vsel %vm729_vm0, %v3184_v14, %v3186_v24 }
 0xc4c   : > { %v3196_v43 = vmul.f32 %v3193_v5, %v4253_v22 }
 0xc4d   : > { %v3188_v42 = vpop.permute.xlu0 %3187 }
 0xc4e   : > { %v3190_v35 = vpop.permute.xlu1 %3189  ;;  %v3192_v8 = vsel %vm729_vm0, %v3186_v24, %v3188_v42 }
 0xc4f   : > { %v3191_v34 = vsel %vm729_vm0, %v3188_v42, %v3190_v35  ;;  %v3194_v45 = vsel %vm729_vm0, %v3190_v35, %v3184_v14  ;;  %v3197_v6 = vmul.f32 %v3192_v8, %v4276_v31 }
 0xc50   : > { %v3195_v40 = vmul.f32 %v3194_v45, %v4262_v25  ;;  %v3198_v48 = vmul.f32 %v3191_v34, %v4269_v29 }
 0xc51   : > { %v3200_v37 = vpop.permute.xlu0 %3199 }
 0xc52   : > { %v3202_v52 = vpop.permute.xlu1 %3201 }
 0xc53   : > { %v3209_v7 = vsel %vm762_vm1, %v3200_v37, %v3202_v52 }
 0xc54   : > { %v3212_v15 = vmul.f32 %v3209_v7, %v6478_v18 }
 0xc55   : > { %v3204_v16 = vpop.permute.xlu0 %3203 }
 0xc56   : > { %v3208_v41 = vsel %vm762_vm1, %v3202_v52, %v3204_v16  ;;  %v3206_v4 = vpop.permute.xlu1 %3205  ;;  %v3312_v20 = vpack.c.bf16 %v3212_v15, %v3196_v43 }
 0xc57   : > { %v3213_v1 = vmul.f32 %v3208_v41, %v6479_v38  ;;  %v3207_v22 = vsel %vm762_vm1, %v3204_v16, %v3206_v4  ;;  %v3210_v19 = vsel %vm762_vm1, %v3206_v4, %v3200_v37 }
 0xc58   : > { %v3211_v23 = vmul.f32 %v3210_v19, %v4265_v28  ;;  %v3214_v17 = vmul.f32 %v3207_v22, %v4272_v30  ;;  %3353 = vmatprep.subr.bf16.mxu0 %v3312_v20 }
 0xc59   : > { %v3216_v47 = vpop.permute.xlu0 %3215  ;;  %v3313_v24 = vpack.c.bf16 %v3213_v1, %v3197_v6 }
 0xc5a   : > { %v3311_v33 = vpack.c.bf16 %v3211_v23, %v3195_v40  ;;  %v3218_v44 = vpop.permute.xlu1 %3217  ;;  %v3314_v14 = vpack.c.bf16 %v3214_v17, %v3198_v48 }
 0xc5b   : > { %v3225_v25 = vsel %vm795_vm2, %v3216_v47, %v3218_v44 }
 0xc5c   : > { %3354 = vmatpush1.bf16.msra.mxu0 %v3311_v33  ;;  %3394 = vmatprep.subr.bf16.mxu1 %v3314_v14  ;;  %v3228_v31 = vmul.f32 %v3225_v25, %v4315_v61 }
 0xc5d   : > { %3395 = vmatpush1.bf16.msra.mxu1 %v3313_v24  ;;  %v3220_v42 = vpop.permute.xlu0 %3219 }
 0xc5e   : > { %v3222_v35 = vpop.permute.xlu1 %3221  ;;  %v3224_v43 = vsel %vm795_vm2, %v3218_v44, %v3220_v42 }
 0xc5f   : > { %v3223_v37 = vsel %vm795_vm2, %v3220_v42, %v3222_v35  ;;  %v3226_v52 = vsel %vm795_vm2, %v3222_v35, %v3216_v47  ;;  %v3229_v20 = vmul.f32 %v3224_v43, %v4326_v11 }
 0xc60   : > { %v3227_v16 = vmul.f32 %v3226_v52, %v4323_v9  ;;  %v3230_v8 = vmul.f32 %v3223_v37, %v4329_v12 }
 0xc61   : > { %v3232_v29 = vpop.permute.xlu0 %3231 }
 0xc62   : > { %v3234_v28 = vpop.permute.xlu1 %3233 }
 0xc63   : > { %v3241_v30 = vsel %vm828_vm3, %v3232_v29, %v3234_v28 }
 0xc64   : > { %v3244_v5 = vmul.f32 %v3241_v30, %v4318_v62 }
 0xc65   : > { %v3236_v7 = vpop.permute.xlu0 %3235 }
 0xc66   : > { %v3240_v18 = vsel %vm828_vm3, %v3234_v28, %v3236_v7  ;;  %v3238_v15 = vpop.permute.xlu1 %3237  ;;  %v3316_v34 = vpack.c.bf16 %v3244_v5, %v3228_v31 }
 0xc67   : > { %v3245_v45 = vmul.f32 %v3240_v18, %v4339_v27  ;;  %v3239_v61 = vsel %vm828_vm3, %v3236_v7, %v3238_v15  ;;  %v3242_v62 = vsel %vm828_vm3, %v3238_v15, %v3232_v29 }
 0xc68   : > { %v3243_v41 = vmul.f32 %v3242_v62, %v4336_v26  ;;  %v3246_v4 = vmul.f32 %v3239_v61, %v4346_v36  ;;  %3355 = vmatprep.subr.bf16.mxu0 %v3316_v34 }
 0xc69   : > { %v3248_v38 = vpop.permute.xlu0 %3247  ;;  %v3317_v19 = vpack.c.bf16 %v3245_v45, %v3229_v20 }
 0xc6a   : > { %v3315_v1 = vpack.c.bf16 %v3243_v41, %v3227_v16  ;;  %v3250_v27 = vpop.permute.xlu1 %3249  ;;  %v3318_v22 = vpack.c.bf16 %v3246_v4, %v3230_v8 }
 0xc6b   : > { %v3257_v40 = vsel %vm861_vm4, %v3248_v38, %v3250_v27 }
 0xc6c   : > { %3356 = vmatpush1.bf16.msra.mxu0 %v3315_v1  ;;  %3396 = vmatprep.subr.bf16.mxu1 %v3318_v22  ;;  %v3259_v12 = vmul.f32 %v3257_v40, %v4365_v56 }
 0xc6d   : > { %3397 = vmatpush1.bf16.msra.mxu1 %v3317_v19  ;;  %v3252_v9 = vpop.permute.xlu0 %3251 }
 0xc6e   : > { %v3256_v26 = vsel %vm861_vm4, %v3250_v27, %v3252_v9  ;;  %v3254_v36 = vpop.permute.xlu1 %3253  ;;  %v3319_v56 = vpack.c.bf16 %v3259_v12, %v6013_v39 }
 0xc6f   : > { %v3260_v11 = vmul.f32 %v3256_v26, %v4373_v59  ;;  %v3255_v48 = vsel %vm861_vm4, %v3252_v9, %v3254_v36  ;;  %v3258_v23 = vsel %vm861_vm4, %v3254_v36, %v3248_v38 }
 0xc70   : > { %v3261_v17 = vmul.f32 %v3255_v48, %v4376_v60  ;;  %v3262_v6 = vmul.f32 %v3258_v23, %v4368_v57 }
 0xc71   : > { %v3264_v47 = vpop.permute.xlu0 %3263  ;;  %v3320_v33 = vpack.c.bf16 %v3260_v11, %v6015_v3 }
 0xc72   : > { %v3321_v44 = vpack.c.bf16 %v3261_v17, %v6021_v32  ;;  %v3266_v14 = vpop.permute.xlu1 %3265  ;;  %v3322_v59 = vpack.c.bf16 %v3262_v6, %v6023_v46 }
 0xc73   : > { %3357 = vmatprep.subr.bf16.mxu0 %v3320_v33  ;;  %v3273_v57 = vsel %vm894_vm6, %v3264_v47, %v3266_v14 }
 0xc74   : > { %3358 = vmatpush1.bf16.msra.mxu0 %v3319_v56  ;;  %3398 = vmatprep.subr.bf16.mxu1 %v3322_v59  ;;  %v3275_v29 = vmul.f32 %v3273_v57, %v4428_v58 }
 0xc75   : > { %3399 = vmatpush1.bf16.msra.mxu1 %v3321_v44  ;;  %v3268_v24 = vpop.permute.xlu0 %3267 }
 0xc76   : > { %v3270_v42 = vpop.permute.xlu1 %3269  ;;  %v3272_v39 = vsel %vm894_vm6, %v3266_v14, %v3268_v24 }
 0xc77   : > { %v3271_v32 = vsel %vm894_vm6, %v3268_v24, %v3270_v42  ;;  %v3274_v46 = vsel %vm894_vm6, %v3270_v42, %v3264_v47  ;;  %v3276_v5 = vmul.f32 %v3272_v39, %v4400_v0 }
 0xc78   : > { %v3277_v43 = vmul.f32 %v3271_v32, %v4405_v49  ;;  %v3278_v58 = vmul.f32 %v3274_v46, %v4397_v2 }
 0xc79   : > { %v3280_v35 = vpop.permute.xlu0 %3279 }
 0xc7a   : > { %v3282_v60 = vpop.permute.xlu1 %3281 }
 0xc7b   : > { %v3289_v3 = vsel %vm927_vm5, %v3280_v35, %v3282_v60 }
 0xc7c   : > { %v3291_v28 = vmul.f32 %v3289_v3, %v4410_v50 }
 0xc7d   : > { %v3284_v25 = vpop.permute.xlu0 %3283 }
 0xc7e   : > { %v3288_v30 = vsel %vm927_vm5, %v3282_v60, %v3284_v25  ;;  %v3286_v31 = vpop.permute.xlu1 %3285  ;;  %v3323_v45 = vpack.c.bf16 %v3291_v28, %v3275_v29 }
 0xc7f   : > { %v3292_v37 = vmul.f32 %v3288_v30, %v4421_v54  ;;  %v3287_v52 = vsel %vm927_vm5, %v3284_v25, %v3286_v31  ;;  %v3290_v7 = vsel %vm927_vm5, %v3286_v31, %v3280_v35 }
 0xc80   : > { %v3293_v50 = vmul.f32 %v3287_v52, %v4424_v55  ;;  %v3294_v18 = vmul.f32 %v3290_v7, %v4418_v53 }
 0xc81   : > { %v3296_v15 = vpop.permute.xlu0 %3295  ;;  %v3324_v34 = vpack.c.bf16 %v3292_v37, %v3276_v5 }
 0xc82   : > { %v3325_v0 = vpack.c.bf16 %v3293_v50, %v3277_v43  ;;  %v3298_v61 = vpop.permute.xlu1 %3297  ;;  %v3326_v54 = vpack.c.bf16 %v3294_v18, %v3278_v58 }
 0xc83   : > { %v3305_v62 = vsel %vm960_vm7, %v3296_v15, %v3298_v61  ;;  %3359 = vmatprep.subr.bf16.mxu0 %v3324_v34 }
 0xc84   : > { %v3307_v16 = vmul.f32 %v3305_v62, %v4437_v21  ;;  %3360 = vmatpush1.bf16.msra.mxu0 %v3323_v45  ;;  %3400 = vmatprep.subr.bf16.mxu1 %v3326_v54 }
 0xc85   : > { %3401 = vmatpush1.bf16.msra.mxu1 %v3325_v0  ;;  %v3300_v2 = vpop.permute.xlu0 %3299 }
 0xc86   : > { %v3304_v49 = vsel %vm960_vm7, %v3298_v61, %v3300_v2  ;;  %v3302_v53 = vpop.permute.xlu1 %3301  ;;  %v3327_v55 = vpack.c.bf16 %v3307_v16, %v3307_v16 }
 0xc87   : > { %v3308_v8 = vmul.f32 %v3304_v49, %v4466_v51  ;;  %v3303_v41 = vsel %vm960_vm7, %v3300_v2, %v3302_v53  ;;  %v3306_v4 = vsel %vm960_vm7, %v3302_v53, %v3296_v15 }
 0xc88   : > { %v3309_v20 = vmul.f32 %v3303_v41, %v4470_v63  ;;  %v3310_v21 = vmul.f32 %v3306_v4, %v4463_v10  ;;  %v3342_v22 = vsel %vm1159_vm8, %v3327_v55, 0 }
 0xc89   : > { %v3328_v38 = vpack.c.bf16 %v3308_v8, %v3308_v8 }
 0xc8a   : > { %v3329_v1 = vpack.c.bf16 %v3309_v20, %v3309_v20  ;;  %v3330_v27 = vpack.c.bf16 %v3310_v21, %v3310_v21 }
 0xc8b   : > { %3619 = vmatprep.subr.msk.bf16.mxu0 %vm1159_vm8, %v3328_v38 }
 0xc8c   : > { %3362 = vmatpush1.bf16.msra.mxu0 %v3342_v22  ;;  %3621 = vmatprep.subr.msk.bf16.mxu1 %vm1159_vm8, %v3330_v27  ;;  %v3348_v51 = vsel %vm1159_vm8, %v3329_v1, 0 }
 0xc8d   : > { %3403 = vmatpush1.bf16.msra.mxu1 %v3348_v51 }
 0xc8f   : > { %3620 = vmatmul.mubr.msk.bf16.vlgmr.msra.gmra.mrb[44].mxu0 %vm1155_vm9, %v3331_v13 }
 0xc90   : > { %3622 = vmatmul.mubr.msk.bf16.vlgmr.msra.gmra.mrb[44].mxu1 %vm1155_vm9, %v3331_v13 }
 0xc96   : > { %v3336_v10 = vpop.permute.xlu0 %3335 }
 0xd62   : > { %v3387_v63 = vpop.f32.mrb[44].mxu0 }
 0xd63   : > { %v3388_v19 = vadd.f32 %v3387_v63, %v3336_v10  ;;  %v3389_v40 = vpop.f32.mrb[45].mxu0  ;;  %v3428_v9 = vpop.f32.mrb[44].mxu1 }
 0xd64   : > { %v3390_v12 = vadd.f32 %v3389_v40, %v3336_v10  ;;  %v3429_v26 = vadd.f32 %v3428_v9, %v3336_v10  ;;  %v3391_v36 = vpop.f32.mrb[46].mxu0  ;;  %v3430_v11 = vpop.f32.mrb[45].mxu1 }
 0xd65   : > { %v3623_v48 = vmul.f32 -1.442695, %v3388_v19  ;;  %v3431_v23 = vadd.f32 %v3430_v11, %v3336_v10  ;;  %v3392_v17 = vpop.f32.mrb[47].mxu0  ;;  %v3432_v6 = vpop.f32.mrb[46].mxu1 }
 0xd66   : > { %v3624_v47 = vmul.f32 -1.442695, %v3390_v12  ;;  %v3625_v33 = vmul.f32 -1.442695, %v3429_v26  ;;  %v3433_v56 = vpop.f32.mrb[47].mxu1 }
 0xd67   : > { %3711 = vpow2.f32 %v3623_v48  ;;  %v3626_v44 = vmul.f32 -1.442695, %v3431_v23 }
 0xd68   : > { %3713 = vpow2.f32 %v3624_v47 }
 0xd69   : > { %3715 = vpow2.f32 %v3625_v33 }
 0xd6a   : > { %3717 = vpow2.f32 %v3626_v44 }
 0xd71   : > { %v3712_v14 = vpop.eup %3711 }
 0xd72   : > { %v3714_v59 = vpop.eup %3713  ;;  %v3447_v24 = vadd.f32 1.0, %v3712_v14 }
 0xd73   : > { %v3716_v42 = vpop.eup %3715  ;;  %v3448_v35 = vadd.f32 1.0, %v3714_v59 }
 0xd74   : > { %v3718_v60 = vpop.eup %3717  ;;  %3719 = vrcp.f32 %v3447_v24  ;;  %v3449_v57 = vadd.f32 1.0, %v3716_v42 }
 0xd75   : > { %3721 = vrcp.f32 %v3448_v35  ;;  %v3450_v3 = vadd.f32 1.0, %v3718_v60 }
 0xd76   : > { %3723 = vrcp.f32 %v3449_v57 }
 0xd77   : > { %3725 = vrcp.f32 %v3450_v3 }
 0xd7e   : > { %v3720_v39 = vpop.eup %3719 }
 0xd7f   : > { %v3722_v32 = vpop.eup %3721  ;;  %3471 = vst [vmem:[%s4914_s0 + $0x60] sm:$0xff] %v3720_v39 }
 0xd80   : > { %v3724_v46 = vpop.eup %3723  ;;  %3472 = vst [vmem:[%s4914_s0 + $0x68] sm:$0xff] %v3722_v32 }
 0xd81   : > { %v3726_v25 = vpop.eup %3725  ;;  %3473 = vst [vmem:[%s4914_s0 + $0x70] sm:$0xff] %v3724_v46 }
 0xd82   : > { %3474 = vst [vmem:[%s4914_s0 + $0x78] sm:$0xff] %v3726_v25 }
 0xd83   : > { %3770 = shalt.err (!%p3767_p2)
}
 0xd84   : > { %s3771_s0 = scalar_lea.hbm %s6203_s25, 2048  ;;  %s3775_s7 = scalar_lea.hbm %s6484_s23, 4096 }
 0xd85   : > { %p3772_p4 = scmp.ne.s32.totalorder %s6203_s25, %s3771_s0  ;;  %p3776_p9 = scmp.lt.u32.totalorder %s6203_s25, %s6484_s23 }
 0xd86   : > { %p3777_p1 = scmp.lt.u32.totalorder %s3775_s7, %s3771_s0  ;;  %p3779_p6 = scmp.lt.u32.totalorder %s3771_s0, %s6203_s25 }
 0xd87   : > { %p3773_p5 = pnand %p3772_p4, %p6485_p11 }
 0xd88   : > { %p3778_p3 = por %p3777_p1, %p3776_p9 }
 0xd89   : > { %p3774_p7 = pneg %p3773_p5 }
 0xd8a   : > { %p3780_p12 = por %p3779_p6, %p3778_p3 }
 0xd8c   : > { %p3781_p13 = pnand %p3780_p12, %p3774_p7 }
 0xd8e   : > { %3784 = shalt.err (!%p3781_p13)
}
 0xd8f   : > { %s3838_s3 = smov 512   ;;  %s3839_s6 = smov 32  }
 0xd90   : > { %s6486_s8 = scalar_lea.sflag [#allocation4], %s4059_s1 }
 0xd91   : > { %3636 = dma.vmem_to_hbm [thread:$0]  (%p6485_p11), %s6205_s4, 2048, %s6203_s25, %s6486_s8, %s3838_s3, %s3838_s3, %s3839_s6  }
 0xd92 PF: > { %s6487_s20 = sld [smem:[#allocation8_spill]]  ;;  %p6488_p8 = scmp.ne.s32.totalorder %s6368_s2, 0 }
 0xd93   : > { %p6489_p10 = scmp.ge.s32.totalorder %s3823_s30, 2 }
 0xd95   : > { %p3643_p0 = pnand %p6489_p10, %p6488_p8 }
 0xd98   : > { %s3504_s26 = sand.u32 1, %s6487_s20  }
 0xd99   : > { %s3505_s0 = scalar_lea.sflag [#allocation4], %s3504_s26 }
 0xd9a   : > { %3806 = dma.done.wait (!%p3643_p0), %s3505_s0, 2048  }
 0xd9b   : > { %3808 = vsyncadd (!%p3643_p0), %s3505_s0, 4294965248  ;;  %s6490_s30 = sld [smem:[#allocation11_spill]]  ;;  %s6491_s29 = sld [smem:[#allocation9_spill]] }
 0xd9c   : > { %s6492_s7 = sld [smem:[#allocation12_spill]]  ;;  %s6493_s3 = smov %s3815_s28 }
 0xda1   : > { %p35_p2 = scmp.ge.s32.totalorder %s6490_s30, 4   ;;  %s6494_s28 = smov %s6491_s29 }
 0xda2   : > { %s6495_s29 = smov %s6492_s7 }
 0xda3   :  { %37 = sbr.rel (!%p35_p2) target bundleno = 17 (0x11), region = 153 }
 0xdaa   :  { %3510 = vsyncpa [#allocation3], 1 }
 0xdab   :  { %3512 = vsyncpa [#allocation3 + $0x1], 1 }
 0xdac   :  { %3513 = vsyncpa [#allocation4], 1 }
 0xdad   :  { %3515 = vsyncpa [#allocation4 + $0x1], 1 }

</bundles_post_ra>
